<compile_context>
chip_gen: v7x
topology: tpu7x:2x2x1
jax: 0.10.0
libtpu: 0.0.40
codegen_flags: <defaults>
</compile_context>

<pallas_src>
import functools

import jax
import jax.numpy as jnp
from jax import lax
from jax.experimental import pallas as pl
from jax.experimental.pallas import tpu as pltpu


def _round_up(x, m):
    return ((x + m - 1) // m) * m


# --------------------------------------------------------------------------
# Pallas kernel: one batch element per grid step, fully fused bottleneck.
# --------------------------------------------------------------------------
def _bottleneck_kernel(x_ref, wa_ref, wb_ref, wc_ref,
                       ba_ref, bb_ref, bc_ref,
                       o_ref, apad_ref, *,
                       H, W, Cin, Cm, Cout, str1, str3, dil, Wb_c, Hp, Wp):
    Ha = (H - 1) // str1 + 1
    Wa = (W - 1) // str1 + 1
    Hb = (Ha - 1) // str3 + 1
    Wb = (Wa - 1) // str3 + 1

    # ---- conv a: 1x1 (matmul over channels, BN scale pre-folded) + ReLU ----
    if str1 > 1:
        x = x_ref[0, pl.ds(0, Ha, stride=str1), pl.ds(0, Wa, stride=str1), :]
    else:
        x = x_ref[0]                                   # (H, W, Cin) bf16
    a = jnp.dot(x.reshape(Ha * Wa, Cin), wa_ref[...],
                preferred_element_type=jnp.float32)
    a = jnp.maximum(a + ba_ref[...], 0.0).astype(jnp.bfloat16)   # (Ha*Wa, Cm)

    # ---- padded copy of `a`: zero the halo / alignment strips, write interior
    # (strips re-zeroed each step: the batch grid axis may be core-split, so a
    #  "first step only" guard is not safe; the strips are small.)
    apad_ref[0:dil, :, :] = jnp.zeros((dil, Wp, Cm), jnp.bfloat16)
    apad_ref[dil + Ha:Hp, :, :] = jnp.zeros((Hp - dil - Ha, Wp, Cm),
                                            jnp.bfloat16)
    apad_ref[dil:dil + Ha, 0:dil, :] = jnp.zeros((Ha, dil, Cm), jnp.bfloat16)
    apad_ref[dil:dil + Ha, dil + Wa:Wp, :] = jnp.zeros(
        (Ha, Wp - dil - Wa, Cm), jnp.bfloat16)
    apad_ref[dil:dil + Ha, dil:dil + Wa, :] = a.reshape(Ha, Wa, Cm)

    # ---- conv b: 3x3 (stride/dilation/groups) as accumulating tap matmuls --
    def tap(kh, kw):
        if str3 > 1:
            p = apad_ref[pl.ds(kh * dil, Hb, stride=str3),
                         pl.ds(kw * dil, Wb_c, stride=str3), :]
        else:
            p = apad_ref[pl.ds(kh * dil, Hb), pl.ds(kw * dil, Wb_c), :]
        return p.reshape(Hb * Wb_c, Cm)

    # Pair taps (K = 2*Cm) when channels are narrow so the 256-deep MXUs on
    # v6e/v7x are fully loaded; with Cm >= 256 a single tap already fills them.
    group = 2 if Cm < 256 else 1
    acc = jnp.zeros((Hb * Wb_c, Cm), jnp.float32)
    t = 0
    while t < 9:
        g = min(group, 9 - t)
        pieces = [tap((t + j) // 3, (t + j) % 3) for j in range(g)]
        lhs = pieces[0] if g == 1 else jnp.concatenate(pieces, axis=1)
        acc = acc + jnp.dot(lhs, wb_ref[pl.ds(t * Cm, g * Cm), :],
                            preferred_element_type=jnp.float32)
        t += g
    b = jnp.maximum(acc + bb_ref[...], 0.0).astype(jnp.bfloat16)  # (Hb*Wb_c,Cm)

    # ---- conv c: 1x1 -> BN bias (no ReLU), bf16 writeback -------------------
    c = jnp.dot(b, wc_ref[...], preferred_element_type=jnp.float32)
    c = (c + bc_ref[...]).astype(jnp.bfloat16).reshape(Hb, Wb_c, Cout)
    if Wb_c == Wb:
        o_ref[0] = c
    else:
        o_ref[0] = c[:, :Wb, :]


# --------------------------------------------------------------------------
# Production wrapper: NHWC, channel-padded, bf16 in -> NHWC padded bf16 out.
# --------------------------------------------------------------------------
def bottleneck_transform(x_nhwc, kparams, *, stride=1, dilation=1,
                         stride_1x1=False):
    wa, wb2d, wc, ba, bb, bc = kparams                 # channel-padded, folded
    N, H, W, Cin_p = x_nhwc.shape
    Cm_p = wa.shape[1]
    Cout_p = wc.shape[1]
    str1, str3 = (stride, 1) if stride_1x1 else (1, stride)
    dil = dilation

    Ha = (H - 1) // str1 + 1
    Wa = (W - 1) // str1 + 1
    Hb = (Ha - 1) // str3 + 1
    Wb = (Wa - 1) // str3 + 1
    Wb_c = _round_up(Wb, 8)                 # sublane-aligned conv-b/c width
    Wa_need = (Wb_c - 1) * str3 + 1         # scratch width the taps must reach
    Hp = Ha + 2 * dil
    Wp = max(Wa, Wa_need) + 2 * dil

    kernel = functools.partial(
        _bottleneck_kernel, H=H, W=W, Cin=Cin_p, Cm=Cm_p, Cout=Cout_p,
        str1=str1, str3=str3, dil=dil, Wb_c=Wb_c, Hp=Hp, Wp=Wp)

    def full_spec(arr):
        nd = arr.ndim
        return pl.BlockSpec(arr.shape, lambda n, _nd=nd: (0,) * _nd)

    # ~3/4 of physical VMEM, capped: ~96 MiB on v5e/v6e, ~48 MiB on v7x.
    try:
        vmem_cap = pltpu.get_tpu_info().vmem_capacity_bytes
    except Exception:
        vmem_cap = 64 * 1024 * 1024
    vmem_limit = min(int(vmem_cap * 3 // 4), 100 * 1024 * 1024)

    out_nhwc = pl.pallas_call(
        kernel,
        out_shape=jax.ShapeDtypeStruct((N, Hb, Wb, Cout_p), jnp.bfloat16),
        grid_spec=pltpu.PrefetchScalarGridSpec(
            num_scalar_prefetch=0,
            grid=(N,),
            in_specs=[
                pl.BlockSpec((1, H, W, Cin_p), lambda n: (n, 0, 0, 0)),
                full_spec(wa), full_spec(wb2d), full_spec(wc),
                full_spec(ba), full_spec(bb), full_spec(bc),
            ],
            out_specs=pl.BlockSpec((1, Hb, Wb, Cout_p), lambda n: (n, 0, 0, 0)),
            scratch_shapes=[pltpu.VMEM((Hp, Wp, Cm_p), jnp.bfloat16)],
        ),
        compiler_params=pltpu.CompilerParams(
            dimension_semantics=("parallel",),
            vmem_limit_bytes=vmem_limit),
    )(x_nhwc, wa, wb2d, wc, ba, bb, bc)
    return out_nhwc


# --------------------------------------------------------------------------
# Test-only NCHW adapter.  Layout conversion / channel padding is kept OUT of
# the production NHWC path (avoids extra per-call HBM passes around the kernel).
# --------------------------------------------------------------------------
def bottleneck_transform_nchw(x_nchw, kparams, *, dim_out, stride=1,
                              dilation=1, stride_1x1=False):
    N, Cin, H, W = x_nchw.shape
    Cin_p = kparams[0].shape[0]
    x = jnp.transpose(x_nchw, (0, 2, 3, 1)).astype(jnp.bfloat16)
    if Cin_p > Cin:
        x = jnp.pad(x, ((0, 0), (0, 0), (0, 0), (0, Cin_p - Cin)))
    y = bottleneck_transform(x, kparams, stride=stride, dilation=dilation,
                             stride_1x1=stride_1x1)
    y = y[..., :dim_out].astype(jnp.float32)
    return jnp.transpose(y, (0, 3, 1, 2))


# --------------------------------------------------------------------------
# Deterministic parameter construction (PyTorch-convention shapes, then
# rearranged/folded/padded for the kernel's matmul form).
# --------------------------------------------------------------------------
def init_params(key, dim_in, dim_out, dim_inner, num_groups, eps=1e-5,
                lane=128):
    cpg = dim_inner // num_groups                      # in-channels per group
    opg = dim_inner // num_groups                      # out-channels per group
    ks = jax.random.split(key, 15)

    wa_oihw = 0.1 * jax.random.normal(ks[0], (dim_inner, dim_in, 1, 1), jnp.float32)
    wb_oihw = 0.1 * jax.random.normal(ks[1], (dim_inner, cpg, 3, 3), jnp.float32)
    wc_oihw = 0.1 * jax.random.normal(ks[2], (dim_out, dim_inner, 1, 1), jnp.float32)

    def make_bn(kg, kb, km, kv, C):
        gamma = 1.0 + 0.1 * jax.random.normal(kg, (C,), jnp.float32)
        beta = 0.1 * jax.random.normal(kb, (C,), jnp.float32)
        rmean = 0.1 * jax.random.normal(km, (C,), jnp.float32)
        rvar = 1.0 + 0.1 * jax.random.uniform(kv, (C,), jnp.float32)
        scale = gamma / jnp.sqrt(rvar + eps)
        bias = beta - rmean * scale
        return scale, bias

    sa, ba = make_bn(ks[3], ks[4], ks[5], ks[6], dim_inner)
    sb, bb = make_bn(ks[7], ks[8], ks[9], ks[10], dim_inner)
    sc, bc = make_bn(ks[11], ks[12], ks[13], ks[14], dim_out)

    Cin_p = _round_up(dim_in, lane)
    Cm_p = _round_up(dim_inner, lane)
    Cout_p = _round_up(dim_out, lane)

    # conv-a weight: (Cin, Cinner), BN scale folded into output channels.
    wa = wa_oihw[:, :, 0, 0].T * sa[None, :]
    wa_p = jnp.zeros((Cin_p, Cm_p), jnp.float32).at[:dim_in, :dim_inner].set(wa)

    # conv-b: grouped weight -> block-diagonal full (3,3,Cinner,Cinner),
    # BN scale folded, then padded + reshaped so row index = (kh*3+kw)*Cm_p+cin.
    wb_hwio = jnp.transpose(wb_oihw, (2, 3, 1, 0))     # (3,3,cpg,Cinner)
    wb_full = jnp.zeros((3, 3, dim_inner, dim_inner), jnp.float32)
    for g in range(num_groups):
        wb_full = wb_full.at[:, :, g * cpg:(g + 1) * cpg,
                             g * opg:(g + 1) * opg].set(
            wb_hwio[:, :, :, g * opg:(g + 1) * opg])
    wb_full = wb_full * sb[None, None, None, :]
    wb_pad = jnp.zeros((3, 3, Cm_p, Cm_p), jnp.float32).at[
        :, :, :dim_inner, :dim_inner].set(wb_full)
    wb2d = wb_pad.reshape(9 * Cm_p, Cm_p)

    # conv-c weight: (Cinner, Cout), BN scale folded.
    wc = wc_oihw[:, :, 0, 0].T * sc[None, :]
    wc_p = jnp.zeros((Cm_p, Cout_p), jnp.float32).at[:dim_inner, :dim_out].set(wc)

    pad1 = lambda v, C: jnp.zeros((1, C), jnp.float32).at[0, :v.shape[0]].set(v)

    kparams = (wa_p.astype(jnp.bfloat16),
               wb2d.astype(jnp.bfloat16),
               wc_p.astype(jnp.bfloat16),
               pad1(ba, Cm_p), pad1(bb, Cm_p), pad1(bc, Cout_p))
    ref_params = dict(wa_oihw=wa_oihw, wb_oihw=wb_oihw, wc_oihw=wc_oihw,
                      sa=sa, ba=ba, sb=sb, bb=bb, sc=sc, bc=bc)
    return kparams, ref_params


# --------------------------------------------------------------------------
# Pure-JAX (lax.conv, f32) reference for correctness checking.
# --------------------------------------------------------------------------
def reference_forward(x, p, *, stride, dilation, num_groups, stride_1x1):
    str1, str3 = (stride, 1) if stride_1x1 else (1, stride)
    dn = ("NCHW", "OIHW", "NCHW")
    bn = lambda y, s, b: y * s[None, :, None, None] + b[None, :, None, None]

    y = lax.conv_general_dilated(x, p["wa_oihw"], (str1, str1), "VALID",
                                 dimension_numbers=dn)
    y = jnp.maximum(bn(y, p["sa"], p["ba"]), 0.0)
    y = lax.conv_general_dilated(y, p["wb_oihw"], (str3, str3),
                                 padding=[(dilation, dilation)] * 2,
                                 rhs_dilation=(dilation, dilation),
                                 feature_group_count=num_groups,
                                 dimension_numbers=dn)
    y = jnp.maximum(bn(y, p["sb"], p["bb"]), 0.0)
    y = lax.conv_general_dilated(y, p["wc_oihw"], (1, 1), "VALID",
                                 dimension_numbers=dn)
    return bn(y, p["sc"], p["bc"])


if __name__ == "__main__":
    key = jax.random.PRNGKey(0)
    kx, kp = jax.random.split(key)

    # Small shapes consistent with the module: N=2, dim_in=4, 16x16 spatial,
    # dim_inner=8, dim_out=16, standard ResNet settings.
    N, dim_in, H, W = 2, 4, 16, 16
    dim_inner, dim_out = 8, 16
    stride, dilation, num_groups, stride_1x1 = 1, 1, 1, False

    x = jax.random.normal(kx, (N, dim_in, H, W), jnp.float32)
    kparams, ref_params = init_params(kp, dim_in, dim_out, dim_inner, num_groups)

    out = bottleneck_transform_nchw(x, kparams, dim_out=dim_out, stride=stride,
                                    dilation=dilation, stride_1x1=stride_1x1)
    out = jax.block_until_ready(out)

    ref = reference_forward(x, ref_params, stride=stride, dilation=dilation,
                            num_groups=num_groups, stride_1x1=stride_1x1)
    ref = jax.block_until_ready(ref)

    assert out.shape == ref.shape == (N, dim_out, H, W), (out.shape, ref.shape)
    max_err = float(jnp.max(jnp.abs(out - ref)))
    tol = 1e-2 + 2e-2 * float(jnp.max(jnp.abs(ref)))   # bf16 matmul inputs/output
    if max_err < tol:
        print("KERNEL_OK")
    else:
        print(f"MISMATCH max_abs_err={max_err} tol={tol}")
</pallas_src>

<mosaic_0001>
module attributes {stable_mosaic.version = 11 : i64} {
  func.func @_bottleneck_kernel(%arg0: i32, %arg1: memref<1x16x16x128xbf16, #tpu.memory_space<vmem>>, %arg2: memref<128x128xbf16, #tpu.memory_space<vmem>>, %arg3: memref<1152x128xbf16, #tpu.memory_space<vmem>>, %arg4: memref<128x128xbf16, #tpu.memory_space<vmem>>, %arg5: memref<1x128xf32, #tpu.memory_space<vmem>>, %arg6: memref<1x128xf32, #tpu.memory_space<vmem>>, %arg7: memref<1x128xf32, #tpu.memory_space<vmem>>, %arg8: memref<1x16x16x128xbf16, #tpu.memory_space<vmem>>, %arg9: memref<18x18x128xbf16, #tpu.memory_space<vmem>>) attributes {dimension_semantics = [#tpu.dimension_semantics<parallel>], iteration_bounds = array<i64: 2>, scalar_prefetch = 0 : i64, scratch_operands = 1 : i64, tpu.core_type = #tpu.core_type<tc>, window_params = [{transform_indices = @transform_0, window_bounds = array<i64: 1, 16, 16, 128>}, {pipeline_mode = #tpu.pipeline_mode<synchronous>, transform_indices = @transform_1, window_bounds = array<i64: 128, 128>}, {pipeline_mode = #tpu.pipeline_mode<synchronous>, transform_indices = @transform_2, window_bounds = array<i64: 1152, 128>}, {pipeline_mode = #tpu.pipeline_mode<synchronous>, transform_indices = @transform_3, window_bounds = array<i64: 128, 128>}, {pipeline_mode = #tpu.pipeline_mode<synchronous>, transform_indices = @transform_4, window_bounds = array<i64: 1, 128>}, {pipeline_mode = #tpu.pipeline_mode<synchronous>, transform_indices = @transform_5, window_bounds = array<i64: 1, 128>}, {pipeline_mode = #tpu.pipeline_mode<synchronous>, transform_indices = @transform_6, window_bounds = array<i64: 1, 128>}, {transform_indices = @transform_7, window_bounds = array<i64: 1, 16, 16, 128>}]} {
    %c0 = arith.constant 0 : index
    %c0_0 = arith.constant 0 : index
    %c0_1 = arith.constant 0 : index
    %c0_2 = arith.constant 0 : index
    %0 = vector.load %arg1[%c0, %c0_0, %c0_1, %c0_2] : memref<1x16x16x128xbf16, #tpu.memory_space<vmem>>, vector<1x16x16x128xbf16>
    %1 = vector.shape_cast %0 : vector<1x16x16x128xbf16> to vector<16x16x128xbf16>
    %2 = vector.shape_cast %1 : vector<16x16x128xbf16> to vector<256x128xbf16>
    %c0_3 = arith.constant 0 : index
    %c0_4 = arith.constant 0 : index
    %3 = vector.load %arg2[%c0_3, %c0_4] : memref<128x128xbf16, #tpu.memory_space<vmem>>, vector<128x128xbf16>
    %cst = arith.constant dense<0.000000e+00> : vector<256x128xf32>
    %4 = tpu.matmul %2, %3, %cst {dimension_numbers = #tpu.dot_dimension_numbers<[1], [0], [0], [1], [0, 0, 1, 1], [], []>} : vector<256x128xbf16>, vector<128x128xbf16>, vector<256x128xf32> -> vector<256x128xf32>
    %c0_5 = arith.constant 0 : index
    %c0_6 = arith.constant 0 : index
    %5 = vector.load %arg5[%c0_5, %c0_6] : memref<1x128xf32, #tpu.memory_space<vmem>>, vector<1x128xf32>
    %6 = vector.broadcast %5 : vector<1x128xf32> to vector<256x128xf32>
    %7 = arith.addf %4, %6 : vector<256x128xf32>
    %cst_7 = arith.constant 0.000000e+00 : f32
    %8 = vector.broadcast %cst_7 : f32 to vector<256x128xf32>
    %9 = arith.maximumf %7, %8 : vector<256x128xf32>
    %10 = arith.truncf %9 : vector<256x128xf32> to vector<256x128xbf16>
    %cst_8 = arith.constant 0.000000e+00 : bf16
    %11 = vector.broadcast %cst_8 : bf16 to vector<1x18x128xbf16>
    %c0_9 = arith.constant 0 : index
    %c0_10 = arith.constant 0 : index
    %c0_11 = arith.constant 0 : index
    %12 = vector.load %arg9[%c0_9, %c0_10, %c0_11] : memref<18x18x128xbf16, #tpu.memory_space<vmem>>, vector<1x18x128xbf16>
    tpu.vector_store %arg9[%c0_9, %c0_10, %c0_11], %11 {strides = array<i32>} : memref<18x18x128xbf16, #tpu.memory_space<vmem>>, vector<1x18x128xbf16>,
    %cst_12 = arith.constant 0.000000e+00 : bf16
    %13 = vector.broadcast %cst_12 : bf16 to vector<1x18x128xbf16>
    %c17 = arith.constant 17 : index
    %c0_13 = arith.constant 0 : index
    %c0_14 = arith.constant 0 : index
    %14 = vector.load %arg9[%c17, %c0_13, %c0_14] : memref<18x18x128xbf16, #tpu.memory_space<vmem>>, vector<1x18x128xbf16>
    tpu.vector_store %arg9[%c17, %c0_13, %c0_14], %13 {strides = array<i32>} : memref<18x18x128xbf16, #tpu.memory_space<vmem>>, vector<1x18x128xbf16>,
    %cst_15 = arith.constant 0.000000e+00 : bf16
    %15 = vector.broadcast %cst_15 : bf16 to vector<16x1x128xbf16>
    %c1 = arith.constant 1 : index
    %c0_16 = arith.constant 0 : index
    %c0_17 = arith.constant 0 : index
    %16 = vector.load %arg9[%c1, %c0_16, %c0_17] : memref<18x18x128xbf16, #tpu.memory_space<vmem>>, vector<16x1x128xbf16>
    tpu.vector_store %arg9[%c1, %c0_16, %c0_17], %15 {strides = array<i32>} : memref<18x18x128xbf16, #tpu.memory_space<vmem>>, vector<16x1x128xbf16>,
    %cst_18 = arith.constant 0.000000e+00 : bf16
    %17 = vector.broadcast %cst_18 : bf16 to vector<16x1x128xbf16>
    %c1_19 = arith.constant 1 : index
    %c17_20 = arith.constant 17 : index
    %c0_21 = arith.constant 0 : index
    %18 = vector.load %arg9[%c1_19, %c17_20, %c0_21] : memref<18x18x128xbf16, #tpu.memory_space<vmem>>, vector<16x1x128xbf16>
    tpu.vector_store %arg9[%c1_19, %c17_20, %c0_21], %17 {strides = array<i32>} : memref<18x18x128xbf16, #tpu.memory_space<vmem>>, vector<16x1x128xbf16>,
    %19 = vector.shape_cast %10 : vector<256x128xbf16> to vector<16x16x128xbf16>
    %c1_22 = arith.constant 1 : index
    %c1_23 = arith.constant 1 : index
    %c0_24 = arith.constant 0 : index
    %20 = vector.load %arg9[%c1_22, %c1_23, %c0_24] : memref<18x18x128xbf16, #tpu.memory_space<vmem>>, vector<16x16x128xbf16>
    tpu.vector_store %arg9[%c1_22, %c1_23, %c0_24], %19 {strides = array<i32>} : memref<18x18x128xbf16, #tpu.memory_space<vmem>>, vector<16x16x128xbf16>,
    %cst_25 = arith.constant 0.000000e+00 : f32
    %21 = vector.broadcast %cst_25 : f32 to vector<256x128xf32>
    %c0_26 = arith.constant 0 : index
    %c0_27 = arith.constant 0 : index
    %c0_28 = arith.constant 0 : index
    %22 = vector.load %arg9[%c0_26, %c0_27, %c0_28] : memref<18x18x128xbf16, #tpu.memory_space<vmem>>, vector<16x16x128xbf16>
    %23 = vector.shape_cast %22 : vector<16x16x128xbf16> to vector<256x128xbf16>
    %c0_29 = arith.constant 0 : index
    %c1_30 = arith.constant 1 : index
    %c0_31 = arith.constant 0 : index
    %24 = vector.load %arg9[%c0_29, %c1_30, %c0_31] : memref<18x18x128xbf16, #tpu.memory_space<vmem>>, vector<16x16x128xbf16>
    %25 = vector.shape_cast %24 : vector<16x16x128xbf16> to vector<256x128xbf16>
    %26 = tpu.concatenate %23, %25 in 1 : vector<256x128xbf16>, vector<256x128xbf16> -> vector<256x256xbf16>
    %c0_32 = arith.constant 0 : index
    %c0_33 = arith.constant 0 : index
    %27 = vector.load %arg3[%c0_32, %c0_33] : memref<1152x128xbf16, #tpu.memory_space<vmem>>, vector<256x128xbf16>
    %cst_34 = arith.constant dense<0.000000e+00> : vector<256x128xf32>
    %28 = tpu.matmul %26, %27, %cst_34 {dimension_numbers = #tpu.dot_dimension_numbers<[1], [0], [0], [1], [0, 0, 1, 1], [], []>} : vector<256x256xbf16>, vector<256x128xbf16>, vector<256x128xf32> -> vector<256x128xf32>
    %29 = arith.addf %21, %28 : vector<256x128xf32>
    %c0_35 = arith.constant 0 : index
    %c2 = arith.constant 2 : index
    %c0_36 = arith.constant 0 : index
    %30 = vector.load %arg9[%c0_35, %c2, %c0_36] : memref<18x18x128xbf16, #tpu.memory_space<vmem>>, vector<16x16x128xbf16>
    %31 = vector.shape_cast %30 : vector<16x16x128xbf16> to vector<256x128xbf16>
    %c1_37 = arith.constant 1 : index
    %c0_38 = arith.constant 0 : index
    %c0_39 = arith.constant 0 : index
    %32 = vector.load %arg9[%c1_37, %c0_38, %c0_39] : memref<18x18x128xbf16, #tpu.memory_space<vmem>>, vector<16x16x128xbf16>
    %33 = vector.shape_cast %32 : vector<16x16x128xbf16> to vector<256x128xbf16>
    %34 = tpu.concatenate %31, %33 in 1 : vector<256x128xbf16>, vector<256x128xbf16> -> vector<256x256xbf16>
    %c256 = arith.constant 256 : index
    %c0_40 = arith.constant 0 : index
    %35 = vector.load %arg3[%c256, %c0_40] : memref<1152x128xbf16, #tpu.memory_space<vmem>>, vector<256x128xbf16>
    %cst_41 = arith.constant dense<0.000000e+00> : vector<256x128xf32>
    %36 = tpu.matmul %34, %35, %cst_41 {dimension_numbers = #tpu.dot_dimension_numbers<[1], [0], [0], [1], [0, 0, 1, 1], [], []>} : vector<256x256xbf16>, vector<256x128xbf16>, vector<256x128xf32> -> vector<256x128xf32>
    %37 = arith.addf %29, %36 : vector<256x128xf32>
    %c1_42 = arith.constant 1 : index
    %c1_43 = arith.constant 1 : index
    %c0_44 = arith.constant 0 : index
    %38 = vector.load %arg9[%c1_42, %c1_43, %c0_44] : memref<18x18x128xbf16, #tpu.memory_space<vmem>>, vector<16x16x128xbf16>
    %39 = vector.shape_cast %38 : vector<16x16x128xbf16> to vector<256x128xbf16>
    %c1_45 = arith.constant 1 : index
    %c2_46 = arith.constant 2 : index
    %c0_47 = arith.constant 0 : index
    %40 = vector.load %arg9[%c1_45, %c2_46, %c0_47] : memref<18x18x128xbf16, #tpu.memory_space<vmem>>, vector<16x16x128xbf16>
    %41 = vector.shape_cast %40 : vector<16x16x128xbf16> to vector<256x128xbf16>
    %42 = tpu.concatenate %39, %41 in 1 : vector<256x128xbf16>, vector<256x128xbf16> -> vector<256x256xbf16>
    %c512 = arith.constant 512 : index
    %c0_48 = arith.constant 0 : index
    %43 = vector.load %arg3[%c512, %c0_48] : memref<1152x128xbf16, #tpu.memory_space<vmem>>, vector<256x128xbf16>
    %cst_49 = arith.constant dense<0.000000e+00> : vector<256x128xf32>
    %44 = tpu.matmul %42, %43, %cst_49 {dimension_numbers = #tpu.dot_dimension_numbers<[1], [0], [0], [1], [0, 0, 1, 1], [], []>} : vector<256x256xbf16>, vector<256x128xbf16>, vector<256x128xf32> -> vector<256x128xf32>
    %45 = arith.addf %37, %44 : vector<256x128xf32>
    %c2_50 = arith.constant 2 : index
    %c0_51 = arith.constant 0 : index
    %c0_52 = arith.constant 0 : index
    %46 = vector.load %arg9[%c2_50, %c0_51, %c0_52] : memref<18x18x128xbf16, #tpu.memory_space<vmem>>, vector<16x16x128xbf16>
    %47 = vector.shape_cast %46 : vector<16x16x128xbf16> to vector<256x128xbf16>
    %c2_53 = arith.constant 2 : index
    %c1_54 = arith.constant 1 : index
    %c0_55 = arith.constant 0 : index
    %48 = vector.load %arg9[%c2_53, %c1_54, %c0_55] : memref<18x18x128xbf16, #tpu.memory_space<vmem>>, vector<16x16x128xbf16>
    %49 = vector.shape_cast %48 : vector<16x16x128xbf16> to vector<256x128xbf16>
    %50 = tpu.concatenate %47, %49 in 1 : vector<256x128xbf16>, vector<256x128xbf16> -> vector<256x256xbf16>
    %c768 = arith.constant 768 : index
    %c0_56 = arith.constant 0 : index
    %51 = vector.load %arg3[%c768, %c0_56] : memref<1152x128xbf16, #tpu.memory_space<vmem>>, vector<256x128xbf16>
    %cst_57 = arith.constant dense<0.000000e+00> : vector<256x128xf32>
    %52 = tpu.matmul %50, %51, %cst_57 {dimension_numbers = #tpu.dot_dimension_numbers<[1], [0], [0], [1], [0, 0, 1, 1], [], []>} : vector<256x256xbf16>, vector<256x128xbf16>, vector<256x128xf32> -> vector<256x128xf32>
    %53 = arith.addf %45, %52 : vector<256x128xf32>
    %c2_58 = arith.constant 2 : index
    %c2_59 = arith.constant 2 : index
    %c0_60 = arith.constant 0 : index
    %54 = vector.load %arg9[%c2_58, %c2_59, %c0_60] : memref<18x18x128xbf16, #tpu.memory_space<vmem>>, vector<16x16x128xbf16>
    %55 = vector.shape_cast %54 : vector<16x16x128xbf16> to vector<256x128xbf16>
    %c1024 = arith.constant 1024 : index
    %c0_61 = arith.constant 0 : index
    %56 = vector.load %arg3[%c1024, %c0_61] : memref<1152x128xbf16, #tpu.memory_space<vmem>>, vector<128x128xbf16>
    %cst_62 = arith.constant dense<0.000000e+00> : vector<256x128xf32>
    %57 = tpu.matmul %55, %56, %cst_62 {dimension_numbers = #tpu.dot_dimension_numbers<[1], [0], [0], [1], [0, 0, 1, 1], [], []>} : vector<256x128xbf16>, vector<128x128xbf16>, vector<256x128xf32> -> vector<256x128xf32>
    %58 = arith.addf %53, %57 : vector<256x128xf32>
    %c0_63 = arith.constant 0 : index
    %c0_64 = arith.constant 0 : index
    %59 = vector.load %arg6[%c0_63, %c0_64] : memref<1x128xf32, #tpu.memory_space<vmem>>, vector<1x128xf32>
    %60 = vector.broadcast %59 : vector<1x128xf32> to vector<256x128xf32>
    %61 = arith.addf %58, %60 : vector<256x128xf32>
    %cst_65 = arith.constant 0.000000e+00 : f32
    %62 = vector.broadcast %cst_65 : f32 to vector<256x128xf32>
    %63 = arith.maximumf %61, %62 : vector<256x128xf32>
    %64 = arith.truncf %63 : vector<256x128xf32> to vector<256x128xbf16>
    %c0_66 = arith.constant 0 : index
    %c0_67 = arith.constant 0 : index
    %65 = vector.load %arg4[%c0_66, %c0_67] : memref<128x128xbf16, #tpu.memory_space<vmem>>, vector<128x128xbf16>
    %cst_68 = arith.constant dense<0.000000e+00> : vector<256x128xf32>
    %66 = tpu.matmul %64, %65, %cst_68 {dimension_numbers = #tpu.dot_dimension_numbers<[1], [0], [0], [1], [0, 0, 1, 1], [], []>} : vector<256x128xbf16>, vector<128x128xbf16>, vector<256x128xf32> -> vector<256x128xf32>
    %c0_69 = arith.constant 0 : index
    %c0_70 = arith.constant 0 : index
    %67 = vector.load %arg7[%c0_69, %c0_70] : memref<1x128xf32, #tpu.memory_space<vmem>>, vector<1x128xf32>
    %68 = vector.broadcast %67 : vector<1x128xf32> to vector<256x128xf32>
    %69 = arith.addf %66, %68 : vector<256x128xf32>
    %70 = arith.truncf %69 : vector<256x128xf32> to vector<256x128xbf16>
    %71 = vector.shape_cast %70 : vector<256x128xbf16> to vector<16x16x128xbf16>
    %c0_71 = arith.constant 0 : index
    %c0_72 = arith.constant 0 : index
    %c0_73 = arith.constant 0 : index
    %c0_74 = arith.constant 0 : index
    %72 = vector.load %arg8[%c0_71, %c0_72, %c0_73, %c0_74] : memref<1x16x16x128xbf16, #tpu.memory_space<vmem>>, vector<1x16x16x128xbf16>
    %73 = vector.shape_cast %72 : vector<1x16x16x128xbf16> to vector<16x16x128xbf16>
    %74 = vector.shape_cast %71 : vector<16x16x128xbf16> to vector<1x16x16x128xbf16>
    tpu.vector_store %arg8[%c0_71, %c0_72, %c0_73, %c0_74], %74 {strides = array<i32>} : memref<1x16x16x128xbf16, #tpu.memory_space<vmem>>, vector<1x16x16x128xbf16>,
    return
  }
  func.func @transform_0(%arg0: i32) -> (i32, i32, i32, i32) {
    %c0_i32 = arith.constant 0 : i32
    %c0_i32_0 = arith.constant 0 : i32
    %c0_i32_1 = arith.constant 0 : i32
    %c0_i32_2 = arith.constant 0 : i32
    return %arg0, %c0_i32, %c0_i32_0, %c0_i32_1 : i32, i32, i32, i32
  }
  func.func @transform_1(%arg0: i32) -> (i32, i32) {
    %c0_i32 = arith.constant 0 : i32
    %c0_i32_0 = arith.constant 0 : i32
    %c0_i32_1 = arith.constant 0 : i32
    return %c0_i32, %c0_i32_0 : i32, i32
  }
  func.func @transform_2(%arg0: i32) -> (i32, i32) {
    %c0_i32 = arith.constant 0 : i32
    %c0_i32_0 = arith.constant 0 : i32
    %c0_i32_1 = arith.constant 0 : i32
    return %c0_i32, %c0_i32_0 : i32, i32
  }
  func.func @transform_3(%arg0: i32) -> (i32, i32) {
    %c0_i32 = arith.constant 0 : i32
    %c0_i32_0 = arith.constant 0 : i32
    %c0_i32_1 = arith.constant 0 : i32
    return %c0_i32, %c0_i32_0 : i32, i32
  }
  func.func @transform_4(%arg0: i32) -> (i32, i32) {
    %c0_i32 = arith.constant 0 : i32
    %c0_i32_0 = arith.constant 0 : i32
    %c0_i32_1 = arith.constant 0 : i32
    return %c0_i32, %c0_i32_0 : i32, i32
  }
  func.func @transform_5(%arg0: i32) -> (i32, i32) {
    %c0_i32 = arith.constant 0 : i32
    %c0_i32_0 = arith.constant 0 : i32
    %c0_i32_1 = arith.constant 0 : i32
    return %c0_i32, %c0_i32_0 : i32, i32
  }
  func.func @transform_6(%arg0: i32) -> (i32, i32) {
    %c0_i32 = arith.constant 0 : i32
    %c0_i32_0 = arith.constant 0 : i32
    %c0_i32_1 = arith.constant 0 : i32
    return %c0_i32, %c0_i32_0 : i32, i32
  }
  func.func @transform_7(%arg0: i32) -> (i32, i32, i32, i32) {
    %c0_i32 = arith.constant 0 : i32
    %c0_i32_0 = arith.constant 0 : i32
    %c0_i32_1 = arith.constant 0 : i32
    %c0_i32_2 = arith.constant 0 : i32
    return %arg0, %c0_i32, %c0_i32_0, %c0_i32_1 : i32, i32, i32, i32
  }
}

</mosaic_0001>

<bundles_post_ra>
// kernel: tpu_custom_call.1
= control target key start
LH: loop header
LB: loop body
LE: loop exit
PB: predicated region body
PF: predicated region fallthrough
CT: control target
= control target key end

     0   :  { %12 = vsyncpa [#allocation4], 0  ;;  %s9835_s0 = inlined_call_operand.hbm [shape: bf16[2,16,16,128], index: 0, kind: input, shape index: {}]   ;;  %s9836_s1 = inlined_call_operand.hbm [shape: bf16[128,128], index: 1, kind: input, shape index: {}]   ;;  %s9837_s2 = inlined_call_operand.hbm [shape: bf16[1152,128], index: 2, kind: input, shape index: {}]   ;;  %s9838_s3 = inlined_call_operand.hbm [shape: bf16[128,128], index: 3, kind: input, shape index: {}]   ;;  %s9839_s4 = inlined_call_operand.vmem [shape: f32[1,128], index: 4, kind: input, shape index: {}]   ;;  %s9840_s5 = inlined_call_operand.vmem [shape: f32[1,128], index: 5, kind: input, shape index: {}]   ;;  %s9841_s6 = inlined_call_operand.vmem [shape: f32[1,128], index: 6, kind: input, shape index: {}]   ;;  %s9842_s7 = inlined_call_operand.hbm [shape: bf16[2,16,16,128], index: 7, kind: output, shape index: {}]  }
   0x1   :  { %14 = vsyncpa [#allocation4 + $0x1], 0 }
   0x2   :  { %15 = vsyncpa [#allocation7], 0 }
   0x3   :  { %16 = vsyncpa [#allocation10], 0 }
   0x4   :  { %17 = vsyncpa [#allocation5], 0 }
   0x5   :  { %19 = vsyncpa [#allocation5 + $0x1], 0  ;;  %s7673_s24 = smov 0   ;;  %s7675_s25 = smov 0  }
   0x6   :  { %s7677_s26 = smov 0   ;;  %s7679_s27 = smov 0  }
   0x7 LB: > { %s7694_s28 = sadd.s32 4294967295, %s7621_s27   ;;  %s5950_s29 = sadd.s32 4294967294, %s7621_s27   ;;  %s7621_s27 = sphi %s7679_s27, %s9944_s27   ;;  %s7617_s26 = sphi %s7677_s26, %s9943_s26   ;;  %s7613_s25 = sphi %s7675_s25, %s9942_s25   ;;  %s7609_s24 = sphi %s7673_s24, %s9941_s24  }
   0x8   : > { %p45_p0 = scmp.ne.s32.totalorder %s7613_s25, %s7609_s24  ;;  %p9843_p1 = scmp.eq.s32.totalorder %s7694_s28, 0 }
   0x9   : > { %p201_p3 = scmp.eq.s32.totalorder %s5950_s29, 1  ;;  %p5951_p5 = scmp.ge.s32.totalorder %s7621_s27, 1 }
   0xa   : > { %p7703_p4 = por %p9843_p1, %p45_p0  ;;  %p208_p7 = scmp.lt.s32.totalorder %s7621_s27, 3 }
   0xb   : > { %p7708_p6 = por %p201_p3, %p45_p0  ;;  %s7623_s10 = smov [#allocation6]  }
   0xc   : > { %s9855_s30 = scalar_select %p7703_p4, 1, 0 }
   0xd   : > { %s9856_s8 = scalar_select %p7708_p6, 1, 0 }
   0xe   : > { %p7713_p8 = pnand %p5951_p5, %p208_p7  ;;  %s220_s11 = sshll.u32 %s7623_s10, 4  ;;  %s7717_s11 = int_to_ptr.vmem [resolvable:$true] %s220_s11 }
   0xf   : > { %9857 = sst [smem:[#allocation16_spill]] %s9856_s8  ;;  %s7624_s13 = smov [#allocation8]  }
  0x10   : > { %s9858_s9 = scalar_select %p7713_p8, 1, 0 }
  0x11   : > { %p7190_p9 = pneg %p7713_p8  ;;  %s233_s14 = sshll.u32 %s7624_s13, 4  ;;  %s7728_s14 = int_to_ptr.vmem [resolvable:$true] %s233_s14 }
  0x12   : > { %s7625_s15 = smov [#allocation9]   ;;  %s7433_s19 = scalar_lea.hbm %s9836_s1, 1024 }
  0x13   : > { %p7724_p11 = pnand %p7190_p9, %p9843_p1  ;;  %s7730_s16 = sshll.u32 %s7625_s15, 4  ;;  %s247_s16 = int_to_ptr.vmem [resolvable:$true] %s7730_s16 }
  0x14   : > { %p7434_p12 = scmp.ne.s32.totalorder %s9836_s1, %s7433_s19  ;;  %p7440_p5 = scmp.lt.u32.totalorder %s7433_s19, %s9836_s1 }
  0x15   : > { %p7740_p13 = pneg %p7724_p11 }
  0x17   : > { %p7436_p0 = pnand %p7740_p13, %p7434_p12 }
  0x19   : > { %p7437_p3 = pneg %p7436_p0 }
  0x1b   : > { %p7442_p7 = pnand %p7440_p5, %p7437_p3 }
  0x1d   : > { %7445 = shalt.err (!%p7442_p7)
}
  0x1e   : > { %s7446_s10 = scalar_lea.vmem %s7717_s11, 1024  ;;  %p7454_p2 = scmp.lt.s32.totalorder %s7717_s11, %s7717_s11 }
  0x1f   : > { %p7447_p9 = scmp.ne.s32.totalorder %s7717_s11, %s7446_s10  ;;  %p7455_p6 = scmp.lt.s32.totalorder %s7446_s10, %s7446_s10 }
  0x21   : > { %p7449_p10 = pnand %p7447_p9, %p7740_p13  ;;  %p7456_p12 = por %p7455_p6, %p7454_p2 }
  0x23   : > { %p7450_p1 = pneg %p7449_p10 }
  0x25   : > { %p7457_p0 = pnand %p7456_p12, %p7450_p1 }
  0x27   : > { %7460 = shalt.err (!%p7457_p0)
}
  0x28   : > { %s7626_s13 = smov 64   ;;  %s7627_s15 = smov 4  }
  0x29   : > { %7193 = dma.hbm_to_vmem [thread:$0]  (!%p7724_p11), %s9836_s1, 1024, %s7717_s11, [#allocation7], %s7626_s13, %s7626_s13, %s7627_s15  }
  0x2a   : > { %s7461_s21 = scalar_lea.hbm %s9837_s2, 9216 }
  0x2b   : > { %p7462_p1 = scmp.ne.s32.totalorder %s9837_s2, %s7461_s21  ;;  %p7468_p10 = scmp.lt.u32.totalorder %s7461_s21, %s9837_s2 }
  0x2d   : > { %p7464_p2 = pnand %p7462_p1, %p7740_p13 }
  0x2f   : > { %p7465_p6 = pneg %p7464_p2 }
  0x31   : > { %p7470_p3 = pnand %p7468_p10, %p7465_p6 }
  0x33   : > { %7473 = shalt.err (!%p7470_p3)
}
  0x34   : > { %s7474_s11 = scalar_lea.vmem %s7728_s14, 9216  ;;  %p7482_p12 = scmp.lt.s32.totalorder %s7728_s14, %s7728_s14 }
  0x35   : > { %p7475_p5 = scmp.ne.s32.totalorder %s7728_s14, %s7474_s11  ;;  %p7483_p0 = scmp.lt.s32.totalorder %s7474_s11, %s7474_s11 }
  0x37   : > { %p7477_p7 = pnand %p7475_p5, %p7740_p13  ;;  %p7484_p1 = por %p7483_p0, %p7482_p12 }
  0x39   : > { %p7478_p9 = pneg %p7477_p7 }
  0x3b   : > { %p7485_p2 = pnand %p7484_p1, %p7478_p9 }
  0x3d   : > { %7488 = shalt.err (!%p7485_p2)
}
  0x3e   : > { %7196 = dma.hbm_to_vmem [thread:$0]  (!%p7724_p11), %s9837_s2, 9216, %s7728_s14, [#allocation7], %s7626_s13, %s7626_s13, %s7627_s15  }
  0x3f   : > { %s7489_s20 = scalar_lea.hbm %s9838_s3, 1024 }
  0x40   : > { %p7490_p6 = scmp.ne.s32.totalorder %s9838_s3, %s7489_s20  ;;  %p7496_p5 = scmp.lt.u32.totalorder %s7489_s20, %s9838_s3 }
  0x42   : > { %p7492_p10 = pnand %p7490_p6, %p7740_p13 }
  0x44   : > { %p7493_p3 = pneg %p7492_p10 }
  0x46   : > { %p7498_p7 = pnand %p7496_p5, %p7493_p3 }
  0x48   : > { %7501 = shalt.err (!%p7498_p7)
}
  0x49   : > { %s7502_s11 = scalar_lea.vmem %s247_s16, 1024  ;;  %p7510_p1 = scmp.lt.s32.totalorder %s247_s16, %s247_s16 }
  0x4a   : > { %p7503_p9 = scmp.ne.s32.totalorder %s247_s16, %s7502_s11  ;;  %p7511_p2 = scmp.lt.s32.totalorder %s7502_s11, %s7502_s11 }
  0x4c   : > { %p7505_p12 = pnand %p7503_p9, %p7740_p13  ;;  %p7512_p4 = por %p7511_p2, %p7510_p1 }
  0x4e   : > { %p7506_p0 = pneg %p7505_p12 }
  0x50   : > { %p7513_p8 = pnand %p7512_p4, %p7506_p0 }
  0x52   : > { %7516 = shalt.err (!%p7513_p8)
}
  0x53   : > { %7199 = dma.hbm_to_vmem [thread:$0]  (!%p7724_p11), %s9838_s3, 1024, %s247_s16, [#allocation10], %s7626_s13, %s7626_s13, %s7627_s15  }
  0x54   : > { %s7813_s22 = sadd.s32 1, %s7621_s27   ;;  %s32_s17 = sadd.s32 1, %s7617_s26 }
  0x55   : > { %s29_s12 = ssub.s32 %s7621_s27, %s7813_s22  ;;  %p39_p8 = scmp.ne.s32.totalorder %s7617_s26, %s7613_s25 }
  0x56   : > { %p30_p4 = scmp.eq.s32.totalorder %s29_s12, 0  ;;  %p40_p13 = scmp.eq.s32.totalorder %s7621_s27, 0 }
  0x57   : > { %p7211_p6 = scmp.lt.s32.totalorder %s7621_s27, 2  ;;  %p9861_p3 = scmp.eq.s32.totalorder %s7694_s28, 1 }
  0x58   : > { %s7823_s18 = scalar_select %p30_p4, %s7617_s26, %s32_s17  }
  0x59   : > { %p41_p10 = por %p40_p13, %p39_p8  ;;  %p7827_p5 = por %p9861_p3, %p39_p8 }
  0x5a   : > { %s269_s20 = sand.u32 1, %s7617_s26   ;;  %s6333_s21 = sshll.u32 %s7621_s27, 11 }
  0x5b   : > { %s5956_s16 = sshll.u32 %s269_s20, 7  ;;  %s7836_s10 = scalar_lea.hbm %s9835_s0, %s6333_s21 }
  0x5c   : > { %s273_s11 = scalar_lea.vmem [#allocation3], %s5956_s16  ;;  %p7838_p11 = pnand %p7211_p6, %p41_p10 }
  0x5d   : > { %s280_s14 = sshll.u32 %s273_s11, 4  ;;  %s7844_s12 = scalar_lea.sflag [#allocation4], %s269_s20  ;;  %s7842_s14 = int_to_ptr.vmem [resolvable:$true] %s280_s14 }
  0x5e   : > { %s7517_s17 = scalar_lea.hbm %s7836_s10, 2048  ;;  %p7519_p9 = pneg %p7838_p11 }
  0x5f   : > { %p7518_p7 = scmp.ne.s32.totalorder %s7836_s10, %s7517_s17  ;;  %s7522_s23 = scalar_lea.hbm %s9835_s0, 4096 }
  0x60   : > { %p7523_p1 = scmp.lt.u32.totalorder %s7836_s10, %s9835_s0  ;;  %p7524_p2 = scmp.lt.u32.totalorder %s7522_s23, %s7517_s17 }
  0x61   : > { %p7520_p12 = pnand %p7519_p9, %p7518_p7  ;;  %p7526_p8 = scmp.lt.u32.totalorder %s7517_s17, %s7836_s10 }
  0x62   : > { %p7525_p4 = por %p7524_p2, %p7523_p1 }
  0x63   : > { %p7521_p0 = pneg %p7520_p12 }
  0x64   : > { %p7527_p13 = por %p7526_p8, %p7525_p4 }
  0x66   : > { %p7528_p6 = pnand %p7527_p13, %p7521_p0 }
  0x68   : > { %7531 = shalt.err (!%p7528_p6)
}
  0x69   : > { %s7532_s20 = scalar_lea.vmem %s7842_s14, 2048  ;;  %s7628_s21 = smov [#allocation3]  }
  0x6a   : > { %p7533_p10 = scmp.ne.s32.totalorder %s7842_s14, %s7532_s20  ;;  %s7537_s16 = sshll.u32 %s7628_s21, 4  ;;  %s7538_s16 = int_to_ptr.vmem [resolvable:$false] %s7537_s16 }
  0x6b   : > { %s7539_s29 = scalar_lea.vmem %s7538_s16, 4096  ;;  %p7540_p12 = scmp.lt.s32.totalorder %s7842_s14, %s7538_s16 }
  0x6c   : > { %p7535_p3 = pnand %p7533_p10, %p7519_p9  ;;  %p7541_p1 = scmp.lt.s32.totalorder %s7539_s29, %s7532_s20 }
  0x6e   : > { %p7536_p7 = pneg %p7535_p3  ;;  %p7542_p2 = por %p7541_p1, %p7540_p12 }
  0x70   : > { %p7543_p4 = pnand %p7542_p2, %p7536_p7 }
  0x72   : > { %7546 = shalt.err (!%p7543_p4)
}
  0x73   : > { %7203 = dma.hbm_to_vmem [thread:$0]  (!%p7838_p11), %s7836_s10, 2048, %s7842_s14, %s7844_s12, %s7626_s13, %s7626_s13, %s7627_s15  }
  0x74   : > { %p9864_p9 = scmp.ne.s32.totalorder %s9858_s9, 0 }
  0x76   : > { %292 = sbr.rel (%p9864_p9) target bundleno = 1257 (0x4e9), region = 48 }
  0x7d   : > { %s7878_s17 = sand.u32 1, %s7613_s25   ;;  %p9865_p0 = scmp.ne.s32.totalorder %s9855_s30, 0 }
  0x7e   : > { %s5960_s23 = sshll.u32 %s7878_s17, 7  ;;  %s295_s11 = scalar_lea.sflag [#allocation4], %s7878_s17 }
  0x7f   : > { %s7884_s8 = scalar_lea.vmem [#allocation3], %s5960_s23 }
  0x80   : > { %7592 = dma.done.wait (%p9865_p0), %s295_s11, 2048  }
  0x81   : > { %7594 = vsyncadd (%p9865_p0), %s295_s11, 4294965248  ;;  %p9866_p11 = scmp.eq.s32.totalorder %s7694_s28, 0 }
  0x83   : > { %7596 = dma.done.wait (%p9866_p11), [#allocation7], 10240   ;;  %p9867_p8 = pmov %p9866_p11 }
  0x85   : > { %7598 = vsyncadd (%p9867_p8), [#allocation7], 4294957056  ;;  %p9868_p13 = pmov %p9867_p8 }
  0x86   : > { %p9869_p6 = pmov %p9867_p8 }
  0x87   : > { %7600 = dma.done.wait (%p9868_p13), [#allocation10], 1024  }
  0x88   : > { %7602 = vsyncadd (%p9869_p6), [#allocation10], 4294966272  ;;  %v7256_v0 = vld [vmem:[#allocation6] sm:$0xff]   ;;  %v7257_v1 = vld [vmem:[#allocation6 + $0x8] sm:$0xff]   ;;  %vm758_vm0 = vcmask 1040384   ;;  %v7629_v51 = vmov 0  }
  0x89   : > { %7014 = vmatprep.subr.bf16.mxu0 %v7256_v0  ;;  %7158 = vmatprep.subr.bf16.mxu1 %v7256_v0  ;;  %v7258_v2 = vld [vmem:[#allocation6 + $0x10] sm:$0xff]   ;;  %v7259_v3 = vld [vmem:[#allocation6 + $0x18] sm:$0xff]   ;;  %v7264_v4 = vld [vmem:[%s7884_s8] sm:$0xff]   ;;  %vm759_vm1 = vsmask.f32 256  ;;  %vm2050_vm8 = vcmask 1042432  }
  0x8a   : > { %7015 = vmatpush3.bf16.msra.mxu0 %v7256_v0  ;;  %7166 = vmatpush3.bf16.msra.mxu1 %v7256_v0  ;;  %v7260_v5 = vld [vmem:[#allocation6 + $0x20] sm:$0xff]   ;;  %v7261_v6 = vld [vmem:[#allocation6 + $0x28] sm:$0xff]   ;;  %v7262_v8 = vld [vmem:[#allocation6 + $0x30] sm:$0xff]   ;;  %vm809_vm3 = vsmask.f32 7938  ;;  %vm2051_vm9 = vcmask 1046532  }
  0x8b   : > { %7016 = vmatprep.subr.bf16.mxu0 %v7257_v1  ;;  %7159 = vmatprep.subr.bf16.mxu1 %v7257_v1  ;;  %v7272_v7 = vld [vmem:[%s7884_s8 + $0x40] sm:$0xff]   ;;  %v7263_v9 = vld [vmem:[#allocation6 + $0x38] sm:$0xff]   ;;  %v7265_v11 = vld [vmem:[%s7884_s8 + $0x8] sm:$0xff]   ;;  %750 = vst [vmem:[#allocation2] sm:$0xf] %v7629_v51  ;;  %vm1261_vm11 = vcmask 1043456  }
  0x8c   : > { %7030 = vmatprep.mubr.bf16.mxu0 %v7264_v4  ;;  %7046 = vmatprep.mubr.bf16.mxu1 %v7272_v7  ;;  %v7280_v10 = vld [vmem:[#allocation8 + $0xc0] sm:$0xff]   ;;  %v7273_v12 = vld [vmem:[%s7884_s8 + $0x48] sm:$0xff]   ;;  %v7266_v14 = vld [vmem:[%s7884_s8 + $0x10] sm:$0xff]   ;;  %751 = vst [vmem:[#allocation2 + $0x4] sm:$0xf] %v7629_v51  ;;  %s9738_s21 = scalar_lea.vmem [#allocation11], %s5960_s23 }
  0x8d   : > { %v7282_v13 = vld [vmem:[#allocation8 + $0x40] sm:$0xff]   ;;  %v7274_v15 = vld [vmem:[%s7884_s8 + $0x50] sm:$0xff]   ;;  %v7284_v18 = vld [vmem:[#allocation8 + $0xc8] sm:$0xff]   ;;  %752 = vst [vmem:[#allocation2 + $0x8] sm:$0x1] %v7629_v51  ;;  %s6398_s16 = sshll.u32 %s7694_s28, 11 }
  0x8e   : > { %7017 = vmatpush3.bf16.msra.mxu0 %v7257_v1  ;;  %7167 = vmatpush3.bf16.msra.mxu1 %v7257_v1  ;;  %v7281_v16 = vld [vmem:[#allocation8 + $0x80] sm:$0xff]   ;;  %v7267_v19 = vld [vmem:[%s7884_s8 + $0x18] sm:$0xff]   ;;  %v7269_v23 = vld [vmem:[%s7884_s8 + $0x28] sm:$0xff]   ;;  %754 = vst [vmem:[#allocation2 + $0xcc] sm:$0xf] %v7629_v51  ;;  %s5848_s29 = sshll.u32 %s9738_s21, 4  ;;  %s9789_s29 = int_to_ptr.vmem [resolvable:$true] %s5848_s29 }
  0x8f   : > { %7018 = vmatprep.subr.bf16.mxu0 %v7258_v2  ;;  %7160 = vmatprep.subr.bf16.mxu1 %v7258_v2  ;;  %v7283_v17 = vld [vmem:[#allocation8] sm:$0xff]   ;;  %v7275_v20 = vld [vmem:[%s7884_s8 + $0x58] sm:$0xff]   ;;  %v7277_v24 = vld [vmem:[%s7884_s8 + $0x68] sm:$0xff]   ;;  %755 = vst [vmem:[#allocation2 + $0xd0] sm:$0xf] %v7629_v51  ;;  %s5835_s28 = scalar_lea.sflag [#allocation5], %s7878_s17 }
  0x90   : > { %v7268_v21 = vld [vmem:[%s7884_s8 + $0x20] sm:$0xff]   ;;  %v7270_v25 = vld [vmem:[%s7884_s8 + $0x30] sm:$0xff]   ;;  %v7271_v27 = vld [vmem:[%s7884_s8 + $0x38] sm:$0xff]   ;;  %756 = vst [vmem:[#allocation2 + $0xd4] sm:$0x1] %v7629_v51  ;;  %s7547_s30 = scalar_lea.vmem %s9789_s29, 2048 }
  0x91   : > { %v7276_v22 = vld [vmem:[%s7884_s8 + $0x60] sm:$0xff]   ;;  %v7278_v26 = vld [vmem:[%s7884_s8 + $0x70] sm:$0xff]   ;;  %v7279_v28 = vld [vmem:[%s7884_s8 + $0x78] sm:$0xff]   ;;  %vm1423_vm5 = vsmask.f32 3328  ;;  %s9787_s8 = scalar_lea.hbm %s9842_s7, %s6398_s16  ;;  %p7548_p10 = scmp.ne.s32.totalorder %s9789_s29, %s7547_s30 }
  0x92   : > { %7019 = vmatpush3.bf16.msra.mxu0 %v7258_v2  ;;  %7168 = vmatpush3.bf16.msra.mxu1 %v7258_v2  ;;  %v7286_v29 = vld [vmem:[#allocation8 + $0x48] sm:$0xff]   ;;  %v7288_v32 = vld [vmem:[#allocation8 + $0xd0] sm:$0xff]   ;;  %vm7915_vm2 = vmand %vm758_vm0, %vm759_vm1  ;;  %vm1424_vm6 = vsmask.f32 7440  ;;  %vm939_vm12 = vsmask.f32 4368 }
  0x93   : > { %7020 = vmatprep.subr.bf16.mxu0 %v7259_v3  ;;  %7161 = vmatprep.subr.bf16.mxu1 %v7259_v3  ;;  %v7285_v30 = vld [vmem:[#allocation8 + $0x88] sm:$0xff]   ;;  %v7290_v33 = vld [vmem:[#allocation8 + $0x50] sm:$0xff]   ;;  %v764_v37 = vld [vmem:[#allocation2 + $0x18] sm:$0x1]  ;;  %p7549_p3 = pnand %p7548_p10, %p7827_p5  ;;  %s7630_s9 = smov [#allocation11]  }
  0x94   : > { %v7287_v31 = vld [vmem:[#allocation8 + $0x8] sm:$0xff]   ;;  %v7289_v34 = vld [vmem:[#allocation8 + $0x90] sm:$0xff]   ;;  %v765_v38 = vsel %vm7915_vm2, 0, %v764_v37  ;;  %vm7922_vm4 = vmand %vm758_vm0, %vm809_vm3  ;;  %s7551_s13 = sshll.u32 %s7630_s9, 4  ;;  %s7552_s13 = int_to_ptr.vmem [resolvable:$false] %s7551_s13 }
  0x95   : > { %v7291_v35 = vld [vmem:[#allocation8 + $0x10] sm:$0xff]   ;;  %766 = vst [vmem:[#allocation2 + $0x18] sm:$0x1] %v765_v38  ;;  %v814_v42 = vld [vmem:[#allocation2 + $0x20] sm:$0x1]  ;;  %v7292_v43 = vld [vmem:[#allocation8 + $0xd8] sm:$0xff]   ;;  %p7550_p7 = pneg %p7549_p3  ;;  %p7554_p12 = scmp.lt.s32.totalorder %s9789_s29, %s7552_s13 }
  0x96   : > { %7021 = vmatpush3.bf16.msra.mxu0 %v7259_v3  ;;  %7169 = vmatpush3.bf16.msra.mxu1 %v7259_v3  ;;  %v761_v40 = vld [vmem:[#allocation2 + $0xc] sm:$0x1]  ;;  %v7294_v44 = vld [vmem:[#allocation8 + $0x58] sm:$0xff]   ;;  %v815_v45 = vsel %vm7922_vm4, 0, %v814_v42  ;;  %v767_v53 = vld [vmem:[#allocation2 + $0x24] sm:$0x1] }
  0x97   : > { %7022 = vmatprep.subr.bf16.mxu0 %v7260_v5  ;;  %7162 = vmatprep.subr.bf16.mxu1 %v7260_v5  ;;  %v762_v41 = vsel %vm7915_vm2, 0, %v761_v40  ;;  %v811_v46 = vld [vmem:[#allocation2 + $0x14] sm:$0x1]  ;;  %816 = vst [vmem:[#allocation2 + $0x20] sm:$0x1] %v815_v45  ;;  %v768_v54 = vsel %vm7915_vm2, 0, %v767_v53  ;;  %vm7949_vm7 = vmor %vm1423_vm5, %vm1424_vm6 }
  0x98   : > { %763 = vst [vmem:[#allocation2 + $0xc] sm:$0x1] %v762_v41  ;;  %v7293_v47 = vld [vmem:[#allocation8 + $0x98] sm:$0xff]   ;;  %v812_v49 = vsel %vm7922_vm4, 0, %v811_v46  ;;  %v7296_v55 = vld [vmem:[#allocation8 + $0xe0] sm:$0xff]   ;;  %v7300_v59 = vld [vmem:[#allocation8 + $0xe8] sm:$0xff]  }
  0x99   : > { %v7295_v48 = vld [vmem:[#allocation8 + $0x18] sm:$0xff]   ;;  %813 = vst [vmem:[#allocation2 + $0x14] sm:$0x1] %v812_v49  ;;  %v7298_v56 = vld [vmem:[#allocation8 + $0x60] sm:$0xff]   ;;  %769 = vst [vmem:[#allocation2 + $0x24] sm:$0x1] %v768_v54 }
  0x9a   : > { %7023 = vmatpush3.bf16.msra.mxu0 %v7260_v5  ;;  %7170 = vmatpush3.bf16.msra.mxu1 %v7260_v5  ;;  %v770_v50 = vld [vmem:[#allocation2 + $0x30] sm:$0x1]  ;;  %v7297_v57 = vld [vmem:[#allocation8 + $0xa0] sm:$0xff]   ;;  %v7302_v60 = vld [vmem:[#allocation8 + $0x68] sm:$0xff]   ;;  %s7553_s15 = scalar_lea.vmem %s7552_s13, 4096 }
  0x9b   : > { %7024 = vmatprep.subr.bf16.mxu0 %v7261_v6  ;;  %7163 = vmatprep.subr.bf16.mxu1 %v7261_v6  ;;  %v771_v52 = vsel %vm7915_vm2, 0, %v770_v50  ;;  %v7299_v58 = vld [vmem:[#allocation8 + $0x20] sm:$0xff]   ;;  %v7301_v61 = vld [vmem:[#allocation8 + $0xa8] sm:$0xff]   ;;  %vm7953_vm10 = vmor %vm2050_vm8, %vm2051_vm9  ;;  %p7555_p1 = scmp.lt.s32.totalorder %s7553_s15, %s7547_s30 }
  0x9c   : > { %772 = vst [vmem:[#allocation2 + $0x30] sm:$0x1] %v771_v52  ;;  %v7303_v62 = vld [vmem:[#allocation8 + $0x28] sm:$0xff]   ;;  %v820_v5 = vld [vmem:[#allocation2 + $0x38] sm:$0x1]  ;;  %vm8045_vm13 = vmand %vm1261_vm11, %vm809_vm3 }
  0x9d   : > { %v7936_v63 = vld [vmem:[#allocation2] sm:$0xf]  ;;  %v7938_v0 = vld [vmem:[#allocation2 + $0x4] sm:$0xf]  ;;  %v821_v7 = vsel %vm7922_vm4, 0, %v820_v5  ;;  %v7313_v51 = vld [vmem:[#allocation8 + $0x140] sm:$0xff]   ;;  %p7556_p2 = por %p7555_p1, %p7554_p12 }
  0x9e   : > { %7025 = vmatpush3.bf16.msra.mxu0 %v7261_v6  ;;  %7171 = vmatpush3.bf16.msra.mxu1 %v7261_v6  ;;  %v1427_v1 = vshrl.u32 %v7936_v63, 16  ;;  %v1430_v2 = vshll.u32 %v7936_v63, 16  ;;  %v1436_v3 = vshll.u32 %v7938_v0, 16  ;;  %v1440_v4 = vshrl.u32 %v7938_v0, 16  ;;  %v817_v6 = vld [vmem:[#allocation2 + $0x2c] sm:$0x1]  ;;  %vm8056_vm14 = vmor %vm759_vm1, %vm939_vm12 }
  0x9f   : > { %7026 = vmatprep.subr.bf16.mxu0 %v7262_v8  ;;  %7164 = vmatprep.subr.bf16.mxu1 %v7262_v8  ;;  %822 = vst [vmem:[#allocation2 + $0x38] sm:$0x1] %v821_v7  ;;  %v773_v38 = vld [vmem:[#allocation2 + $0x3c] sm:$0x1]  ;;  %v826_v40 = vld [vmem:[#allocation2 + $0x50] sm:$0x1]  ;;  %v6022_v49 = vcombine.low %v7936_v63, %v7938_v0  ;;  %p7557_p4 = pnand %p7556_p2, %p7550_p7 }
  0xa0   : > { %v827_v45 = vsel %vm7922_vm4, 0, %v826_v40  ;;  %v823_v50 = vld [vmem:[#allocation2 + $0x44] sm:$0x1]  ;;  %v782_v53 = vld [vmem:[#allocation2 + $0x60] sm:$0x1] }
  0xa1   : > { %828 = vst [vmem:[#allocation2 + $0x50] sm:$0x1] %v827_v45  ;;  %v824_v52 = vsel %vm7922_vm4, 0, %v823_v50  ;;  %v783_v54 = vsel %vm7915_vm2, 0, %v782_v53  ;;  %v838_v63 = vld [vmem:[#allocation2 + $0x80] sm:$0x1] }
  0xa2   : > { %7027 = vmatpush3.bf16.msra.mxu0 %v7262_v8  ;;  %7172 = vmatpush3.bf16.msra.mxu1 %v7262_v8  ;;  %v818_v8 = vsel %vm7922_vm4, 0, %v817_v6  ;;  %825 = vst [vmem:[#allocation2 + $0x44] sm:$0x1] %v824_v52  ;;  %784 = vst [vmem:[#allocation2 + $0x60] sm:$0x1] %v783_v54 }
  0xa3   : > { %7028 = vmatprep.subr.bf16.mxu0 %v7263_v9  ;;  %7165 = vmatprep.subr.bf16.mxu1 %v7263_v9  ;;  %819 = vst [vmem:[#allocation2 + $0x2c] sm:$0x1] %v818_v8  ;;  %v794_v5 = vld [vmem:[#allocation2 + $0x90] sm:$0x1]  ;;  %v791_v7 = vld [vmem:[#allocation2 + $0x84] sm:$0x1] }
  0xa4   : > { %v795_v6 = vsel %vm7915_vm2, 0, %v794_v5  ;;  %v792_v8 = vsel %vm7915_vm2, 0, %v791_v7  ;;  %v1263_v7 = vld [vmem:[#allocation2 + $0xc] sm:$0xf] }
  0xa5   : > { %796 = vst [vmem:[#allocation2 + $0x90] sm:$0x1] %v795_v6  ;;  %793 = vst [vmem:[#allocation2 + $0x84] sm:$0x1] %v792_v8 }
  0xa6   : > { %7029 = vmatpush3.bf16.msra.mxu0 %v7263_v9  ;;  %7173 = vmatpush3.bf16.msra.mxu1 %v7263_v9  ;;  %v7304_v9 = vld [vmem:[#allocation8 + $0xf0] sm:$0xff]  }
  0xa7   : > { %6518 = vmatprep.subr.bf16.mxu1 %v7280_v10  ;;  %6630 = vmatprep.subr.bf16.mxu0 %v7282_v13  ;;  %v7305_v10 = vld [vmem:[#allocation8 + $0xb0] sm:$0xff]  }
  0xa8   : > { %v7307_v13 = vld [vmem:[#allocation8 + $0x30] sm:$0xff]  }
  0xa9   : > { %7031 = vmatmul.mubr.bf16.vlgmr.msra.gmra.mrb[0].mxu0 %v7265_v11  ;;  %7047 = vmatmul.mubr.bf16.vlgmr.msra.gmra.mrb[0].mxu1 %v7273_v12  ;;  %v7306_v11 = vld [vmem:[#allocation8 + $0x70] sm:$0xff]   ;;  %v1429_v12 = vrot.slane %v1427_v1, 4 }
  0xaa   : > { %7034 = vmatprep.mubr.bf16.mxu0 %v7266_v14  ;;  %7050 = vmatprep.mubr.bf16.mxu1 %v7274_v15  ;;  %v1407_v14 = vld [vmem:[#allocation2 + $0x8] sm:$0x1]  ;;  %v1432_v15 = vrot.slane %v1430_v2, 5  ;;  %v839_v2 = vsel %vm7922_vm4, 0, %v838_v63  ;;  %v1270_v63 = vld [vmem:[#allocation2 + $0x18] sm:$0xf] }
  0xab   : > { %6519 = vmatpush3.bf16.msra.mxu1 %v7281_v16  ;;  %6631 = vmatpush3.bf16.msra.mxu0 %v7283_v17  ;;  %v1438_v16 = vrot.slane %v1436_v3, 5  ;;  %v1442_v17 = vrot.slane %v1440_v4, 4  ;;  %v835_v3 = vld [vmem:[#allocation2 + $0x74] sm:$0x1]  ;;  %840 = vst [vmem:[#allocation2 + $0x80] sm:$0x1] %v839_v2 }
  0xac   : > { %6520 = vmatprep.subr.bf16.mxu1 %v7284_v18  ;;  %6632 = vmatprep.subr.bf16.mxu0 %v7286_v29  ;;  %v1446_v18 = vshll.u32 %v1407_v14, 16  ;;  %v836_v4 = vsel %vm7922_vm4, 0, %v835_v3 }
  0xad   : > { %837 = vst [vmem:[#allocation2 + $0x74] sm:$0x1] %v836_v4 }
  0xaf   : > { %6521 = vmatpush3.bf16.msra.mxu1 %v7285_v30  ;;  %6633 = vmatpush3.bf16.msra.mxu0 %v7287_v31  ;;  %v2002_v31 = vld [vmem:[#allocation2] sm:$0xe] }
  0xb0   : > { %6522 = vmatprep.subr.bf16.mxu1 %v7288_v32  ;;  %6634 = vmatprep.subr.bf16.mxu0 %v7290_v33 }
  0xb1   : > { %7035 = vmatmul.mubr.bf16.gmra.mrb[4].mxu0 %v7267_v19  ;;  %7051 = vmatmul.mubr.bf16.gmra.mrb[4].mxu1 %v7275_v20  ;;  %v2055_v19 = vrot.slane %v7938_v0, 5  ;;  %v7308_v20 = vld [vmem:[#allocation8 + $0xf8] sm:$0xff]  }
  0xb2   : > { %7038 = vmatprep.mubr.bf16.mxu0 %v7268_v21  ;;  %7054 = vmatprep.mubr.bf16.mxu1 %v7276_v22  ;;  %v7310_v21 = vld [vmem:[#allocation8 + $0x78] sm:$0xff]   ;;  %v1433_v22 = vor.u32 %v1432_v15, %v1429_v12  ;;  %v797_v15 = vld [vmem:[#allocation2 + $0x9c] sm:$0x1] }
  0xb3   : > { %6523 = vmatpush3.bf16.msra.mxu1 %v7289_v34  ;;  %6635 = vmatpush3.bf16.msra.mxu0 %v7291_v35  ;;  %v2057_v33 = vrot.slane %v2055_v19, 4  ;;  %v776_v34 = vld [vmem:[#allocation2 + $0x48] sm:$0x1]  ;;  %v6054_v35 = vrot.slane %v2002_v31, 9 }
  0xb4   : > { %6524 = vmatprep.subr.bf16.mxu1 %v7292_v43  ;;  %6636 = vmatprep.subr.bf16.mxu0 %v7294_v44  ;;  %v1434_v29 = vrot.slane %v1433_v22, 4  ;;  %v777_v37 = vsel %vm7915_vm2, 0, %v776_v34  ;;  %v774_v44 = vsel %vm7915_vm2, 0, %v773_v38 }
  0xb5   : > { %778 = vst [vmem:[#allocation2 + $0x48] sm:$0x1] %v777_v37  ;;  %775 = vst [vmem:[#allocation2 + $0x3c] sm:$0x1] %v774_v44 }
  0xb6   : > { %v1439_v41 = vsel %vm7949_vm7, %v1434_v29, %v1438_v16 }
  0xb7   : > { %6525 = vmatpush3.bf16.msra.mxu1 %v7293_v47  ;;  %6637 = vmatpush3.bf16.msra.mxu0 %v7295_v48  ;;  %v7973_v47 = vsel %vm7953_vm10, %v6054_v35, %v2055_v19  ;;  %v7338_v19 = vld [vmem:[#allocation8 + $0x180] sm:$0xff]  }
  0xb8   : > { %6526 = vmatprep.subr.bf16.mxu1 %v7296_v55  ;;  %6638 = vmatprep.subr.bf16.mxu0 %v7298_v56  ;;  %v779_v55 = vld [vmem:[#allocation2 + $0x54] sm:$0x1] }
  0xb9   : > { %7039 = vmatmul.mubr.bf16.gmra.mrb[8].mxu0 %v7269_v23  ;;  %7055 = vmatmul.mubr.bf16.gmra.mrb[8].mxu1 %v7277_v24  ;;  %v1443_v23 = vor.u32 %v1442_v17, %v1438_v16  ;;  %v7309_v24 = vld [vmem:[#allocation8 + $0xb8] sm:$0xff]   ;;  %v780_v56 = vsel %vm7915_vm2, 0, %v779_v55  ;;  %v798_v16 = vsel %vm7915_vm2, 0, %v797_v15  ;;  %v7337_v17 = vld [vmem:[#allocation8 + $0x1c0] sm:$0xff]  }
  0xba   : > { %7042 = vmatprep.mubr.bf16.mxu0 %v7270_v25  ;;  %7058 = vmatprep.mubr.bf16.mxu1 %v7278_v26  ;;  %v7311_v25 = vld [vmem:[#allocation8 + $0x38] sm:$0xff]   ;;  %781 = vst [vmem:[#allocation2 + $0x54] sm:$0x1] %v780_v56  ;;  %799 = vst [vmem:[#allocation2 + $0x9c] sm:$0x1] %v798_v16 }
  0xbb   : > { %6527 = vmatpush3.bf16.msra.mxu1 %v7297_v57  ;;  %6639 = vmatpush3.bf16.msra.mxu0 %v7299_v58  ;;  %v1444_v30 = vrot.slane %v1443_v23, 4  ;;  %v832_v57 = vld [vmem:[#allocation2 + $0x68] sm:$0x1]  ;;  %v8016_v23 = vld [vmem:[%s9839_s4] ss:$0 sm:$0xff] }
  0xbc   : > { %6528 = vmatprep.subr.bf16.mxu1 %v7300_v59  ;;  %6640 = vmatprep.subr.bf16.mxu0 %v7302_v60  ;;  %v833_v58 = vsel %vm7922_vm4, 0, %v832_v57  ;;  %v829_v59 = vld [vmem:[#allocation2 + $0x5c] sm:$0x1] }
  0xbd   : > { %834 = vst [vmem:[#allocation2 + $0x68] sm:$0x1] %v833_v58  ;;  %v830_v60 = vsel %vm7922_vm4, 0, %v829_v59 }
  0xbe   : > { %831 = vst [vmem:[#allocation2 + $0x5c] sm:$0x1] %v830_v60 }
  0xbf   : > { %6529 = vmatpush3.bf16.msra.mxu1 %v7301_v61  ;;  %6641 = vmatpush3.bf16.msra.mxu0 %v7303_v62  ;;  %v788_v61 = vld [vmem:[#allocation2 + $0x78] sm:$0x1]  ;;  %v785_v62 = vld [vmem:[#allocation2 + $0x6c] sm:$0x1] }
  0xc0   : > { %6530 = vmatprep.subr.bf16.mxu1 %v7304_v9  ;;  %6642 = vmatprep.subr.bf16.mxu0 %v7306_v11  ;;  %v789_v0 = vsel %vm7915_vm2, 0, %v788_v61  ;;  %v786_v1 = vsel %vm7915_vm2, 0, %v785_v62  ;;  %v844_v9 = vld [vmem:[#allocation2 + $0x98] sm:$0x1] }
  0xc1   : > { %7043 = vmatmul.mubr.bf16.gmra.mrb[12].mxu0 %v7271_v27  ;;  %7059 = vmatmul.mubr.bf16.gmra.mrb[12].mxu1 %v7279_v28  ;;  %v1448_v27 = vrot.slane %v1446_v18, 5  ;;  %v2058_v28 = vrot.slane %v1407_v14, 5  ;;  %790 = vst [vmem:[#allocation2 + $0x78] sm:$0x1] %v789_v0  ;;  %787 = vst [vmem:[#allocation2 + $0x6c] sm:$0x1] %v786_v1 }
  0xc2   : > { %v845_v11 = vsel %vm7922_vm4, 0, %v844_v9  ;;  %v850_v18 = vld [vmem:[#allocation2 + $0xb0] sm:$0x1] }
  0xc3   : > { %6531 = vmatpush3.bf16.msra.mxu1 %v7305_v10  ;;  %6643 = vmatpush3.bf16.msra.mxu0 %v7307_v13  ;;  %v1449_v42 = vsel %vm7949_vm7, %v1444_v30, %v1448_v27  ;;  %v7965_v43 = vsel %vm7953_vm10, %v2057_v33, %v2058_v28  ;;  %v841_v10 = vld [vmem:[#allocation2 + $0x8c] sm:$0x1]  ;;  %846 = vst [vmem:[#allocation2 + $0x98] sm:$0x1] %v845_v11  ;;  %v800_v13 = vld [vmem:[#allocation2 + $0xa8] sm:$0x1] }
  0xc4   : > { %6532 = vmatprep.subr.bf16.mxu1 %v7308_v20  ;;  %6644 = vmatprep.subr.bf16.mxu0 %v7310_v21  ;;  %v6038_v46 = vcombine.low %v1439_v41, %v1449_v42  ;;  %v6070_v48 = vcombine.low %v7973_v47, %v7965_v43  ;;  %v842_v12 = vsel %vm7922_vm4, 0, %v841_v10  ;;  %v801_v14 = vsel %vm7915_vm2, 0, %v800_v13  ;;  %v847_v21 = vld [vmem:[#allocation2 + $0xa4] sm:$0x1] }
  0xc5   : > { %843 = vst [vmem:[#allocation2 + $0x8c] sm:$0x1] %v842_v12  ;;  %802 = vst [vmem:[#allocation2 + $0xa8] sm:$0x1] %v801_v14  ;;  %v851_v20 = vsel %vm7922_vm4, 0, %v850_v18  ;;  %v848_v22 = vsel %vm7922_vm4, 0, %v847_v21 }
  0xc6   : > { %2774 = vmatprep.mubr.bf16.mxu0 %v6038_v46  ;;  %852 = vst [vmem:[#allocation2 + $0xb0] sm:$0x1] %v851_v20  ;;  %849 = vst [vmem:[#allocation2 + $0xa4] sm:$0x1] %v848_v22  ;;  %v7320_v47 = vld [vmem:[#allocation8 + $0x108] sm:$0xff]  }
  0xc7   : > { %6533 = vmatpush3.bf16.msra.mxu1 %v7309_v24  ;;  %6645 = vmatpush3.bf16.msra.mxu0 %v7311_v25 }
  0xc8   : > { %6742 = vmatprep.subr.bf16.mxu1 %v7313_v51  ;;  %6854 = vmatprep.subr.bf16.mxu0 %v7337_v17 }
  0xca   : > { %2775 = vmatmul.mubr.bf16.vlgmr.msra.gmra.mrb[16].mxu0 %v6022_v49 }
  0xcb   : > { %6855 = vmatpush3.bf16.msra.mxu0 %v7338_v19 }
 0x17c   : > { %v7032_v24 = vpop.f32.mrb[0].mxu0  ;;  %v7048_v25 = vpop.f32.mrb[0].mxu1 }
 0x17d   : > { %v584_v27 = vadd.f32 %v7032_v24, %v8016_v23  ;;  %v575_v28 = vpop.f32.mrb[1].mxu0  ;;  %v648_v29 = vadd.f32 %v7048_v25, %v8016_v23  ;;  %v639_v30 = vpop.f32.mrb[1].mxu1 }
 0x17e   : > { %v576_v31 = vadd.f32 %v8016_v23, %v575_v28  ;;  %v7033_v33 = vpop.f32.mrb[2].mxu0  ;;  %v640_v34 = vadd.f32 %v8016_v23, %v639_v30  ;;  %v7049_v35 = vpop.f32.mrb[2].mxu1 }
 0x17f   : > { %v704_v37 = vmax.f32 %v584_v27, 0.0  ;;  %v587_v38 = vadd.f32 %v7033_v33, %v8016_v23  ;;  %v578_v40 = vpop.f32.mrb[3].mxu0  ;;  %v720_v41 = vmax.f32 %v648_v29, 0.0  ;;  %v8024_v42 = vadd.f32 %v7049_v35, %v8016_v23  ;;  %v642_v44 = vpop.f32.mrb[3].mxu1  ;;  %v7345_v35 = vld [vmem:[#allocation8 + $0x1c8] sm:$0xff]  }
 0x180   : > { %v702_v45 = vmax.f32 %v576_v31, 0.0  ;;  %v579_v46 = vadd.f32 %v8016_v23, %v578_v40  ;;  %v718_v49 = vmax.f32 %v640_v34, 0.0  ;;  %v8028_v50 = vadd.f32 %v8016_v23, %v642_v44  ;;  %v1274_v31 = vld [vmem:[#allocation2 + $0x20] sm:$0x1]  ;;  %6856 = vmatprep.subr.bf16.mxu0 %v7345_v35 }
 0x181   : > { %v6336_v51 = vpack.c.bf16 %v704_v37, %v704_v37  ;;  %v705_v52 = vmax.f32 %v587_v38, 0.0  ;;  %v8030_v53 = vpack.c.bf16 %v720_v41, %v720_v41  ;;  %v721_v54 = vmax.f32 %v8024_v42, 0.0  ;;  %v1267_v41 = vld [vmem:[#allocation2 + $0x14] sm:$0x1] }
 0x182   : > { %v6334_v55 = vpack.c.bf16 %v702_v45, %v702_v45  ;;  %v703_v56 = vmax.f32 %v579_v46, 0.0  ;;  %v8033_v57 = vpack.c.bf16 %v718_v49, %v718_v49  ;;  %v7332_v42 = vld [vmem:[#allocation8 + $0x118] sm:$0xff]  }
 0x183   : > { %v959_v59 = vshrl.u32 %v6336_v51, 16  ;;  %v962_v60 = vshll.u32 %v6336_v51, 16  ;;  %v6337_v61 = vpack.c.bf16 %v705_v52, %v705_v52  ;;  %v1095_v62 = vshrl.u32 %v8030_v53, 16  ;;  %v7346_v52 = vld [vmem:[#allocation8 + $0x188] sm:$0xff]  }
 0x184   : > { %v942_v0 = vshrl.u32 %v6334_v55, 16  ;;  %v945_v1 = vshll.u32 %v6334_v55, 16  ;;  %v6335_v2 = vpack.c.bf16 %v703_v56, %v703_v56  ;;  %v7036_v3 = vpop.f32.mrb[4].mxu0  ;;  %v1098_v4 = vshll.u32 %v8030_v53, 16  ;;  %v8038_v5 = vpop.f32.mrb[4].mxu1  ;;  %6857 = vmatpush3.bf16.msra.mxu0 %v7346_v52 }
 0x185   : > { %v961_v6 = vrot.slane %v959_v59, 7  ;;  %v967_v8 = vshrl.u32 %v6337_v61, 16  ;;  %v970_v9 = vshll.u32 %v6337_v61, 16  ;;  %v600_v10 = vadd.f32 %v7036_v3, %v8016_v23  ;;  %v591_v11 = vpop.f32.mrb[5].mxu0  ;;  %v8041_v12 = vpop.f32.mrb[5].mxu1 }
 0x186   : > { %v944_v14 = vrot.slane %v942_v0, 7  ;;  %v950_v15 = vshrl.u32 %v6335_v2, 16  ;;  %v953_v16 = vshll.u32 %v6335_v2, 16  ;;  %v592_v17 = vadd.f32 %v8016_v23, %v591_v11  ;;  %v7037_v18 = vpop.f32.mrb[6].mxu0  ;;  %v8050_v19 = vpop.f32.mrb[6].mxu1 }
 0x187   : > { %v964_v20 = vor.u32 %v962_v60, %v961_v6  ;;  %v965_v21 = vrot.slane %v961_v6, 4  ;;  %v969_v22 = vrot.slane %v967_v8, 7  ;;  %v708_v24 = vmax.f32 %v600_v10, 0.0  ;;  %v594_v25 = vpop.f32.mrb[7].mxu0  ;;  %v8052_v27 = vpop.f32.mrb[7].mxu1 }
 0x188   : > { %v947_v28 = vor.u32 %v945_v1, %v944_v14  ;;  %v948_v29 = vrot.slane %v944_v14, 4  ;;  %v952_v33 = vrot.slane %v950_v15, 7  ;;  %v706_v34 = vmax.f32 %v592_v17, 0.0  ;;  %v1284_v0 = vld [vmem:[#allocation2 + $0x30] sm:$0xf] }
 0x189   : > { %v1271_v37 = vsel %vm8045_vm13, %v964_v20, %v1270_v63  ;;  %v972_v38 = vor.u32 %v970_v9, %v969_v22  ;;  %v974_v40 = vrot.slane %v969_v22, 4  ;;  %v6340_v44 = vpack.c.bf16 %v708_v24, %v708_v24  ;;  %v1277_v8 = vld [vmem:[#allocation2 + $0x24] sm:$0xf] }
 0x18a   : > { %1272 = vst [vmem:[#allocation2 + $0x18] sm:$0xf] %v1271_v37  ;;  %v1264_v45 = vsel %vm8045_vm13, %v947_v28, %v1263_v7  ;;  %v955_v46 = vor.u32 %v953_v16, %v952_v33  ;;  %v957_v49 = vrot.slane %v952_v33, 4  ;;  %v6338_v51 = vpack.c.bf16 %v706_v34, %v706_v34 }
 0x18b   : > { %1265 = vst [vmem:[#allocation2 + $0xc] sm:$0xf] %v1264_v45  ;;  %v973_v55 = vsel %vm8056_vm14, %v965_v21, %v972_v38  ;;  %v1275_v56 = vsel %vm7915_vm2, %v974_v40, %v1274_v31  ;;  %v993_v59 = vshrl.u32 %v6340_v44, 16  ;;  %v996_v60 = vshll.u32 %v6340_v44, 16 }
 0x18c   : > { %1273 = vst [vmem:[#allocation2 + $0x1c] sm:$0xf] %v973_v55  ;;  %1276 = vst [vmem:[#allocation2 + $0x20] sm:$0x1] %v1275_v56  ;;  %v956_v61 = vsel %vm8056_vm14, %v948_v29, %v955_v46  ;;  %v1268_v63 = vsel %vm7915_vm2, %v957_v49, %v1267_v41  ;;  %v976_v1 = vshrl.u32 %v6338_v51, 16  ;;  %v979_v2 = vshll.u32 %v6338_v51, 16 }
 0x18d   : > { %v7040_v3 = vpop.f32.mrb[8].mxu0  ;;  %v8072_v6 = vpop.f32.mrb[8].mxu1  ;;  %1266 = vst [vmem:[#allocation2 + $0x10] sm:$0xf] %v956_v61  ;;  %1269 = vst [vmem:[#allocation2 + $0x14] sm:$0x1] %v1268_v63  ;;  %v603_v9 = vadd.f32 %v7037_v18, %v8016_v23  ;;  %v595_v10 = vadd.f32 %v8016_v23, %v594_v25 }
 0x18e   : > { %v8074_v7 = vrot.slane %v993_v59, 7  ;;  %v616_v11 = vadd.f32 %v7040_v3, %v8016_v23  ;;  %v607_v14 = vpop.f32.mrb[9].mxu0  ;;  %v8079_v15 = vpop.f32.mrb[9].mxu1  ;;  %v8081_v16 = vrot.slane %v976_v1, 7  ;;  %v8086_v21 = vrot.slane %v1095_v62, 7 }
 0x18f   : > { %v608_v17 = vadd.f32 %v8016_v23, %v607_v14  ;;  %v7041_v20 = vpop.f32.mrb[10].mxu0  ;;  %v8089_v24 = vpop.f32.mrb[10].mxu1  ;;  %v709_v28 = vmax.f32 %v603_v9, 0.0  ;;  %v707_v29 = vmax.f32 %v595_v10, 0.0  ;;  %v1281_v61 = vld [vmem:[#allocation2 + $0x2c] sm:$0x1] }
 0x190   : > { %v998_v18 = vor.u32 %v996_v60, %v8074_v7  ;;  %v999_v25 = vrot.slane %v8074_v7, 4  ;;  %v610_v31 = vpop.f32.mrb[11].mxu0  ;;  %v8093_v33 = vpop.f32.mrb[11].mxu1  ;;  %v981_v34 = vor.u32 %v979_v2, %v8081_v16  ;;  %v982_v35 = vrot.slane %v8081_v16, 4  ;;  %v1288_v60 = vld [vmem:[#allocation2 + $0x38] sm:$0x1] }
 0x191   : > { %v712_v37 = vmax.f32 %v616_v11, 0.0  ;;  %v710_v62 = vmax.f32 %v608_v17, 0.0  ;;  %v6341_v40 = vpack.c.bf16 %v709_v28, %v709_v28  ;;  %v6339_v41 = vpack.c.bf16 %v707_v29, %v707_v29  ;;  %v1298_v9 = vld [vmem:[#allocation2 + $0x48] sm:$0xf]  ;;  %v1291_v10 = vld [vmem:[#allocation2 + $0x3c] sm:$0xf] }
 0x192   : > { %v1285_v38 = vsel %vm8045_vm13, %v998_v18, %v1284_v0  ;;  %v619_v44 = vadd.f32 %v7041_v20, %v8016_v23  ;;  %v1278_v45 = vsel %vm8045_vm13, %v981_v34, %v1277_v8  ;;  %v611_v51 = vadd.f32 %v8016_v23, %v610_v31  ;;  %v7315_v16 = vld [vmem:[#allocation8 + $0x100] sm:$0xff]   ;;  %v2003_v18 = vld [vmem:[#allocation2 + $0xc] sm:$0xe] }
 0x193   : > { %1286 = vst [vmem:[#allocation2 + $0x30] sm:$0xf] %v1285_v38  ;;  %v6344_v46 = vpack.c.bf16 %v712_v37, %v712_v37  ;;  %v6342_v49 = vpack.c.bf16 %v710_v62, %v710_v62  ;;  %1279 = vst [vmem:[#allocation2 + $0x24] sm:$0xf] %v1278_v45  ;;  %v1001_v52 = vshrl.u32 %v6341_v40, 16  ;;  %v1004_v55 = vshll.u32 %v6341_v40, 16 }
 0x194   : > { %v984_v56 = vshrl.u32 %v6339_v41, 16  ;;  %v987_v59 = vshll.u32 %v6339_v41, 16  ;;  %v713_v8 = vmax.f32 %v619_v44, 0.0  ;;  %v711_v11 = vmax.f32 %v611_v51, 0.0  ;;  %v7312_v14 = vld [vmem:[#allocation2 + $0xc] sm:$0xff]   ;;  %v7316_v40 = vld [vmem:[#allocation2 + $0x18] sm:$0xff]  }
 0x195   : > { %v1027_v63 = vshrl.u32 %v6344_v46, 16  ;;  %v1030_v0 = vshll.u32 %v6344_v46, 16  ;;  %v1010_v1 = vshrl.u32 %v6342_v49, 16  ;;  %v1013_v2 = vshll.u32 %v6342_v49, 16  ;;  %v8107_v28 = vld [vmem:[#allocation2 + $0xc] sm:$0xf]  ;;  %2517 = vmatprep.mubr.bf16.mxu1 %v7312_v14 }
 0x196   : > { %v1003_v3 = vrot.slane %v1001_v52, 7  ;;  %v986_v7 = vrot.slane %v984_v56, 7  ;;  %v8112_v29 = vor.u32 %v1098_v4, %v8086_v21  ;;  %v8117_v31 = vpack.c.bf16 %v721_v54, %v721_v54  ;;  %v8119_v41 = vld [vmem:[#allocation2 + $0x10] sm:$0xf]  ;;  %v7319_v44 = vld [vmem:[#allocation8 + $0x148] sm:$0xff]   ;;  %2518 = vmatmul.mubr.bf16.vlgmr.msra.gmra.mrb[16].mxu1 %v6070_v48  ;;  %v8130_v46 = vpop.f32.mrb[12].mxu0 }
 0x197   : > { %v8103_v17 = vrot.slane %v1027_v63, 7  ;;  %v8105_v20 = vrot.slane %v1010_v1, 7  ;;  %v8128_v54 = vld [vmem:[#allocation2 + $0x14] sm:$0x1]  ;;  %v8132_v49 = vpop.f32.mrb[12].mxu1  ;;  %6743 = vmatpush3.bf16.msra.mxu1 %v7315_v16  ;;  %v8142_v43 = vpop.f32.mrb[13].mxu0  ;;  %2525 = vmatprep.mubr.bf16.mxu1 %v7316_v40 }
 0x198   : > { %v1006_v34 = vor.u32 %v1004_v55, %v1003_v3  ;;  %v1008_v37 = vrot.slane %v1003_v3, 4  ;;  %v989_v62 = vor.u32 %v987_v59, %v986_v7  ;;  %v991_v38 = vrot.slane %v986_v7, 4  ;;  %v8144_v48 = vpop.f32.mrb[13].mxu1  ;;  %v7325_v63 = vld [vmem:[#allocation8 + $0x150] sm:$0xff]   ;;  %6744 = vmatprep.subr.bf16.mxu1 %v7319_v44  ;;  %v8175_v58 = vld [vmem:[#allocation2 + $0x20] sm:$0x1] }
 0x199   : > { %v1032_v45 = vor.u32 %v1030_v0, %v8103_v17  ;;  %v1033_v53 = vrot.slane %v8103_v17, 4  ;;  %v1015_v4 = vor.u32 %v1013_v2, %v8105_v20  ;;  %v8152_v0 = vpop.f32.mrb[14].mxu1  ;;  %v6055_v1 = vrot.slane %v2003_v18, 9  ;;  %v7326_v40 = vld [vmem:[#allocation8 + $0x110] sm:$0xff]  }
 0x19a   : > { %v1007_v51 = vsel %vm8056_vm14, %v999_v25, %v1006_v34  ;;  %v1289_v52 = vsel %vm7915_vm2, %v1008_v37, %v1288_v60  ;;  %v990_v55 = vsel %vm8056_vm14, %v982_v35, %v989_v62  ;;  %v1282_v56 = vsel %vm7915_vm2, %v991_v38, %v1281_v61  ;;  %v8150_v61 = vpop.f32.mrb[14].mxu0  ;;  %v1302_v34 = vld [vmem:[#allocation2 + $0x50] sm:$0x1] }
 0x19b   : > { %1287 = vst [vmem:[#allocation2 + $0x34] sm:$0xf] %v1007_v51  ;;  %1290 = vst [vmem:[#allocation2 + $0x38] sm:$0x1] %v1289_v52  ;;  %v1299_v25 = vsel %vm8045_vm13, %v1032_v45, %v1298_v9  ;;  %v1292_v59 = vsel %vm8045_vm13, %v1015_v4, %v1291_v10  ;;  %v6345_v35 = vpack.c.bf16 %v713_v8, %v713_v8  ;;  %v2062_v2 = vrot.slane %v8119_v41, 5  ;;  %v8157_v9 = vpop.f32.mrb[15].mxu0 }
 0x19c   : > { %1280 = vst [vmem:[#allocation2 + $0x28] sm:$0xf] %v990_v55  ;;  %1283 = vst [vmem:[#allocation2 + $0x2c] sm:$0x1] %v1282_v56  ;;  %v6343_v60 = vpack.c.bf16 %v711_v11, %v711_v11  ;;  %v2065_v3 = vrot.slane %v8128_v54, 5  ;;  %v1451_v7 = vshrl.u32 %v8107_v28, 16  ;;  %6745 = vmatpush3.bf16.msra.mxu1 %v7320_v47  ;;  %v6023_v47 = vcombine.low %v8107_v28, %v8119_v41 }
 0x19d   : > { %1300 = vst [vmem:[#allocation2 + $0x48] sm:$0xf] %v1299_v25  ;;  %1293 = vst [vmem:[#allocation2 + $0x3c] sm:$0xf] %v1292_v59  ;;  %v8159_v10 = vpop.f32.mrb[15].mxu1  ;;  %v1035_v8 = vshrl.u32 %v6345_v35, 16  ;;  %v2063_v37 = vsel %vm7953_vm10, %v6055_v1, %v2062_v2  ;;  %6746 = vmatprep.subr.bf16.mxu1 %v7325_v63 }
 0x19e   : > { %v1038_v11 = vshll.u32 %v6345_v35, 16  ;;  %v1018_v14 = vshrl.u32 %v6343_v60, 16  ;;  %v1021_v16 = vshll.u32 %v6343_v60, 16  ;;  %v2064_v18 = vrot.slane %v2062_v2, 4  ;;  %v7353_v45 = vld [vmem:[#allocation8 + $0x1d0] sm:$0xff]   ;;  %v7331_v55 = vld [vmem:[#allocation8 + $0x158] sm:$0xff]  }
 0x19f   : > { %v1453_v62 = vrot.slane %v1451_v7, 4  ;;  %v1454_v38 = vshll.u32 %v8107_v28, 16  ;;  %v1037_v4 = vrot.slane %v1035_v8, 7  ;;  %v1460_v44 = vshll.u32 %v8119_v41, 16  ;;  %v7354_v56 = vld [vmem:[#allocation8 + $0x190] sm:$0xff]   ;;  %6858 = vmatprep.subr.bf16.mxu0 %v7353_v45 }
 0x1a0   : > { %v1020_v51 = vrot.slane %v1018_v14, 7  ;;  %v1464_v52 = vshrl.u32 %v8119_v41, 16  ;;  %v1295_v25 = vld [vmem:[#allocation2 + $0x44] sm:$0x1]  ;;  %v2066_v59 = vsel %vm7953_vm10, %v2064_v18, %v2065_v3  ;;  %v1470_v60 = vshll.u32 %v8128_v54, 16  ;;  %6859 = vmatpush3.bf16.msra.mxu0 %v7354_v56  ;;  %6747 = vmatpush3.bf16.msra.mxu1 %v7326_v40 }
 0x1a1   : > { %v1456_v35 = vrot.slane %v1454_v38, 5  ;;  %v8171_v1 = vld [vmem:[#allocation2 + $0x18] sm:$0xf]  ;;  %v1040_v2 = vor.u32 %v1038_v11, %v1037_v4  ;;  %v1042_v7 = vrot.slane %v1037_v4, 4  ;;  %v8173_v63 = vld [vmem:[#allocation2 + $0x1c] sm:$0xf]  ;;  %v6071_v22 = vcombine.low %v2063_v37, %v2066_v59  ;;  %6748 = vmatprep.subr.bf16.mxu1 %v7331_v55 }
 0x1a2   : > { %v1023_v8 = vor.u32 %v1021_v16, %v1020_v51  ;;  %v1025_v14 = vrot.slane %v1020_v51, 4  ;;  %v1462_v18 = vrot.slane %v1460_v44, 5  ;;  %v1466_v38 = vrot.slane %v1464_v52, 4  ;;  %v7340_v59 = vld [vmem:[#allocation8 + $0x120] sm:$0xff]  }
 0x1a3   : > { %v1457_v3 = vor.u32 %v1456_v35, %v1453_v62  ;;  %v7318_v54 = vld [vmem:[#allocation2 + $0x24] sm:$0xff]   ;;  %v1041_v11 = vsel %vm8056_vm14, %v1033_v53, %v1040_v2  ;;  %v1303_v16 = vsel %vm7915_vm2, %v1042_v7, %v1302_v34  ;;  %v9882_v45 = vrot.slane %v8105_v20, 4  ;;  %v7339_v62 = vld [vmem:[#allocation8 + $0x160] sm:$0xff]   ;;  %2526 = vmatmul.mubr.bf16.gmra.mrb[20].mxu1 %v6071_v22 }
 0x1a4   : > { %v1296_v37 = vsel %vm7915_vm2, %v1025_v14, %v1295_v25  ;;  %1301 = vst [vmem:[#allocation2 + $0x4c] sm:$0xf] %v1041_v11  ;;  %1304 = vst [vmem:[#allocation2 + $0x50] sm:$0x1] %v1303_v16  ;;  %v1467_v53 = vor.u32 %v1466_v38, %v1462_v18  ;;  %v1472_v40 = vrot.slane %v1470_v60, 5  ;;  %v1475_v34 = vshrl.u32 %v8171_v1, 16  ;;  %2533 = vmatprep.mubr.bf16.mxu1 %v7318_v54 }
 0x1a5   : > { %v1024_v4 = vsel %vm8056_vm14, %v9882_v45, %v1023_v8  ;;  %1297 = vst [vmem:[#allocation2 + $0x44] sm:$0x1] %v1296_v37  ;;  %v1458_v17 = vrot.slane %v1457_v3, 4  ;;  %v1478_v20 = vshll.u32 %v8171_v1, 16  ;;  %v1484_v51 = vshll.u32 %v8173_v63, 16  ;;  %6749 = vmatpush3.bf16.msra.mxu1 %v7332_v42  ;;  %v7347_v35 = vld [vmem:[#allocation8 + $0x168] sm:$0xff]  }
 0x1a6   : > { %1294 = vst [vmem:[#allocation2 + $0x40] sm:$0xf] %v1024_v4  ;;  %v1488_v44 = vshrl.u32 %v8173_v63, 16  ;;  %v1494_v52 = vshll.u32 %v8175_v58, 16  ;;  %v1468_v56 = vrot.slane %v1467_v53, 4  ;;  %v1477_v25 = vrot.slane %v1475_v34, 4  ;;  %6750 = vmatprep.subr.bf16.mxu1 %v7339_v62 }
 0x1a7   : > { %v1463_v55 = vsel %vm7949_vm7, %v1458_v17, %v1462_v18  ;;  %v632_v22 = vadd.f32 %v8130_v46, %v8016_v23  ;;  %v1480_v60 = vrot.slane %v1478_v20, 5  ;;  %v1486_v2 = vrot.slane %v1484_v51, 5  ;;  %v2004_v14 = vld [vmem:[#allocation2 + $0x18] sm:$0xe]  ;;  %v7361_v46 = vld [vmem:[#allocation8 + $0x1d8] sm:$0xff]   ;;  %v7355_v34 = vld [vmem:[#allocation8 + $0x170] sm:$0xff]  }
 0x1a8   : > { %v1490_v7 = vrot.slane %v1488_v44, 4  ;;  %v1496_v8 = vrot.slane %v1494_v52, 5  ;;  %v1473_v3 = vsel %vm7949_vm7, %v1468_v56, %v1472_v40  ;;  %v624_v18 = vadd.f32 %v8016_v23, %v8142_v43  ;;  %v7362_v4 = vld [vmem:[#allocation8 + $0x198] sm:$0xff]   ;;  %v7348_v40 = vld [vmem:[#allocation8 + $0x128] sm:$0xff]   ;;  %6860 = vmatprep.subr.bf16.mxu0 %v7361_v46 }
 0x1a9   : > { %v716_v38 = vmax.f32 %v632_v22, 0.0  ;;  %v635_v54 = vadd.f32 %v8150_v61, %v8016_v23  ;;  %v6039_v42 = vcombine.low %v1463_v55, %v1473_v3  ;;  %v1481_v11 = vor.u32 %v1480_v60, %v1477_v25  ;;  %6751 = vmatpush3.bf16.msra.mxu1 %v7340_v59  ;;  %v1312_v25 = vld [vmem:[#allocation2 + $0x60] sm:$0xf]  ;;  %6861 = vmatpush3.bf16.msra.mxu0 %v7362_v4  ;;  %v8218_v60 = vld [vmem:[#allocation2 + $0x24] sm:$0xf] }
 0x1aa   : > { %v1491_v16 = vor.u32 %v1490_v7, %v1486_v2  ;;  %v627_v45 = vadd.f32 %v8016_v23, %v8157_v9  ;;  %v714_v62 = vmax.f32 %v624_v18, 0.0  ;;  %v6056_v53 = vrot.slane %v2004_v14, 9  ;;  %6752 = vmatprep.subr.bf16.mxu1 %v7347_v35  ;;  %v7356_v7 = vld [vmem:[#allocation8 + $0x130] sm:$0xff]   ;;  %v1305_v14 = vld [vmem:[#allocation2 + $0x54] sm:$0xf]  ;;  %v7369_v4 = vld [vmem:[#allocation8 + $0x1e8] sm:$0xff]  }
 0x1ab   : > { %v6348_v37 = vpack.c.bf16 %v716_v38, %v716_v38  ;;  %v717_v17 = vmax.f32 %v635_v54, 0.0  ;;  %2782 = vmatprep.mubr.bf16.mxu0 %v6039_v42  ;;  %v1482_v43 = vrot.slane %v1481_v11, 4  ;;  %v2069_v51 = vrot.slane %v8173_v63, 5  ;;  %v7363_v18 = vld [vmem:[#allocation8 + $0x178] sm:$0xff]   ;;  %v7367_v54 = vld [vmem:[#allocation8 + $0x1e0] sm:$0xff]  }
 0x1ac   : > { %v1492_v20 = vrot.slane %v1491_v16, 4  ;;  %v715_v61 = vmax.f32 %v627_v45, 0.0  ;;  %2783 = vmatmul.mubr.bf16.gmra.mrb[20].mxu0 %v6023_v47  ;;  %v6346_v44 = vpack.c.bf16 %v714_v62, %v714_v62  ;;  %v7368_v45 = vld [vmem:[#allocation8 + $0x1a0] sm:$0xff]   ;;  %v1316_v62 = vld [vmem:[#allocation2 + $0x68] sm:$0x1]  ;;  %6862 = vmatprep.subr.bf16.mxu0 %v7367_v54 }
 0x1ad   : > { %v1061_v23 = vshrl.u32 %v6348_v37, 16  ;;  %v1064_v9 = vshll.u32 %v6348_v37, 16  ;;  %v6349_v52 = vpack.c.bf16 %v717_v17, %v717_v17  ;;  %v1487_v55 = vsel %vm7949_vm7, %v1482_v43, %v1486_v2  ;;  %6753 = vmatpush3.bf16.msra.mxu1 %v7348_v40  ;;  %6863 = vmatpush3.bf16.msra.mxu0 %v7368_v45 }
 0x1ae   : > { %v1497_v56 = vsel %vm7949_vm7, %v1492_v20, %v1496_v8  ;;  %v6347_v22 = vpack.c.bf16 %v715_v61, %v715_v61  ;;  %v8216_v59 = vsel %vm7953_vm10, %v6056_v53, %v2069_v51  ;;  %v1044_v41 = vshrl.u32 %v6346_v44, 16  ;;  %6754 = vmatprep.subr.bf16.mxu1 %v7355_v34  ;;  %v1309_v61 = vld [vmem:[#allocation2 + $0x5c] sm:$0x1]  ;;  %6864 = vmatprep.subr.bf16.mxu0 %v7369_v4  ;;  %v7372_v4 = vld [vmem:[#allocation8 + $0x1f0] sm:$0xff]  }
 0x1af   : > { %v6040_v35 = vcombine.low %v1487_v55, %v1497_v56  ;;  %v1063_v28 = vrot.slane %v1061_v23, 7  ;;  %v1047_v47 = vshll.u32 %v6346_v44, 16  ;;  %v1069_v2 = vshrl.u32 %v6349_v52, 16  ;;  %v8226_v56 = vld [vmem:[#allocation2 + $0x28] sm:$0xf] }
 0x1b0   : > { %v1072_v3 = vshll.u32 %v6349_v52, 16  ;;  %v1052_v38 = vshrl.u32 %v6347_v22, 16  ;;  %v1055_v8 = vshll.u32 %v6347_v22, 16  ;;  %v1046_v11 = vrot.slane %v1044_v41, 7 }
 0x1b1   : > { %2790 = vmatprep.mubr.bf16.mxu0 %v6040_v35  ;;  %v1066_v46 = vor.u32 %v1064_v9, %v1063_v28  ;;  %v1067_v42 = vrot.slane %v1063_v28, 4  ;;  %v2071_v16 = vrot.slane %v2069_v51, 4  ;;  %v1071_v37 = vrot.slane %v1069_v2, 7  ;;  %6755 = vmatpush3.bf16.msra.mxu1 %v7356_v7  ;;  %v7364_v51 = vld [vmem:[#allocation8 + $0x138] sm:$0xff]   ;;  %v7370_v9 = vld [vmem:[#allocation8 + $0x1a8] sm:$0xff]  }
 0x1b2   : > { %v1054_v17 = vrot.slane %v1052_v38, 7  ;;  %v2072_v53 = vrot.slane %v8175_v58, 5  ;;  %v6024_v40 = vcombine.low %v8171_v1, %v8173_v63  ;;  %v1049_v43 = vor.u32 %v1047_v47, %v1046_v11  ;;  %6756 = vmatprep.subr.bf16.mxu1 %v7363_v18  ;;  %v2005_v28 = vld [vmem:[#allocation2 + $0x24] sm:$0xe]  ;;  %v8241_v2 = vld [vmem:[#allocation2 + $0x30] sm:$0xf]  ;;  %6865 = vmatpush3.bf16.msra.mxu0 %v7370_v9 }
 0x1b3   : > { %v1313_v34 = vsel %vm8045_vm13, %v1066_v46, %v1312_v25  ;;  %v1050_v20 = vrot.slane %v1046_v11, 4  ;;  %v1499_v23 = vshrl.u32 %v8218_v60, 16  ;;  %v1074_v44 = vor.u32 %v1072_v3, %v1071_v37  ;;  %v1410_v25 = vld [vmem:[#allocation2 + $0x2c] sm:$0x1]  ;;  %v7321_v38 = vld [vmem:[#allocation2 + $0x30] sm:$0xff]   ;;  %6866 = vmatprep.subr.bf16.mxu0 %v7372_v4 }
 0x1b4   : > { %1314 = vst [vmem:[#allocation2 + $0x60] sm:$0xf] %v1313_v34  ;;  %v1076_v52 = vrot.slane %v1071_v37, 4  ;;  %v1057_v58 = vor.u32 %v1055_v8, %v1054_v17  ;;  %v1059_v55 = vrot.slane %v1054_v17, 4  ;;  %v1306_v1 = vsel %vm8045_vm13, %v1049_v43, %v1305_v14  ;;  %2791 = vmatmul.mubr.bf16.gmra.mrb[24].mxu0 %v6024_v40  ;;  %v8246_v46 = vld [vmem:[#allocation2 + $0x34] sm:$0xf] }
 0x1b5   : > { %v2073_v63 = vsel %vm7953_vm10, %v2071_v16, %v2072_v53  ;;  %v1501_v22 = vrot.slane %v1499_v23, 4  ;;  %v1502_v35 = vshll.u32 %v8218_v60, 16  ;;  %1307 = vst [vmem:[#allocation2 + $0x54] sm:$0xf] %v1306_v1  ;;  %v1075_v41 = vsel %vm8056_vm14, %v1067_v42, %v1074_v44  ;;  %6757 = vmatpush3.bf16.msra.mxu1 %v7364_v51  ;;  %v7373_v37 = vld [vmem:[#allocation8 + $0x1b0] sm:$0xff]   ;;  %v7374_v34 = vld [vmem:[#allocation8 + $0x1f8] sm:$0xff]  }
 0x1b6   : > { %v1317_v47 = vsel %vm7915_vm2, %v1076_v52, %v1316_v62  ;;  %v1058_v7 = vsel %vm8056_vm14, %v1050_v20, %v1057_v58  ;;  %v1310_v14 = vsel %vm7915_vm2, %v1059_v55, %v1309_v61  ;;  %1315 = vst [vmem:[#allocation2 + $0x64] sm:$0xf] %v1075_v41  ;;  %v6072_v3 = vcombine.low %v8216_v59, %v2073_v63  ;;  %v8251_v40 = vld [vmem:[#allocation2 + $0x38] sm:$0x1]  ;;  %v7324_v41 = vld [vmem:[#allocation2 + $0x3c] sm:$0xff]  }
 0x1b7   : > { %1318 = vst [vmem:[#allocation2 + $0x68] sm:$0x1] %v1317_v47  ;;  %1308 = vst [vmem:[#allocation2 + $0x58] sm:$0xf] %v1058_v7  ;;  %v1504_v8 = vrot.slane %v1502_v35, 5  ;;  %v1508_v18 = vshll.u32 %v8226_v56, 16  ;;  %v6025_v53 = vcombine.low %v8218_v60, %v8226_v56  ;;  %6867 = vmatpush3.bf16.msra.mxu0 %v7373_v37 }
 0x1b8   : > { %1311 = vst [vmem:[#allocation2 + $0x5c] sm:$0x1] %v1310_v14  ;;  %v1512_v54 = vshrl.u32 %v8226_v56, 16  ;;  %v1518_v42 = vshll.u32 %v1410_v25, 16  ;;  %v6057_v11 = vrot.slane %v2005_v28, 9  ;;  %v2076_v16 = vrot.slane %v8226_v56, 5  ;;  %2534 = vmatmul.mubr.bf16.gmra.mrb[24].mxu1 %v6072_v3  ;;  %6868 = vmatprep.subr.bf16.mxu0 %v7374_v34 }
 0x1b9   : > { %v2079_v45 = vrot.slane %v1410_v25, 5  ;;  %v1505_v62 = vor.u32 %v1504_v8, %v1501_v22  ;;  %v1510_v59 = vrot.slane %v1508_v18, 5  ;;  %v7376_v43 = vld [vmem:[#allocation8 + $0x200] sm:$0xff]   ;;  %2541 = vmatprep.mubr.bf16.mxu1 %v7321_v38  ;;  %v1523_v51 = vshrl.u32 %v8241_v2, 16  ;;  %v7375_v60 = vld [vmem:[#allocation8 + $0x1b8] sm:$0xff]  }
 0x1ba   : > { %v1514_v17 = vrot.slane %v1512_v54, 4  ;;  %v1520_v20 = vrot.slane %v1518_v42, 5  ;;  %v2077_v61 = vsel %vm7953_vm10, %v6057_v11, %v2076_v16  ;;  %v2078_v23 = vrot.slane %v2076_v16, 4  ;;  %7062 = vmatprep.subr.bf16.mxu1 %v7376_v43  ;;  %v1326_v25 = vld [vmem:[#allocation2 + $0x78] sm:$0xf] }
 0x1bb   : > { %v1506_v9 = vrot.slane %v1505_v62, 4  ;;  %v1526_v52 = vshll.u32 %v8241_v2, 16  ;;  %v1532_v58 = vshll.u32 %v8246_v46, 16  ;;  %v1525_v56 = vrot.slane %v1523_v51, 4  ;;  %v2006_v16 = vld [vmem:[#allocation2 + $0x30] sm:$0xe]  ;;  %6869 = vmatpush3.bf16.msra.mxu0 %v7375_v60 }
 0x1bc   : > { %v1515_v44 = vor.u32 %v1514_v17, %v1510_v59  ;;  %v2080_v55 = vsel %vm7953_vm10, %v2078_v23, %v2079_v45  ;;  %v1536_v1 = vshrl.u32 %v8246_v46, 16  ;;  %v1542_v63 = vshll.u32 %v8251_v40, 16  ;;  %v1319_v17 = vld [vmem:[#allocation2 + $0x6c] sm:$0xf] }
 0x1bd   : > { %v1511_v22 = vsel %vm7949_vm7, %v1506_v9, %v1510_v59  ;;  %v6073_v28 = vcombine.low %v2077_v61, %v2080_v55  ;;  %v1528_v47 = vrot.slane %v1526_v52, 5  ;;  %v1534_v7 = vrot.slane %v1532_v58, 5  ;;  %v1330_v9 = vld [vmem:[#allocation2 + $0x80] sm:$0x1] }
 0x1be   : > { %v1516_v35 = vrot.slane %v1515_v44, 4  ;;  %v1538_v14 = vrot.slane %v1536_v1, 4  ;;  %v1544_v3 = vrot.slane %v1542_v63, 5  ;;  %v1101_v38 = vrot.slane %v8086_v21, 4 }
 0x1bf   : > { %v1529_v18 = vor.u32 %v1528_v47, %v1525_v56  ;;  %v1327_v54 = vsel %vm8045_vm13, %v8112_v29, %v1326_v25  ;;  %v9883_v42 = vshrl.u32 %v8033_v57, 16  ;;  %v1081_v37 = vshll.u32 %v8033_v57, 16  ;;  %v8285_v56 = vld [vmem:[#allocation2 + $0x3c] sm:$0xf]  ;;  %v1323_v47 = vld [vmem:[#allocation2 + $0x74] sm:$0x1] }
 0x1c0   : > { %v1521_v8 = vsel %vm7949_vm7, %v1516_v35, %v1520_v20  ;;  %v1539_v4 = vor.u32 %v1538_v14, %v1534_v7  ;;  %1328 = vst [vmem:[#allocation2 + $0x78] sm:$0xf] %v1327_v54  ;;  %v1103_v21 = vshrl.u32 %v8117_v31, 16  ;;  %2542 = vmatmul.mubr.bf16.gmra.mrb[28].mxu1 %v6073_v28  ;;  %v1106_v34 = vshll.u32 %v8117_v31, 16  ;;  %v1412_v35 = vld [vmem:[#allocation2 + $0x44] sm:$0x1] }
 0x1c1   : > { %v1080_v11 = vrot.slane %v9883_v42, 7  ;;  %v6041_v45 = vcombine.low %v1511_v22, %v1521_v8  ;;  %v1530_v62 = vrot.slane %v1529_v18, 4  ;;  %v9884_v29 = vmax.f32 %v8028_v50, 0.0  ;;  %2549 = vmatprep.mubr.bf16.mxu1 %v7324_v41  ;;  %v8289_v22 = vld [vmem:[#allocation2 + $0x40] sm:$0xf] }
 0x1c2   : > { %v1540_v20 = vrot.slane %v1539_v4, 4  ;;  %v1105_v23 = vrot.slane %v1103_v21, 7  ;;  %v6058_v51 = vrot.slane %v2006_v16, 9  ;;  %v2083_v58 = vrot.slane %v8246_v46, 5  ;;  %v2007_v16 = vld [vmem:[#allocation2 + $0x3c] sm:$0xe] }
 0x1c3   : > { %v1084_v59 = vrot.slane %v1080_v11, 4  ;;  %v6351_v43 = vpack.c.bf16 %v9884_v29, %v9884_v29  ;;  %2798 = vmatprep.mubr.bf16.mxu0 %v6041_v45  ;;  %v1083_v61 = vor.u32 %v1081_v37, %v1080_v11  ;;  %v1535_v57 = vsel %vm7949_vm7, %v1530_v62, %v1534_v7  ;;  %v7327_v4 = vld [vmem:[#allocation2 + $0x48] sm:$0xff]  }
 0x1c4   : > { %2799 = vmatmul.mubr.bf16.gmra.mrb[28].mxu0 %v6025_v53  ;;  %v1545_v50 = vsel %vm7949_vm7, %v1540_v20, %v1544_v3  ;;  %v1108_v60 = vor.u32 %v1106_v34, %v1105_v23  ;;  %v1110_v55 = vrot.slane %v1105_v23, 4  ;;  %v2084_v63 = vsel %vm7953_vm10, %v6058_v51, %v2083_v58  ;;  %v8308_v21 = vld [vmem:[#allocation2 + $0x48] sm:$0xf] }
 0x1c5   : > { %v1086_v44 = vshrl.u32 %v6351_v43, 16  ;;  %v1089_v52 = vshll.u32 %v6351_v43, 16  ;;  %v1320_v31 = vsel %vm8045_vm13, %v1083_v61, %v1319_v17  ;;  %v6042_v1 = vcombine.low %v1535_v57, %v1545_v50  ;;  %v8310_v43 = vld [vmem:[#allocation2 + $0x4c] sm:$0xf] }
 0x1c6   : > { %1321 = vst [vmem:[#allocation2 + $0x6c] sm:$0xf] %v1320_v31  ;;  %v2085_v25 = vrot.slane %v2083_v58, 4  ;;  %v1109_v28 = vsel %vm8056_vm14, %v1101_v38, %v1108_v60  ;;  %v1331_v41 = vsel %vm7915_vm2, %v1110_v55, %v1330_v9  ;;  %v2086_v7 = vrot.slane %v8251_v40, 5  ;;  %v8315_v9 = vld [vmem:[#allocation2 + $0x50] sm:$0x1] }
 0x1c7   : > { %v1088_v53 = vrot.slane %v1086_v44, 7  ;;  %v6026_v14 = vcombine.low %v8241_v2, %v8246_v46  ;;  %2806 = vmatprep.mubr.bf16.mxu0 %v6042_v1  ;;  %1329 = vst [vmem:[#allocation2 + $0x7c] sm:$0xf] %v1109_v28  ;;  %1332 = vst [vmem:[#allocation2 + $0x80] sm:$0x1] %v1331_v41  ;;  %v1547_v18 = vshrl.u32 %v8285_v56, 16  ;;  %v6027_v23 = vcombine.low %v8285_v56, %v8289_v22 }
 0x1c8   : > { %v1550_v54 = vshll.u32 %v8285_v56, 16  ;;  %v2087_v38 = vsel %vm7953_vm10, %v2085_v25, %v2086_v7  ;;  %v1556_v42 = vshll.u32 %v8289_v22, 16  ;;  %v1560_v11 = vshrl.u32 %v8289_v22, 16  ;;  %v7330_v7 = vld [vmem:[#allocation2 + $0x54] sm:$0xff]  }
 0x1c9   : > { %v1091_v3 = vor.u32 %v1089_v52, %v1088_v53  ;;  %v1093_v8 = vrot.slane %v1088_v53, 4  ;;  %v1566_v40 = vshll.u32 %v1412_v35, 16  ;;  %v6074_v45 = vcombine.low %v2084_v63, %v2087_v38  ;;  %v8333_v38 = vld [vmem:[%s9839_s4] ss:$0 sm:$0xff] }
 0x1ca   : > { %v1549_v37 = vrot.slane %v1547_v18, 4  ;;  %v1552_v62 = vrot.slane %v1550_v54, 5  ;;  %v1558_v17 = vrot.slane %v1556_v42, 5  ;;  %v1562_v34 = vrot.slane %v1560_v11, 4 }
 0x1cb   : > { %v1092_v2 = vsel %vm8056_vm14, %v1084_v59, %v1091_v3  ;;  %v1324_v46 = vsel %vm7915_vm2, %v1093_v8, %v1323_v47  ;;  %v1568_v29 = vrot.slane %v1566_v40, 5  ;;  %2550 = vmatmul.mubr.bf16.gmra.mrb[32].mxu1 %v6074_v45  ;;  %v6059_v20 = vrot.slane %v2007_v16, 9  ;;  %v2008_v3 = vld [vmem:[#allocation2 + $0x48] sm:$0xe] }
 0x1cc   : > { %1322 = vst [vmem:[#allocation2 + $0x70] sm:$0xf] %v1092_v2  ;;  %1325 = vst [vmem:[#allocation2 + $0x74] sm:$0x1] %v1324_v46  ;;  %2807 = vmatmul.mubr.bf16.gmra.mrb[32].mxu0 %v6026_v14  ;;  %v2090_v59 = vrot.slane %v8289_v22, 5  ;;  %v2093_v61 = vrot.slane %v1412_v35, 5  ;;  %2557 = vmatprep.mubr.bf16.mxu1 %v7327_v4  ;;  %v1553_v51 = vor.u32 %v1552_v62, %v1549_v37 }
 0x1cd   : > { %v1563_v57 = vor.u32 %v1562_v34, %v1558_v17  ;;  %v1571_v44 = vshrl.u32 %v8308_v21, 16  ;;  %v1574_v52 = vshll.u32 %v8308_v21, 16  ;;  %v1580_v31 = vshll.u32 %v8310_v43, 16 }
 0x1ce   : > { %v2091_v58 = vsel %vm7953_vm10, %v6059_v20, %v2090_v59  ;;  %v2092_v50 = vrot.slane %v2090_v59, 4  ;;  %v1584_v60 = vshrl.u32 %v8310_v43, 16  ;;  %v1554_v55 = vrot.slane %v1553_v51, 4 }
 0x1cf   : > { %v1564_v1 = vrot.slane %v1563_v57, 4  ;;  %v1573_v56 = vrot.slane %v1571_v44, 4  ;;  %v1576_v53 = vrot.slane %v1574_v52, 5  ;;  %v1582_v25 = vrot.slane %v1580_v31, 5 }
 0x1d0   : > { %v2094_v63 = vsel %vm7953_vm10, %v2092_v50, %v2093_v61  ;;  %v1586_v22 = vrot.slane %v1584_v60, 4  ;;  %v1590_v35 = vshll.u32 %v8315_v9, 16  ;;  %v1559_v28 = vsel %vm7949_vm7, %v1554_v55, %v1558_v17 }
 0x1d1   : > { %v1569_v41 = vsel %vm7949_vm7, %v1564_v1, %v1568_v29  ;;  %v6075_v47 = vcombine.low %v2091_v58, %v2094_v63  ;;  %v1577_v14 = vor.u32 %v1576_v53, %v1573_v56  ;;  %v664_v42 = vadd.f32 %v8333_v38, %v8038_v5  ;;  %v8353_v58 = vld [vmem:[#allocation2 + $0x54] sm:$0xf]  ;;  %v1340_v56 = vld [vmem:[#allocation2 + $0x90] sm:$0xf] }
 0x1d2   : > { %v6043_v8 = vcombine.low %v1559_v28, %v1569_v41  ;;  %v1587_v18 = vor.u32 %v1586_v22, %v1582_v25  ;;  %v1592_v54 = vrot.slane %v1590_v35, 5  ;;  %v656_v40 = vadd.f32 %v8333_v38, %v8041_v12  ;;  %v1333_v35 = vld [vmem:[#allocation2 + $0x84] sm:$0xf] }
 0x1d3   : > { %v1578_v11 = vrot.slane %v1577_v14, 4  ;;  %v667_v16 = vadd.f32 %v8333_v38, %v8050_v19  ;;  %v659_v2 = vadd.f32 %v8333_v38, %v8052_v27  ;;  %2558 = vmatmul.mubr.bf16.gmra.mrb[36].mxu1 %v6075_v47  ;;  %v724_v45 = vmax.f32 %v664_v42, 0.0  ;;  %v1344_v47 = vld [vmem:[#allocation2 + $0x98] sm:$0x1]  ;;  %v7333_v14 = vld [vmem:[#allocation2 + $0x60] sm:$0xff]  }
 0x1d4   : > { %2814 = vmatprep.mubr.bf16.mxu0 %v6043_v8  ;;  %v1588_v46 = vrot.slane %v1587_v18, 4  ;;  %v6060_v4 = vrot.slane %v2008_v3, 9  ;;  %v2097_v37 = vrot.slane %v8310_v43, 5  ;;  %2565 = vmatprep.mubr.bf16.mxu1 %v7330_v7  ;;  %v722_v62 = vmax.f32 %v656_v40, 0.0  ;;  %v8359_v40 = vld [vmem:[#allocation2 + $0x58] sm:$0xf] }
 0x1d5   : > { %2815 = vmatmul.mubr.bf16.gmra.mrb[36].mxu0 %v6027_v23  ;;  %v1583_v5 = vsel %vm7949_vm7, %v1578_v11, %v1582_v25  ;;  %v725_v12 = vmax.f32 %v667_v16, 0.0  ;;  %v723_v17 = vmax.f32 %v659_v2, 0.0  ;;  %v6356_v34 = vpack.c.bf16 %v724_v45, %v724_v45  ;;  %v1337_v11 = vld [vmem:[#allocation2 + $0x8c] sm:$0x1]  ;;  %v1414_v45 = vld [vmem:[#allocation2 + $0x5c] sm:$0x1] }
 0x1d6   : > { %v1593_v19 = vsel %vm7949_vm7, %v1588_v46, %v1592_v54  ;;  %v2098_v27 = vsel %vm7953_vm10, %v6060_v4, %v2097_v37  ;;  %v2099_v29 = vrot.slane %v2097_v37, 4  ;;  %v6354_v59 = vpack.c.bf16 %v722_v62, %v722_v62  ;;  %v2009_v37 = vld [vmem:[#allocation2 + $0x54] sm:$0xe] }
 0x1d7   : > { %v6044_v20 = vcombine.low %v1583_v5, %v1593_v19  ;;  %v6357_v61 = vpack.c.bf16 %v725_v12, %v725_v12  ;;  %v6355_v51 = vpack.c.bf16 %v723_v17, %v723_v17  ;;  %v1129_v23 = vshrl.u32 %v6356_v34, 16 }
 0x1d8   : > { %v1132_v57 = vshll.u32 %v6356_v34, 16  ;;  %v2100_v44 = vrot.slane %v8315_v9, 5  ;;  %v6028_v52 = vcombine.low %v8308_v21, %v8310_v43  ;;  %v1112_v50 = vshrl.u32 %v6354_v59, 16 }
 0x1d9   : > { %2822 = vmatprep.mubr.bf16.mxu0 %v6044_v20  ;;  %v1115_v31 = vshll.u32 %v6354_v59, 16  ;;  %v1137_v60 = vshrl.u32 %v6357_v61, 16  ;;  %v1140_v55 = vshll.u32 %v6357_v61, 16  ;;  %v1131_v1 = vrot.slane %v1129_v23, 7  ;;  %v8375_v20 = vld [vmem:[#allocation2 + $0x60] sm:$0xf] }
 0x1da   : > { %v1120_v53 = vshrl.u32 %v6355_v51, 16  ;;  %v1123_v63 = vshll.u32 %v6355_v51, 16  ;;  %v2101_v25 = vsel %vm7953_vm10, %v2099_v29, %v2100_v44  ;;  %v1114_v22 = vrot.slane %v1112_v50, 7 }
 0x1db   : > { %v1139_v9 = vrot.slane %v1137_v60, 7  ;;  %v6076_v28 = vcombine.low %v2098_v27, %v2101_v25  ;;  %v1595_v21 = vshrl.u32 %v8353_v58, 16  ;;  %v1134_v43 = vor.u32 %v1132_v57, %v1131_v1  ;;  %v8378_v57 = vld [vmem:[#allocation2 + $0x64] sm:$0xf]  ;;  %v8382_v60 = vld [vmem:[#allocation2 + $0x68] sm:$0x1] }
 0x1dc   : > { %v1135_v41 = vrot.slane %v1131_v1, 4  ;;  %v1122_v7 = vrot.slane %v1120_v53, 7  ;;  %v1598_v3 = vshll.u32 %v8353_v58, 16  ;;  %v1117_v8 = vor.u32 %v1115_v31, %v1114_v22 }
 0x1dd   : > { %v1118_v18 = vrot.slane %v1114_v22, 4  ;;  %v1142_v54 = vor.u32 %v1140_v55, %v1139_v9  ;;  %v1144_v42 = vrot.slane %v1139_v9, 4  ;;  %2566 = vmatmul.mubr.bf16.gmra.mrb[40].mxu1 %v6076_v28  ;;  %2823 = vmatmul.mubr.bf16.gmra.mrb[40].mxu0 %v6028_v52  ;;  %v1341_v16 = vsel %vm8045_vm13, %v1134_v43, %v1340_v56  ;;  %v7336_v28 = vld [vmem:[#allocation2 + $0x6c] sm:$0xff]  }
 0x1de   : > { %v1125_v2 = vor.u32 %v1123_v63, %v1122_v7  ;;  %v1127_v46 = vrot.slane %v1122_v7, 4  ;;  %2573 = vmatprep.mubr.bf16.mxu1 %v7333_v14  ;;  %v1597_v4 = vrot.slane %v1595_v21, 4  ;;  %1342 = vst [vmem:[#allocation2 + $0x90] sm:$0xf] %v1341_v16  ;;  %v1334_v5 = vsel %vm8045_vm13, %v1117_v8, %v1333_v35 }
 0x1df   : > { %v1143_v62 = vsel %vm8056_vm14, %v1135_v41, %v1142_v54  ;;  %v1345_v12 = vsel %vm7915_vm2, %v1144_v42, %v1344_v47  ;;  %v1600_v17 = vrot.slane %v1598_v3, 5  ;;  %1335 = vst [vmem:[#allocation2 + $0x84] sm:$0xf] %v1334_v5  ;;  %v1604_v27 = vshll.u32 %v8359_v40, 16  ;;  %v2010_v41 = vld [vmem:[#allocation2 + $0x60] sm:$0xe] }
 0x1e0   : > { %1343 = vst [vmem:[#allocation2 + $0x94] sm:$0xf] %v1143_v62  ;;  %1346 = vst [vmem:[#allocation2 + $0x98] sm:$0x1] %v1345_v12  ;;  %v1126_v19 = vsel %vm8056_vm14, %v1118_v18, %v1125_v2  ;;  %v1338_v34 = vsel %vm7915_vm2, %v1127_v46, %v1337_v11  ;;  %v1608_v29 = vshrl.u32 %v8359_v40, 16  ;;  %v1614_v61 = vshll.u32 %v1414_v45, 16 }
 0x1e1   : > { %1336 = vst [vmem:[#allocation2 + $0x88] sm:$0xf] %v1126_v19  ;;  %1339 = vst [vmem:[#allocation2 + $0x8c] sm:$0x1] %v1338_v34  ;;  %v1601_v59 = vor.u32 %v1600_v17, %v1597_v4  ;;  %v6061_v51 = vrot.slane %v2009_v37, 9  ;;  %v2104_v23 = vrot.slane %v8359_v40, 5  ;;  %v6029_v31 = vcombine.low %v8353_v58, %v8359_v40 }
 0x1e2   : > { %v1606_v44 = vrot.slane %v1604_v27, 5  ;;  %v1610_v52 = vrot.slane %v1608_v29, 4  ;;  %v2107_v50 = vrot.slane %v1414_v45, 5  ;;  %v1616_v1 = vrot.slane %v1614_v61, 5 }
 0x1e3   : > { %v1602_v55 = vrot.slane %v1601_v59, 4  ;;  %v2105_v56 = vsel %vm7953_vm10, %v6061_v51, %v2104_v23  ;;  %v2106_v53 = vrot.slane %v2104_v23, 4  ;;  %v1619_v25 = vshrl.u32 %v8375_v20, 16 }
 0x1e4   : > { %v1611_v63 = vor.u32 %v1610_v52, %v1606_v44  ;;  %v1622_v22 = vshll.u32 %v8375_v20, 16  ;;  %v1628_v35 = vshll.u32 %v8378_v57, 16  ;;  %v1632_v21 = vshrl.u32 %v8378_v57, 16 }
 0x1e5   : > { %v1607_v9 = vsel %vm7949_vm7, %v1602_v55, %v1606_v44  ;;  %v2108_v58 = vsel %vm7953_vm10, %v2106_v53, %v2107_v50  ;;  %v1638_v43 = vshll.u32 %v8382_v60, 16  ;;  %v1621_v14 = vrot.slane %v1619_v25, 4 }
 0x1e6   : > { %v1612_v47 = vrot.slane %v1611_v63, 4  ;;  %v6077_v7 = vcombine.low %v2105_v56, %v2108_v58  ;;  %v1624_v3 = vrot.slane %v1622_v22, 5  ;;  %v1630_v8 = vrot.slane %v1628_v35, 5  ;;  %v1354_v56 = vld [vmem:[#allocation2 + $0xa8] sm:$0xf] }
 0x1e7   : > { %v1634_v18 = vrot.slane %v1632_v21, 4  ;;  %v1640_v54 = vrot.slane %v1638_v43, 5  ;;  %v680_v42 = vadd.f32 %v8333_v38, %v8072_v6  ;;  %v672_v16 = vadd.f32 %v8333_v38, %v8079_v15  ;;  %v1347_v22 = vld [vmem:[#allocation2 + $0x9c] sm:$0xf]  ;;  %v1358_v21 = vld [vmem:[#allocation2 + $0xb0] sm:$0x1] }
 0x1e8   : > { %v1617_v11 = vsel %vm7949_vm7, %v1612_v47, %v1616_v1  ;;  %2574 = vmatmul.mubr.bf16.gmra.mrb[44].mxu1 %v6077_v7  ;;  %v1625_v40 = vor.u32 %v1624_v3, %v1621_v14  ;;  %v683_v2 = vadd.f32 %v8333_v38, %v8089_v24  ;;  %v675_v37 = vadd.f32 %v8333_v38, %v8093_v33  ;;  %v8510_v30 = vld [vmem:[#allocation2 + $0x94] sm:$0xf] }
 0x1e9   : > { %v6045_v46 = vcombine.low %v1607_v9, %v1617_v11  ;;  %2581 = vmatprep.mubr.bf16.mxu1 %v7336_v28  ;;  %v1635_v45 = vor.u32 %v1634_v18, %v1630_v8  ;;  %v728_v4 = vmax.f32 %v680_v42, 0.0  ;;  %v726_v6 = vmax.f32 %v672_v16, 0.0  ;;  %v8415_v18 = vld [vmem:[#allocation2 + $0x6c] sm:$0xf] }
 0x1ea   : > { %v1626_v5 = vrot.slane %v1625_v40, 4  ;;  %v729_v62 = vmax.f32 %v683_v2, 0.0  ;;  %v6062_v12 = vrot.slane %v2010_v41, 9  ;;  %v727_v34 = vmax.f32 %v675_v37, 0.0  ;;  %v1351_v41 = vld [vmem:[#allocation2 + $0xa4] sm:$0x1] }
 0x1eb   : > { %2830 = vmatprep.mubr.bf16.mxu0 %v6045_v46  ;;  %v1636_v17 = vrot.slane %v1635_v45, 4  ;;  %v6360_v19 = vpack.c.bf16 %v728_v4, %v728_v4  ;;  %v2111_v15 = vrot.slane %v8378_v57, 5  ;;  %v6358_v27 = vpack.c.bf16 %v726_v6, %v726_v6  ;;  %v8421_v2 = vld [vmem:[#allocation2 + $0x70] sm:$0xf]  ;;  %v1416_v46 = vld [vmem:[#allocation2 + $0x74] sm:$0x1] }
 0x1ec   : > { %2831 = vmatmul.mubr.bf16.gmra.mrb[44].mxu0 %v6029_v31  ;;  %v1631_v24 = vsel %vm7949_vm7, %v1626_v5, %v1630_v8  ;;  %v6361_v29 = vpack.c.bf16 %v729_v62, %v729_v62  ;;  %v2114_v59 = vrot.slane %v8382_v60, 5  ;;  %v6359_v23 = vpack.c.bf16 %v727_v34, %v727_v34  ;;  %v7341_v6 = vld [vmem:[#allocation2 + $0x78] sm:$0xff]  }
 0x1ed   : > { %v1641_v33 = vsel %vm7949_vm7, %v1636_v17, %v1640_v54  ;;  %v1163_v61 = vshrl.u32 %v6360_v19, 16  ;;  %v1166_v51 = vshll.u32 %v6360_v19, 16  ;;  %v1146_v52 = vshrl.u32 %v6358_v27, 16  ;;  %v2011_v54 = vld [vmem:[#allocation2 + $0x6c] sm:$0xe] }
 0x1ee   : > { %v6046_v44 = vcombine.low %v1631_v24, %v1641_v33  ;;  %v1149_v50 = vshll.u32 %v6358_v27, 16  ;;  %v1171_v55 = vshrl.u32 %v6361_v29, 16  ;;  %v1174_v31 = vshll.u32 %v6361_v29, 16  ;;  %v8437_v24 = vld [vmem:[#allocation2 + $0x78] sm:$0xf] }
 0x1ef   : > { %v1165_v1 = vrot.slane %v1163_v61, 7  ;;  %v1154_v53 = vshrl.u32 %v6359_v23, 16  ;;  %v1157_v63 = vshll.u32 %v6359_v23, 16  ;;  %v1148_v25 = vrot.slane %v1146_v52, 7  ;;  %v8440_v61 = vld [vmem:[#allocation2 + $0x7c] sm:$0xf] }
 0x1f0   : > { %2838 = vmatprep.mubr.bf16.mxu0 %v6046_v44  ;;  %v1173_v35 = vrot.slane %v1171_v55, 7  ;;  %v2112_v60 = vsel %vm7953_vm10, %v6062_v12, %v2111_v15  ;;  %v2113_v9 = vrot.slane %v2111_v15, 4  ;;  %v6030_v47 = vcombine.low %v8375_v20, %v8378_v57 }
 0x1f1   : > { %v1168_v58 = vor.u32 %v1166_v51, %v1165_v1  ;;  %v1169_v28 = vrot.slane %v1165_v1, 4  ;;  %v1156_v43 = vrot.slane %v1154_v53, 7  ;;  %v1151_v7 = vor.u32 %v1149_v50, %v1148_v25  ;;  %v8444_v50 = vld [vmem:[#allocation2 + $0x80] sm:$0x1] }
 0x1f2   : > { %v1152_v14 = vrot.slane %v1148_v25, 4  ;;  %v1176_v3 = vor.u32 %v1174_v31, %v1173_v35  ;;  %v1178_v8 = vrot.slane %v1173_v35, 4  ;;  %v2115_v16 = vsel %vm7953_vm10, %v2113_v9, %v2114_v59  ;;  %v806_v53 = vld [vmem:[#allocation2 + $0xc0] sm:$0x1] }
 0x1f3   : > { %v1355_v42 = vsel %vm8045_vm13, %v1168_v58, %v1354_v56  ;;  %v1159_v11 = vor.u32 %v1157_v63, %v1156_v43  ;;  %v1161_v40 = vrot.slane %v1156_v43, 4  ;;  %v1348_v20 = vsel %vm8045_vm13, %v1151_v7, %v1347_v22 }
 0x1f4   : > { %1356 = vst [vmem:[#allocation2 + $0xa8] sm:$0xf] %v1355_v42  ;;  %v1177_v57 = vsel %vm8056_vm14, %v1169_v28, %v1176_v3  ;;  %v1359_v45 = vsel %vm7915_vm2, %v1178_v8, %v1358_v21  ;;  %v6078_v4 = vcombine.low %v2112_v60, %v2115_v16  ;;  %2839 = vmatmul.mubr.bf16.gmra.mrb[48].mxu0 %v6030_v47  ;;  %1349 = vst [vmem:[#allocation2 + $0x9c] sm:$0xf] %v1348_v20  ;;  %v803_v60 = vld [vmem:[#allocation2 + $0xb4] sm:$0x1] }
 0x1f5   : > { %1357 = vst [vmem:[#allocation2 + $0xac] sm:$0xf] %v1177_v57  ;;  %1360 = vst [vmem:[#allocation2 + $0xb0] sm:$0x1] %v1359_v45  ;;  %v1160_v37 = vsel %vm8056_vm14, %v1152_v14, %v1159_v11  ;;  %v1352_v5 = vsel %vm7915_vm2, %v1161_v40, %v1351_v41  ;;  %v1643_v62 = vshrl.u32 %v8415_v18, 16  ;;  %v1646_v12 = vshll.u32 %v8415_v18, 16 }
 0x1f6   : > { %1350 = vst [vmem:[#allocation2 + $0xa0] sm:$0xf] %v1160_v37  ;;  %1353 = vst [vmem:[#allocation2 + $0xa4] sm:$0x1] %v1352_v5  ;;  %2582 = vmatmul.mubr.bf16.gmra.mrb[48].mxu1 %v6078_v4  ;;  %v1652_v17 = vshll.u32 %v8421_v2, 16  ;;  %v1656_v19 = vshrl.u32 %v8421_v2, 16  ;;  %v6031_v52 = vcombine.low %v8415_v18, %v8421_v2 }
 0x1f7   : > { %v1662_v34 = vshll.u32 %v1416_v46, 16  ;;  %v6063_v15 = vrot.slane %v2011_v54, 9  ;;  %2589 = vmatprep.mubr.bf16.mxu1 %v7341_v6  ;;  %v1645_v27 = vrot.slane %v1643_v62, 4  ;;  %v1648_v29 = vrot.slane %v1646_v12, 5  ;;  %v7344_v28 = vld [vmem:[#allocation2 + $0x84] sm:$0xff]  }
 0x1f8   : > { %v2118_v59 = vrot.slane %v8421_v2, 5  ;;  %v2121_v33 = vrot.slane %v1416_v46, 5  ;;  %v1654_v51 = vrot.slane %v1652_v17, 5  ;;  %v1658_v23 = vrot.slane %v1656_v19, 4  ;;  %v856_v42 = vld [vmem:[#allocation2 + $0xc8] sm:$0x1] }
 0x1f9   : > { %v1664_v44 = vrot.slane %v1662_v34, 5  ;;  %v1649_v55 = vor.u32 %v1648_v29, %v1645_v27  ;;  %v1667_v31 = vshrl.u32 %v8437_v24, 16  ;;  %v1670_v25 = vshll.u32 %v8437_v24, 16  ;;  %v853_v46 = vld [vmem:[#allocation2 + $0xbc] sm:$0x1] }
 0x1fa   : > { %v2119_v1 = vsel %vm7953_vm10, %v6063_v15, %v2118_v59  ;;  %v2120_v56 = vrot.slane %v2118_v59, 4  ;;  %v1659_v63 = vor.u32 %v1658_v23, %v1654_v51  ;;  %v1676_v22 = vshll.u32 %v8440_v61, 16  ;;  %v2012_v4 = vld [vmem:[#allocation2 + $0x78] sm:$0xe] }
 0x1fb   : > { %v1680_v35 = vshrl.u32 %v8440_v61, 16  ;;  %v1650_v9 = vrot.slane %v1649_v55, 4  ;;  %v1669_v21 = vrot.slane %v1667_v31, 4  ;;  %v1686_v43 = vshll.u32 %v8444_v50, 16 }
 0x1fc   : > { %v2122_v58 = vsel %vm7953_vm10, %v2120_v56, %v2121_v33  ;;  %v1660_v41 = vrot.slane %v1659_v63, 4  ;;  %v1672_v7 = vrot.slane %v1670_v25, 5  ;;  %v1678_v14 = vrot.slane %v1676_v22, 5  ;;  %v8481_v56 = vld [vmem:[#allocation2 + $0x84] sm:$0xf] }
 0x1fd   : > { %v6079_v47 = vcombine.low %v2119_v1, %v2122_v58  ;;  %v1655_v3 = vsel %vm7949_vm7, %v1650_v9, %v1654_v51  ;;  %v1682_v8 = vrot.slane %v1680_v35, 4  ;;  %v1688_v18 = vrot.slane %v1686_v43, 5 }
 0x1fe   : > { %v696_v54 = vadd.f32 %v8333_v38, %v8132_v49  ;;  %v1665_v11 = vsel %vm7949_vm7, %v1660_v41, %v1664_v44  ;;  %v1673_v40 = vor.u32 %v1672_v7, %v1669_v21  ;;  %v807_v16 = vsel %vm7915_vm2, 0, %v806_v53 }
 0x1ff   : > { %2590 = vmatmul.mubr.bf16.gmra.mrb[52].mxu1 %v6079_v47  ;;  %v688_v2 = vadd.f32 %v8333_v38, %v8144_v48  ;;  %v6047_v20 = vcombine.low %v1655_v3, %v1665_v11  ;;  %v1683_v57 = vor.u32 %v1682_v8, %v1678_v14  ;;  %808 = vst [vmem:[#allocation2 + $0xc0] sm:$0x1] %v807_v16  ;;  %v804_v49 = vsel %vm7915_vm2, 0, %v803_v60 }
 0x200   : > { %2597 = vmatprep.mubr.bf16.mxu1 %v7344_v28  ;;  %v732_v45 = vmax.f32 %v696_v54, 0.0  ;;  %v1674_v37 = vrot.slane %v1673_v40, 4  ;;  %805 = vst [vmem:[#allocation2 + $0xb4] sm:$0x1] %v804_v49  ;;  %v699_v6 = vadd.f32 %v8333_v38, %v8152_v0  ;;  %v857_v62 = vsel %vm7922_vm4, 0, %v856_v42 }
 0x201   : > { %v730_v5 = vmax.f32 %v688_v2, 0.0  ;;  %2846 = vmatprep.mubr.bf16.mxu0 %v6047_v20  ;;  %v1684_v48 = vrot.slane %v1683_v57, 4  ;;  %858 = vst [vmem:[#allocation2 + $0xc8] sm:$0x1] %v857_v62  ;;  %v691_v17 = vadd.f32 %v8333_v38, %v8159_v10  ;;  %v854_v19 = vsel %vm7922_vm4, 0, %v853_v46 }
 0x202   : > { %v6364_v12 = vpack.c.bf16 %v732_v45, %v732_v45  ;;  %2847 = vmatmul.mubr.bf16.gmra.mrb[52].mxu0 %v6031_v52  ;;  %v1679_v34 = vsel %vm7949_vm7, %v1674_v37, %v1678_v14  ;;  %v733_v27 = vmax.f32 %v699_v6, 0.0  ;;  %855 = vst [vmem:[#allocation2 + $0xbc] sm:$0x1] %v854_v19  ;;  %v6064_v0 = vrot.slane %v2012_v4, 9  ;;  %v8492_v42 = vld [vmem:[#allocation2 + $0x88] sm:$0xf] }
 0x203   : > { %v6362_v15 = vpack.c.bf16 %v730_v5, %v730_v5  ;;  %v1689_v29 = vsel %vm7949_vm7, %v1684_v48, %v1688_v18  ;;  %v731_v51 = vmax.f32 %v691_v17, 0.0  ;;  %v2125_v52 = vrot.slane %v8440_v61, 5  ;;  %v1418_v46 = vld [vmem:[#allocation2 + $0x8c] sm:$0x1]  ;;  %v2013_v57 = vld [vmem:[#allocation2 + $0x84] sm:$0xe] }
 0x204   : > { %v1197_v59 = vshrl.u32 %v6364_v12, 16  ;;  %v1200_v33 = vshll.u32 %v6364_v12, 16  ;;  %v6048_v23 = vcombine.low %v1679_v34, %v1689_v29  ;;  %v6365_v38 = vpack.c.bf16 %v733_v27, %v733_v27  ;;  %v7349_v6 = vld [vmem:[#allocation2 + $0x90] sm:$0xff]  }
 0x205   : > { %v1180_v44 = vshrl.u32 %v6362_v15, 16  ;;  %v1183_v10 = vshll.u32 %v6362_v15, 16  ;;  %v6363_v55 = vpack.c.bf16 %v731_v51, %v731_v51  ;;  %v2128_v1 = vrot.slane %v8444_v50, 5  ;;  %v8507_v12 = vld [vmem:[#allocation2 + $0x90] sm:$0xf] }
 0x206   : > { %v1199_v39 = vrot.slane %v1197_v59, 7  ;;  %2854 = vmatprep.mubr.bf16.mxu0 %v6048_v23  ;;  %v1368_v31 = vld [vmem:[#allocation2 + $0xc0] sm:$0xf]  ;;  %v1205_v63 = vshrl.u32 %v6365_v38, 16  ;;  %v1208_v25 = vshll.u32 %v6365_v38, 16  ;;  %v6032_v22 = vcombine.low %v8437_v24, %v8440_v61 }
 0x207   : > { %v1182_v53 = vrot.slane %v1180_v44, 7  ;;  %v1361_v9 = vld [vmem:[#allocation2 + $0xb4] sm:$0xf]  ;;  %v1188_v58 = vshrl.u32 %v6363_v55, 16  ;;  %v1191_v28 = vshll.u32 %v6363_v55, 16  ;;  %v2126_v50 = vsel %vm7953_vm10, %v6064_v0, %v2125_v52 }
 0x208   : > { %v1202_v35 = vor.u32 %v1200_v33, %v1199_v39  ;;  %v1203_v60 = vrot.slane %v1199_v39, 4  ;;  %v1207_v41 = vrot.slane %v1205_v63, 7  ;;  %v1372_v7 = vld [vmem:[#allocation2 + $0xc8] sm:$0x1]  ;;  %v2127_v3 = vrot.slane %v2125_v52, 4 }
 0x209   : > { %v1185_v21 = vor.u32 %v1183_v10, %v1182_v53  ;;  %v1186_v43 = vrot.slane %v1182_v53, 4  ;;  %v1190_v14 = vrot.slane %v1188_v58, 7  ;;  %v1691_v8 = vshrl.u32 %v8481_v56, 16  ;;  %v1365_v54 = vld [vmem:[#allocation2 + $0xbc] sm:$0x1] }
 0x20a   : > { %v1369_v47 = vsel %vm8045_vm13, %v1202_v35, %v1368_v31  ;;  %v1210_v61 = vor.u32 %v1208_v25, %v1207_v41  ;;  %v1212_v18 = vrot.slane %v1207_v41, 4  ;;  %2855 = vmatmul.mubr.bf16.gmra.mrb[56].mxu0 %v6032_v22  ;;  %v1694_v11 = vshll.u32 %v8481_v56, 16  ;;  %v1419_v59 = vld [vmem:[#allocation2 + $0x98] sm:$0x1]  ;;  %v2014_v10 = vld [vmem:[#allocation2 + $0x90] sm:$0xe] }
 0x20b   : > { %1370 = vst [vmem:[#allocation2 + $0xc0] sm:$0xf] %v1369_v47  ;;  %v1362_v24 = vsel %vm8045_vm13, %v1185_v21, %v1361_v9  ;;  %v1193_v40 = vor.u32 %v1191_v28, %v1190_v14  ;;  %v1195_v16 = vrot.slane %v1190_v14, 4  ;;  %v2129_v2 = vsel %vm7953_vm10, %v2127_v3, %v2128_v1  ;;  %v7352_v22 = vld [vmem:[#allocation2 + $0x9c] sm:$0xff]  }
 0x20c   : > { %1363 = vst [vmem:[#allocation2 + $0xb4] sm:$0xf] %v1362_v24  ;;  %v1693_v20 = vrot.slane %v1691_v8, 4  ;;  %v1211_v13 = vsel %vm8056_vm14, %v1203_v60, %v1210_v61  ;;  %v1373_v45 = vsel %vm7915_vm2, %v1212_v18, %v1372_v7  ;;  %v6080_v49 = vcombine.low %v2126_v50, %v2129_v2  ;;  %v8524_v9 = vld [vmem:[#allocation2 + $0x9c] sm:$0xf] }
 0x20d   : > { %v1696_v4 = vrot.slane %v1694_v11, 5  ;;  %1371 = vst [vmem:[#allocation2 + $0xc4] sm:$0xf] %v1211_v13  ;;  %1374 = vst [vmem:[#allocation2 + $0xc8] sm:$0x1] %v1373_v45  ;;  %v1194_v37 = vsel %vm8056_vm14, %v1186_v43, %v1193_v40  ;;  %v1366_v5 = vsel %vm7915_vm2, %v1195_v16, %v1365_v54  ;;  %v1700_v62 = vshll.u32 %v8492_v42, 16 }
 0x20e   : > { %v1704_v48 = vshrl.u32 %v8492_v42, 16  ;;  %1364 = vst [vmem:[#allocation2 + $0xb8] sm:$0xf] %v1194_v37  ;;  %1367 = vst [vmem:[#allocation2 + $0xbc] sm:$0x1] %v1366_v5  ;;  %2598 = vmatmul.mubr.bf16.gmra.mrb[56].mxu1 %v6080_v49  ;;  %v1710_v19 = vshll.u32 %v1418_v46, 16  ;;  %v6033_v29 = vcombine.low %v8481_v56, %v8492_v42  ;;  %v6034_v24 = vcombine.low %v8507_v12, %v8510_v30 }
 0x20f   : > { %v1697_v17 = vor.u32 %v1696_v4, %v1693_v20  ;;  %v6065_v34 = vrot.slane %v2013_v57, 9  ;;  %v2132_v15 = vrot.slane %v8492_v42, 5  ;;  %2605 = vmatprep.mubr.bf16.mxu1 %v7349_v6  ;;  %v1702_v36 = vrot.slane %v1700_v62, 5  ;;  %v8529_v14 = vld [vmem:[#allocation2 + $0xa0] sm:$0xf] }
 0x210   : > { %v1706_v27 = vrot.slane %v1704_v48, 4  ;;  %v2135_v0 = vrot.slane %v1418_v46, 5  ;;  %v1712_v51 = vrot.slane %v1710_v19, 5  ;;  %v1715_v39 = vshrl.u32 %v8507_v12, 16  ;;  %v1420_v61 = vld [vmem:[#allocation2 + $0xa4] sm:$0x1] }
 0x211   : > { %v1698_v33 = vrot.slane %v1697_v17, 4  ;;  %v2133_v23 = vsel %vm7953_vm10, %v6065_v34, %v2132_v15  ;;  %v2134_v44 = vrot.slane %v2132_v15, 4  ;;  %v1718_v55 = vshll.u32 %v8507_v12, 16  ;;  %v2015_v57 = vld [vmem:[#allocation2 + $0x9c] sm:$0xe] }
 0x212   : > { %v1707_v38 = vor.u32 %v1706_v27, %v1702_v36  ;;  %v1724_v52 = vshll.u32 %v8510_v30, 16  ;;  %v1728_v31 = vshrl.u32 %v8510_v30, 16  ;;  %v1734_v53 = vshll.u32 %v1419_v59, 16  ;;  %v8545_v48 = vld [vmem:[#allocation2 + $0xa8] sm:$0xf] }
 0x213   : > { %v1703_v1 = vsel %vm7949_vm7, %v1698_v33, %v1702_v36  ;;  %v2136_v56 = vsel %vm7953_vm10, %v2134_v44, %v2135_v0  ;;  %v1717_v35 = vrot.slane %v1715_v39, 4  ;;  %v1720_v60 = vrot.slane %v1718_v55, 5  ;;  %v8547_v12 = vld [vmem:[#allocation2 + $0xac] sm:$0xf]  ;;  %v1421_v33 = vld [vmem:[#allocation2 + $0xb0] sm:$0x1] }
 0x214   : > { %v1708_v63 = vrot.slane %v1707_v38, 4  ;;  %v6081_v25 = vcombine.low %v2133_v23, %v2136_v56  ;;  %v1726_v58 = vrot.slane %v1724_v52, 5  ;;  %v1730_v28 = vrot.slane %v1728_v31, 4  ;;  %v2016_v52 = vld [vmem:[#allocation2 + $0xa8] sm:$0xe] }
 0x215   : > { %v1736_v21 = vrot.slane %v1734_v53, 5  ;;  %v6066_v43 = vrot.slane %v2014_v10, 9  ;;  %v1721_v50 = vor.u32 %v1720_v60, %v1717_v35  ;;  %v2139_v47 = vrot.slane %v8510_v30, 5  ;;  %v7357_v30 = vld [vmem:[#allocation2 + $0xa8] sm:$0xff]   ;;  %v8564_v60 = vld [vmem:[#allocation2 + $0xb4] sm:$0xf] }
 0x216   : > { %v1713_v41 = vsel %vm7949_vm7, %v1708_v63, %v1712_v51  ;;  %v2142_v7 = vrot.slane %v1419_v59, 5  ;;  %2606 = vmatmul.mubr.bf16.gmra.mrb[60].mxu1 %v6081_v25  ;;  %v1731_v8 = vor.u32 %v1730_v28, %v1726_v58  ;;  %v1739_v18 = vshrl.u32 %v8524_v9, 16 }
 0x217   : > { %v6049_v3 = vcombine.low %v1703_v1, %v1713_v41  ;;  %2613 = vmatprep.mubr.bf16.mxu1 %v7352_v22  ;;  %v1722_v54 = vrot.slane %v1721_v50, 4  ;;  %v2140_v42 = vsel %vm7953_vm10, %v6066_v43, %v2139_v47  ;;  %v2141_v11 = vrot.slane %v2139_v47, 4  ;;  %v8566_v41 = vld [vmem:[#allocation2 + $0xb8] sm:$0xf] }
 0x218   : > { %v1742_v40 = vshll.u32 %v8524_v9, 16  ;;  %v1732_v16 = vrot.slane %v1731_v8, 4  ;;  %v1741_v2 = vrot.slane %v1739_v18, 4  ;;  %v1748_v46 = vshll.u32 %v8529_v14, 16  ;;  %v7360_v8 = vld [vmem:[#allocation2 + $0xb4] sm:$0xff]  }
 0x219   : > { %2862 = vmatprep.mubr.bf16.mxu0 %v6049_v3  ;;  %v1752_v20 = vshrl.u32 %v8529_v14, 16  ;;  %v1727_v13 = vsel %vm7949_vm7, %v1722_v54, %v1726_v58  ;;  %v2143_v45 = vsel %vm7953_vm10, %v2141_v11, %v2142_v7  ;;  %v1758_v4 = vshll.u32 %v1420_v61, 16  ;;  %v1422_v54 = vld [vmem:[#allocation2 + $0xbc] sm:$0x1] }
 0x21a   : > { %2863 = vmatmul.mubr.bf16.gmra.mrb[60].mxu0 %v6033_v29  ;;  %v1744_v49 = vrot.slane %v1742_v40, 5  ;;  %v1737_v37 = vsel %vm7949_vm7, %v1732_v16, %v1736_v21  ;;  %v6082_v5 = vcombine.low %v2140_v42, %v2143_v45  ;;  %v1750_v6 = vrot.slane %v1748_v46, 5  ;;  %v2017_v45 = vld [vmem:[#allocation2 + $0xb4] sm:$0xe] }
 0x21b   : > { %v1754_v62 = vrot.slane %v1752_v20, 4  ;;  %v6050_v17 = vcombine.low %v1727_v13, %v1737_v37  ;;  %v1760_v34 = vrot.slane %v1758_v4, 5  ;;  %v6067_v15 = vrot.slane %v2015_v57, 9 }
 0x21c   : > { %v1745_v19 = vor.u32 %v1744_v49, %v1741_v2  ;;  %v2146_v27 = vrot.slane %v8529_v14, 5  ;;  %v2149_v0 = vrot.slane %v1420_v61, 5  ;;  %v6035_v29 = vcombine.low %v8524_v9, %v8529_v14 }
 0x21d   : > { %v1755_v36 = vor.u32 %v1754_v62, %v1750_v6  ;;  %2870 = vmatprep.mubr.bf16.mxu0 %v6050_v17  ;;  %v1763_v51 = vshrl.u32 %v8545_v48, 16  ;;  %v1766_v23 = vshll.u32 %v8545_v48, 16  ;;  %v1772_v44 = vshll.u32 %v8547_v12, 16 }
 0x21e   : > { %v1746_v59 = vrot.slane %v1745_v19, 4  ;;  %2614 = vmatmul.mubr.bf16.gmra.mrb[64].mxu1 %v6082_v5  ;;  %v2147_v38 = vsel %vm7953_vm10, %v6067_v15, %v2146_v27  ;;  %v2148_v39 = vrot.slane %v2146_v27, 4  ;;  %v1776_v55 = vshrl.u32 %v8547_v12, 16  ;;  %v2905_v15 = vld [vmem:[#allocation2 + $0x14] sm:$0x1] }
 0x21f   : > { %v1756_v10 = vrot.slane %v1755_v36, 4  ;;  %2621 = vmatprep.mubr.bf16.mxu1 %v7357_v30  ;;  %v1765_v56 = vrot.slane %v1763_v51, 4  ;;  %v1768_v31 = vrot.slane %v1766_v23, 5  ;;  %v1774_v53 = vrot.slane %v1772_v44, 5 }
 0x220   : > { %v1751_v1 = vsel %vm7949_vm7, %v1746_v59, %v1750_v6  ;;  %v2150_v25 = vsel %vm7953_vm10, %v2148_v39, %v2149_v0  ;;  %v1778_v22 = vrot.slane %v1776_v55, 4  ;;  %v1782_v35 = vshll.u32 %v1421_v33, 16  ;;  %v2904_v6 = vld [vmem:[#allocation2 + $0x10] sm:$0xf]  ;;  %v3335_v59 = vld [vmem:[#allocation2 + $0xc] sm:$0xe] }
 0x221   : > { %v1761_v63 = vsel %vm7949_vm7, %v1756_v10, %v1760_v34  ;;  %v6083_v28 = vcombine.low %v2147_v38, %v2150_v25  ;;  %v1769_v21 = vor.u32 %v1768_v31, %v1765_v56  ;;  %v6068_v43 = vrot.slane %v2016_v52, 9  ;;  %v8593_v52 = vld [vmem:[#allocation2 + $0x18] sm:$0xf]  ;;  %v8599_v56 = vld [vmem:[#allocation2 + $0x1c] sm:$0xf] }
 0x222   : > { %2871 = vmatmul.mubr.bf16.gmra.mrb[64].mxu0 %v6034_v24  ;;  %v6051_v58 = vcombine.low %v1751_v1, %v1761_v63  ;;  %v1779_v50 = vor.u32 %v1778_v22, %v1774_v53  ;;  %v1784_v47 = vrot.slane %v1782_v35, 5  ;;  %v2153_v7 = vrot.slane %v8547_v12, 5  ;;  %v3993_v22 = vld [vmem:[#allocation2 + $0x20] sm:$0x1]  ;;  %v8605_v35 = vpop.f32.mrb[16].mxu0 }
 0x223   : > { %v2156_v3 = vrot.slane %v1421_v33, 5  ;;  %v1770_v61 = vrot.slane %v1769_v21, 4  ;;  %v6036_v18 = vcombine.low %v8545_v48, %v8547_v12  ;;  %v1787_v24 = vshrl.u32 %v8564_v60, 16  ;;  %v8638_v12 = vld [vmem:[#allocation2 + $0x28] sm:$0xf] }
 0x224   : > { %2878 = vmatprep.mubr.bf16.mxu0 %v6051_v58  ;;  %v1790_v42 = vshll.u32 %v8564_v60, 16  ;;  %v1780_v11 = vrot.slane %v1779_v50, 4  ;;  %v2154_v40 = vsel %vm7953_vm10, %v6068_v43, %v2153_v7  ;;  %v2155_v16 = vrot.slane %v2153_v7, 4  ;;  %v7365_v58 = vld [vmem:[#allocation2 + $0xc0] sm:$0xff]   ;;  %v8611_v7 = vpop.f32.mrb[17].mxu0 }
 0x225   : > { %v1796_v2 = vshll.u32 %v8566_v41, 16  ;;  %v1775_v46 = vsel %vm7949_vm7, %v1770_v61, %v1774_v53  ;;  %v1789_v20 = vrot.slane %v1787_v24, 4  ;;  %v1800_v13 = vshrl.u32 %v8566_v41, 16  ;;  %v8616_v24 = vld [vmem:[#allocation2 + $0x1c] sm:$0xf] }
 0x226   : > { %v1792_v57 = vrot.slane %v1790_v42, 5  ;;  %2622 = vmatmul.mubr.bf16.gmra.mrb[68].mxu1 %v6083_v28  ;;  %v1785_v49 = vsel %vm7949_vm7, %v1780_v11, %v1784_v47  ;;  %v2157_v4 = vsel %vm7953_vm10, %v2155_v16, %v2156_v3  ;;  %v1806_v5 = vshll.u32 %v1422_v54, 16  ;;  %v2903_v47 = vld [vmem:[#allocation2 + $0xc] sm:$0xf]  ;;  %v8618_v42 = vpop.f32.mrb[18].mxu0 }
 0x227   : > { %v1798_v37 = vrot.slane %v1796_v2, 5  ;;  %2629 = vmatprep.mubr.bf16.mxu1 %v7360_v8  ;;  %v6052_v62 = vcombine.low %v1775_v46, %v1785_v49  ;;  %v6084_v17 = vcombine.low %v2154_v40, %v2157_v4  ;;  %v1802_v34 = vrot.slane %v1800_v13, 4  ;;  %v8623_v46 = vld [vmem:[#allocation2 + $0x20] sm:$0x1]  ;;  %v3336_v4 = vld [vmem:[#allocation2 + $0x18] sm:$0xe] }
 0x228   : > { %v1793_v19 = vor.u32 %v1792_v57, %v1789_v20  ;;  %v1808_v30 = vrot.slane %v1806_v5, 5  ;;  %v6069_v36 = vrot.slane %v2017_v45, 9  ;;  %v2160_v27 = vrot.slane %v8566_v41, 5  ;;  %v8625_v20 = vpop.f32.mrb[19].mxu0 }
 0x229   : > { %v2163_v0 = vrot.slane %v1422_v54, 5  ;;  %v1803_v51 = vor.u32 %v1802_v34, %v1798_v37  ;;  %v6037_v23 = vcombine.low %v8564_v60, %v8566_v41  ;;  %v2961_v44 = vshll.u32 %v2904_v6, 16  ;;  %v8666_v41 = vld [vmem:[#allocation2 + $0x28] sm:$0xf] }
 0x22a   : > { %2879 = vmatmul.mubr.bf16.gmra.mrb[68].mxu0 %v6035_v29  ;;  %v1794_v33 = vrot.slane %v1793_v19, 4  ;;  %v8591_v10 = vsel %vm7953_vm10, %v6069_v36, %v2160_v27  ;;  %v2162_v38 = vrot.slane %v2160_v27, 4  ;;  %v2965_v39 = vshrl.u32 %v2904_v6, 16 }
 0x22b   : > { %2886 = vmatprep.mubr.bf16.mxu0 %v6052_v62  ;;  %v2971_v55 = vshll.u32 %v2905_v15, 16  ;;  %v1804_v14 = vrot.slane %v1803_v51, 4  ;;  %v8597_v29 = vrot.slane %v2961_v44, 5  ;;  %v6134_v1 = vrot.slane %v3335_v59, 9 }
 0x22c   : > { %v1799_v9 = vsel %vm7949_vm7, %v1794_v33, %v1798_v37  ;;  %v2164_v31 = vsel %vm7953_vm10, %v2162_v38, %v2163_v0  ;;  %v2967_v53 = vrot.slane %v2965_v39, 4  ;;  %v3401_v25 = vrot.slane %v2904_v6, 5 }
 0x22d   : > { %v8603_v63 = vrot.slane %v2971_v55, 5  ;;  %v1809_v28 = vsel %vm7949_vm7, %v1804_v14, %v1808_v30  ;;  %v6085_v21 = vcombine.low %v8591_v10, %v2164_v31  ;;  %v3404_v43 = vrot.slane %v2905_v15, 5 }
 0x22e   : > { %v4010_v50 = vshrl.u32 %v8593_v52, 16  ;;  %2630 = vmatmul.mubr.bf16.gmra.mrb[72].mxu1 %v6084_v17  ;;  %v6053_v3 = vcombine.low %v1799_v9, %v1809_v28  ;;  %v2968_v8 = vor.u32 %v2967_v53, %v8597_v29  ;;  %v3402_v61 = vsel %vm7953_vm10, %v6134_v1, %v3401_v25  ;;  %v8632_v17 = vld [vmem:[#allocation2 + $0x24] sm:$0xf]  ;;  %v8646_v9 = vld [vmem:[#allocation2 + $0x2c] sm:$0x1] }
 0x22f   : > { %v3403_v54 = vrot.slane %v3401_v25, 4  ;;  %2637 = vmatprep.mubr.bf16.mxu1 %v7365_v58  ;;  %v4013_v40 = vshll.u32 %v8593_v52, 16  ;;  %v4019_v16 = vshll.u32 %v8599_v56, 16  ;;  %v4023_v2 = vshrl.u32 %v8599_v56, 16  ;;  %9885 = vst [vmem:[#allocation17_spill] sm:$0xff] %v8646_v9 }
 0x230   : > { %v4012_v11 = vrot.slane %v4010_v50, 4  ;;  %v2969_v57 = vrot.slane %v2968_v8, 4  ;;  %v4029_v45 = vshll.u32 %v3993_v22, 16  ;;  %v2952_v49 = vshrl.u32 %v2903_v47, 16  ;;  %v2906_v58 = vld [vmem:[#allocation2 + $0x18] sm:$0xf] }
 0x231   : > { %v3405_v13 = vsel %vm7953_vm10, %v3403_v54, %v3404_v43  ;;  %v4015_v5 = vrot.slane %v4013_v40, 5  ;;  %v4021_v6 = vrot.slane %v4019_v16, 5  ;;  %v4025_v62 = vrot.slane %v4023_v2, 4  ;;  %v3337_v2 = vld [vmem:[#allocation2 + $0x24] sm:$0xe] }
 0x232   : > { %2887 = vmatmul.mubr.bf16.gmra.mrb[72].mxu0 %v6036_v18  ;;  %v6166_v37 = vcombine.low %v3402_v61, %v3405_v13  ;;  %v4031_v19 = vrot.slane %v4029_v45, 5  ;;  %v2954_v34 = vrot.slane %v2952_v49, 4  ;;  %v2955_v15 = vshll.u32 %v2903_v47, 16 }
 0x233   : > { %2894 = vmatprep.mubr.bf16.mxu0 %v6053_v3  ;;  %v2974_v30 = vsel %vm7949_vm7, %v2969_v57, %v8603_v63  ;;  %v4016_v36 = vor.u32 %v4015_v5, %v4012_v11  ;;  %v4026_v27 = vor.u32 %v4025_v62, %v4021_v6  ;;  %v6135_v0 = vrot.slane %v3336_v4, 9 }
 0x234   : > { %v3408_v48 = vrot.slane %v8616_v24, 5  ;;  %v2957_v18 = vrot.slane %v2955_v15, 5  ;;  %v3411_v59 = vrot.slane %v8623_v46, 5  ;;  %v6198_v33 = vcombine.low %v8593_v52, %v8599_v56 }
 0x235   : > { %v4034_v51 = vshrl.u32 %v8632_v17, 16  ;;  %v4017_v44 = vrot.slane %v4016_v36, 4  ;;  %v4027_v10 = vrot.slane %v4026_v27, 4  ;;  %v4037_v1 = vshll.u32 %v8632_v17, 16 }
 0x236   : > { %v3409_v38 = vsel %vm7953_vm10, %v6135_v0, %v3408_v48  ;;  %v3410_v39 = vrot.slane %v3408_v48, 4  ;;  %2638 = vmatmul.mubr.bf16.gmra.mrb[76].mxu1 %v6085_v21  ;;  %v2958_v55 = vor.u32 %v2957_v18, %v2954_v34  ;;  %v4043_v31 = vshll.u32 %v8638_v12, 16  ;;  %v8675_v0 = vld [vmem:[#allocation2 + $0x30] sm:$0xf]  ;;  %v8677_v48 = vld [vmem:[#allocation2 + $0x34] sm:$0xf] }
 0x237   : > { %v4036_v14 = vrot.slane %v4034_v51, 4  ;;  %3799 = vmatprep.mubr.bf16.mxu1 %v6166_v37  ;;  %v4022_v53 = vsel %vm7949_vm7, %v4017_v44, %v4021_v6  ;;  %v4032_v63 = vsel %vm7949_vm7, %v4027_v10, %v4031_v19  ;;  %v4047_v22 = vshrl.u32 %v8638_v12, 16  ;;  %v7379_v6 = vld [vmem:[#allocation8 + $0x208] sm:$0xff]   ;;  %v7409_v18 = vld [vmem:[#allocation8 + $0x200] sm:$0xff]  }
 0x238   : > { %v3412_v25 = vsel %vm7953_vm10, %v3410_v39, %v3411_v59  ;;  %v6214_v28 = vcombine.low %v4022_v53, %v4032_v63  ;;  %v2959_v21 = vrot.slane %v2958_v55, 4  ;;  %v4039_v50 = vrot.slane %v4037_v1, 5  ;;  %v3995_v44 = vld [vmem:[#allocation2 + $0x38] sm:$0x1] }
 0x239   : > { %v6167_v43 = vcombine.low %v3409_v38, %v3412_v25  ;;  %v4045_v47 = vrot.slane %v4043_v31, 5  ;;  %v4049_v3 = vrot.slane %v4047_v22, 4  ;;  %v4053_v8 = vshll.u32 %v8646_v9, 16 }
 0x23a   : > { %2895 = vmatmul.mubr.bf16.gmra.mrb[76].mxu0 %v6037_v23  ;;  %v2964_v54 = vsel %vm7949_vm7, %v2959_v21, %v8597_v29  ;;  %v4040_v11 = vor.u32 %v4039_v50, %v4036_v14  ;;  %v2976_v40 = vshrl.u32 %v2906_v58, 16  ;;  %v2979_v16 = vshll.u32 %v2906_v58, 16  ;;  %v8668_v23 = vld [vmem:[#allocation2 + $0x2c] sm:$0x1]  ;;  %v2909_v58 = vld [vmem:[#allocation2 + $0x24] sm:$0xf] }
 0x23b   : > { %4713 = vmatprep.mubr.bf16.mxu0 %v6214_v28  ;;  %v6150_v57 = vcombine.low %v2964_v54, %v2974_v30  ;;  %v4050_v13 = vor.u32 %v4049_v3, %v4045_v47  ;;  %v4055_v45 = vrot.slane %v4053_v8, 5  ;;  %v2985_v60 = vshll.u32 %v8616_v24, 16  ;;  %v7382_v14 = vld [vmem:[#allocation8 + $0x210] sm:$0xff]   ;;  %v3338_v3 = vld [vmem:[#allocation2 + $0x30] sm:$0xe] }
 0x23c   : > { %v4041_v49 = vrot.slane %v4040_v11, 4  ;;  %v2978_v4 = vrot.slane %v2976_v40, 4  ;;  %v2981_v37 = vrot.slane %v2979_v16, 5  ;;  %v2989_v5 = vshrl.u32 %v8616_v24, 16  ;;  %v7385_v16 = vld [vmem:[#allocation8 + $0x218] sm:$0xff]  }
 0x23d   : > { %v4051_v29 = vrot.slane %v4050_v13, 4  ;;  %v2987_v62 = vrot.slane %v2985_v60, 5  ;;  %v2995_v19 = vshll.u32 %v8623_v46, 16  ;;  %v6136_v34 = vrot.slane %v3337_v2, 9  ;;  %v8702_v60 = vld [vmem:[#allocation2 + $0x38] sm:$0x1] }
 0x23e   : > { %3800 = vmatmul.mubr.bf16.vlgmr.msra.gmra.mrb[80].mxu1 %v6150_v57  ;;  %v4046_v15 = vsel %vm7949_vm7, %v4041_v49, %v4045_v47  ;;  %v2982_v30 = vor.u32 %v2981_v37, %v2978_v4  ;;  %v2991_v36 = vrot.slane %v2989_v5, 4  ;;  %v3415_v27 = vrot.slane %v8666_v41, 5 }
 0x23f   : > { %7063 = vmatpush3.bf16.msra.mxu1 %v7409_v18  ;;  %3807 = vmatprep.mubr.bf16.mxu1 %v6167_v43  ;;  %v4056_v24 = vsel %vm7949_vm7, %v4051_v29, %v4055_v45  ;;  %v2997_v46 = vrot.slane %v2995_v19, 5  ;;  %v3418_v59 = vrot.slane %v8668_v23, 5  ;;  %v6199_v51 = vcombine.low %v8632_v17, %v8638_v12  ;;  %v7388_v18 = vld [vmem:[#allocation8 + $0x220] sm:$0xff]  }
 0x240   : > { %v6215_v10 = vcombine.low %v4046_v15, %v4056_v24  ;;  %v2983_v38 = vrot.slane %v2982_v30, 4  ;;  %v2992_v39 = vor.u32 %v2991_v36, %v2987_v62  ;;  %v3416_v55 = vsel %vm7953_vm10, %v6136_v34, %v3415_v27  ;;  %7064 = vmatprep.subr.bf16.mxu1 %v7379_v6  ;;  %v2913_v15 = vld [vmem:[#allocation2 + $0x34] sm:$0xf] }
 0x241   : > { %v3417_v1 = vrot.slane %v3415_v27, 4  ;;  %v4058_v31 = vshrl.u32 %v8675_v0, 16  ;;  %v4061_v53 = vshll.u32 %v8675_v0, 16  ;;  %v4067_v17 = vshll.u32 %v8677_v48, 16  ;;  %v8709_v27 = vld [vmem:[#allocation2 + $0x40] sm:$0xf] }
 0x242   : > { %4714 = vmatmul.mubr.bf16.vlgmr.msra.gmra.mrb[80].mxu0 %v6198_v33  ;;  %v2988_v12 = vsel %vm7949_vm7, %v2983_v38, %v2987_v62  ;;  %v2993_v63 = vrot.slane %v2992_v39, 4  ;;  %v4071_v25 = vshrl.u32 %v8677_v48, 16  ;;  %v4077_v22 = vshll.u32 %v3995_v44, 16  ;;  %v3996_v44 = vld [vmem:[#allocation2 + $0x44] sm:$0x1] }
 0x243   : > { %4721 = vmatprep.mubr.bf16.mxu0 %v6215_v10  ;;  %v3419_v52 = vsel %vm7953_vm10, %v3417_v1, %v3418_v59  ;;  %v4060_v56 = vrot.slane %v4058_v31, 4  ;;  %v4063_v33 = vrot.slane %v4061_v53, 5  ;;  %v4069_v28 = vrot.slane %v4067_v17, 5  ;;  %7065 = vmatpush3.bf16.msra.mxu1 %v7379_v6  ;;  %v8704_v6 = vld [vmem:[#allocation2 + $0x3c] sm:$0xf] }
 0x244   : > { %v2998_v21 = vsel %vm7949_vm7, %v2993_v63, %v2997_v46  ;;  %v6168_v43 = vcombine.low %v3416_v55, %v3419_v52  ;;  %v4073_v50 = vrot.slane %v4071_v25, 4  ;;  %v4079_v47 = vrot.slane %v4077_v22, 5  ;;  %7066 = vmatprep.subr.bf16.mxu1 %v7382_v14  ;;  %v2912_v17 = vld [vmem:[#allocation2 + $0x30] sm:$0xf] }
 0x245   : > { %v6151_v8 = vcombine.low %v2988_v12, %v2998_v21  ;;  %v4064_v54 = vor.u32 %v4063_v33, %v4060_v56  ;;  %v3000_v11 = vshrl.u32 %v2909_v58, 16  ;;  %v3003_v40 = vshll.u32 %v2909_v58, 16  ;;  %v3339_v56 = vld [vmem:[#allocation2 + $0x3c] sm:$0xe]  ;;  %v7391_v33 = vld [vmem:[#allocation8 + $0x228] sm:$0xff]  }
 0x246   : > { %v4074_v2 = vor.u32 %v4073_v50, %v4069_v28  ;;  %v3009_v57 = vshll.u32 %v8666_v41, 16  ;;  %v3013_v13 = vshrl.u32 %v8666_v41, 16  ;;  %v3019_v45 = vshll.u32 %v8668_v23, 16 }
 0x247   : > { %3808 = vmatmul.mubr.bf16.gmra.mrb[84].mxu1 %v6151_v8  ;;  %v4065_v49 = vrot.slane %v4064_v54, 4  ;;  %v3002_v4 = vrot.slane %v3000_v11, 4  ;;  %v3005_v37 = vrot.slane %v3003_v40, 5  ;;  %v6137_v5 = vrot.slane %v3338_v3, 9  ;;  %v8727_v11 = vld [vmem:[#allocation2 + $0x44] sm:$0x1] }
 0x248   : > { %3815 = vmatprep.mubr.bf16.mxu1 %v6168_v43  ;;  %v4075_v29 = vrot.slane %v4074_v2, 4  ;;  %v3011_v62 = vrot.slane %v3009_v57, 5  ;;  %v3015_v19 = vrot.slane %v3013_v13, 4  ;;  %v3021_v34 = vrot.slane %v3019_v45, 5  ;;  %7067 = vmatpush3.bf16.msra.mxu1 %v7382_v14  ;;  %v8730_v57 = vld [vmem:[#allocation2 + $0x40] sm:$0xf] }
 0x249   : > { %v4070_v41 = vsel %vm7949_vm7, %v4065_v49, %v4069_v28  ;;  %v3006_v23 = vor.u32 %v3005_v37, %v3002_v4  ;;  %v3422_v30 = vrot.slane %v2913_v15, 5  ;;  %v3425_v36 = vrot.slane %v8702_v60, 5  ;;  %7068 = vmatprep.subr.bf16.mxu1 %v7385_v16  ;;  %v7394_v45 = vld [vmem:[#allocation8 + $0x230] sm:$0xff]  }
 0x24a   : > { %4722 = vmatmul.mubr.bf16.gmra.mrb[84].mxu0 %v6199_v51  ;;  %v4080_v24 = vsel %vm7949_vm7, %v4075_v29, %v4079_v47  ;;  %v3016_v46 = vor.u32 %v3015_v19, %v3011_v62  ;;  %v6200_v59 = vcombine.low %v8675_v0, %v8677_v48  ;;  %v4082_v51 = vshrl.u32 %v8704_v6, 16  ;;  %v8732_v29 = vld [vmem:[#allocation2 + $0x48] sm:$0xf] }
 0x24b   : > { %v6216_v10 = vcombine.low %v4070_v41, %v4080_v24  ;;  %v3007_v38 = vrot.slane %v3006_v23, 4  ;;  %v3423_v39 = vsel %vm7953_vm10, %v6137_v5, %v3422_v30  ;;  %v3424_v55 = vrot.slane %v3422_v30, 4 }
 0x24c   : > { %v3017_v14 = vrot.slane %v3016_v46, 4  ;;  %v4084_v1 = vrot.slane %v4082_v51, 4  ;;  %v4085_v31 = vshll.u32 %v8704_v6, 16  ;;  %v4091_v53 = vshll.u32 %v8709_v27, 16  ;;  %7069 = vmatpush3.bf16.msra.mxu1 %v7385_v16 }
 0x24d   : > { %4729 = vmatprep.mubr.bf16.mxu0 %v6216_v10  ;;  %v3012_v0 = vsel %vm7949_vm7, %v3007_v38, %v3011_v62  ;;  %v3426_v48 = vsel %vm7953_vm10, %v3424_v55, %v3425_v36  ;;  %v4095_v12 = vshrl.u32 %v8709_v27, 16  ;;  %v4101_v63 = vshll.u32 %v3996_v44, 16  ;;  %7070 = vmatprep.subr.bf16.mxu1 %v7388_v18  ;;  %v8740_v36 = vld [vmem:[#allocation2 + $0x4c] sm:$0xf]  ;;  %v7397_v44 = vld [vmem:[#allocation8 + $0x238] sm:$0xff]  }
 0x24e   : > { %v3022_v25 = vsel %vm7949_vm7, %v3017_v14, %v3021_v34  ;;  %v6169_v22 = vcombine.low %v3423_v39, %v3426_v48  ;;  %v4087_v58 = vrot.slane %v4085_v31, 5  ;;  %v4093_v52 = vrot.slane %v4091_v53, 5  ;;  %v3997_v39 = vld [vmem:[#allocation2 + $0x50] sm:$0x1]  ;;  %v2915_v31 = vld [vmem:[#allocation2 + $0x3c] sm:$0xf] }
 0x24f   : > { %v6152_v28 = vcombine.low %v3012_v0, %v3022_v25  ;;  %v4097_v21 = vrot.slane %v4095_v12, 4  ;;  %v4103_v43 = vrot.slane %v4101_v63, 5  ;;  %v3024_v50 = vshrl.u32 %v2912_v17, 16 }
 0x250   : > { %v4088_v47 = vor.u32 %v4087_v58, %v4084_v1  ;;  %v3027_v3 = vshll.u32 %v2912_v17, 16  ;;  %v3033_v8 = vshll.u32 %v2913_v15, 16  ;;  %v3037_v54 = vshrl.u32 %v2913_v15, 16  ;;  %7071 = vmatpush3.bf16.msra.mxu1 %v7388_v18 }
 0x251   : > { %3816 = vmatmul.mubr.bf16.gmra.mrb[88].mxu1 %v6152_v28  ;;  %v4098_v40 = vor.u32 %v4097_v21, %v4093_v52  ;;  %v3026_v16 = vrot.slane %v3024_v50, 4  ;;  %v3043_v2 = vshll.u32 %v8702_v60, 16  ;;  %v6138_v13 = vrot.slane %v3339_v56, 9  ;;  %7072 = vmatprep.subr.bf16.mxu1 %v7391_v33  ;;  %v3340_v28 = vld [vmem:[#allocation2 + $0x48] sm:$0xe] }
 0x252   : > { %4730 = vmatmul.mubr.bf16.gmra.mrb[88].mxu0 %v6200_v59  ;;  %3823 = vmatprep.mubr.bf16.mxu1 %v6169_v22  ;;  %v4089_v49 = vrot.slane %v4088_v47, 4  ;;  %v3029_v4 = vrot.slane %v3027_v3, 5  ;;  %v3035_v37 = vrot.slane %v3033_v8, 5  ;;  %v3039_v5 = vrot.slane %v3037_v54, 4  ;;  %v8759_v3 = vld [vmem:[#allocation2 + $0x50] sm:$0x1] }
 0x253   : > { %v4099_v62 = vrot.slane %v4098_v40, 4  ;;  %v3045_v19 = vrot.slane %v3043_v2, 5  ;;  %v3429_v34 = vrot.slane %v8730_v57, 5  ;;  %v3432_v15 = vrot.slane %v8727_v11, 5  ;;  %v8761_v2 = vld [vmem:[#allocation2 + $0x54] sm:$0xf] }
 0x254   : > { %v4094_v60 = vsel %vm7949_vm7, %v4089_v49, %v4093_v52  ;;  %v3030_v41 = vor.u32 %v3029_v4, %v3026_v16  ;;  %v3040_v23 = vor.u32 %v3039_v5, %v3035_v37  ;;  %v6201_v30 = vcombine.low %v8704_v6, %v8709_v27  ;;  %7073 = vmatpush3.bf16.msra.mxu1 %v7391_v33  ;;  %v2919_v4 = vld [vmem:[#allocation2 + $0x4c] sm:$0xf] }
 0x255   : > { %v4104_v18 = vsel %vm7949_vm7, %v4099_v62, %v4103_v43  ;;  %v3430_v24 = vsel %vm7953_vm10, %v6138_v13, %v3429_v34  ;;  %v3431_v46 = vrot.slane %v3429_v34, 4  ;;  %v4106_v59 = vshrl.u32 %v8732_v29, 16  ;;  %7074 = vmatprep.subr.bf16.mxu1 %v7394_v45 }
 0x256   : > { %v6217_v51 = vcombine.low %v4094_v60, %v4104_v18  ;;  %v3031_v10 = vrot.slane %v3030_v41, 4  ;;  %v3041_v38 = vrot.slane %v3040_v23, 4  ;;  %v4109_v6 = vshll.u32 %v8732_v29, 16  ;;  %v3998_v41 = vld [vmem:[#allocation2 + $0x5c] sm:$0x1] }
 0x257   : > { %v3433_v27 = vsel %vm7953_vm10, %v3431_v46, %v3432_v15  ;;  %v4108_v55 = vrot.slane %v4106_v59, 4  ;;  %v4115_v14 = vshll.u32 %v8740_v36, 16  ;;  %v4119_v1 = vshrl.u32 %v8740_v36, 16 }
 0x258   : > { %4737 = vmatprep.mubr.bf16.mxu0 %v6217_v51  ;;  %v3036_v53 = vsel %vm7949_vm7, %v3031_v10, %v3035_v37  ;;  %v3046_v17 = vsel %vm7949_vm7, %v3041_v38, %v3045_v19  ;;  %v6170_v0 = vcombine.low %v3430_v24, %v3433_v27  ;;  %v4111_v48 = vrot.slane %v4109_v6, 5  ;;  %7075 = vmatpush3.bf16.msra.mxu1 %v7394_v45  ;;  %v8766_v19 = vld [vmem:[#allocation2 + $0x58] sm:$0xf]  ;;  %v2918_v38 = vld [vmem:[#allocation2 + $0x48] sm:$0xf] }
 0x259   : > { %v6153_v12 = vcombine.low %v3036_v53, %v3046_v17  ;;  %v4117_v63 = vrot.slane %v4115_v14, 5  ;;  %v4121_v25 = vrot.slane %v4119_v1, 4  ;;  %v4125_v22 = vshll.u32 %v3997_v39, 16  ;;  %7076 = vmatprep.subr.bf16.mxu1 %v7397_v44 }
 0x25a   : > { %4738 = vmatmul.mubr.bf16.gmra.mrb[92].mxu0 %v6201_v30  ;;  %v4112_v58 = vor.u32 %v4111_v48, %v4108_v55  ;;  %v3048_v52 = vshrl.u32 %v2915_v31, 16  ;;  %v3051_v56 = vshll.u32 %v2915_v31, 16  ;;  %v3057_v33 = vshll.u32 %v8730_v57, 16  ;;  %v3341_v31 = vld [vmem:[#allocation2 + $0x54] sm:$0xe] }
 0x25b   : > { %3824 = vmatmul.mubr.bf16.gmra.mrb[92].mxu1 %v6153_v12  ;;  %v4122_v21 = vor.u32 %v4121_v25, %v4117_v63  ;;  %v4127_v43 = vrot.slane %v4125_v22, 5  ;;  %v3061_v50 = vshrl.u32 %v8730_v57, 16  ;;  %v3067_v47 = vshll.u32 %v8727_v11, 16 }
 0x25c   : > { %3831 = vmatprep.mubr.bf16.mxu1 %v6170_v0  ;;  %v4113_v8 = vrot.slane %v4112_v58, 4  ;;  %v3050_v54 = vrot.slane %v3048_v52, 4  ;;  %v3053_v40 = vrot.slane %v3051_v56, 5  ;;  %v3059_v16 = vrot.slane %v3057_v33, 5  ;;  %7077 = vmatpush3.bf16.msra.mxu1 %v7397_v44  ;;  %v8784_v58 = vld [vmem:[#allocation2 + $0x5c] sm:$0x1] }
 0x25d   : > { %v4123_v13 = vrot.slane %v4122_v21, 4  ;;  %v3063_v45 = vrot.slane %v3061_v50, 4  ;;  %v3069_v49 = vrot.slane %v3067_v47, 5  ;;  %v6139_v37 = vrot.slane %v3340_v28, 9  ;;  %v8787_v28 = vld [vmem:[#allocation2 + $0x58] sm:$0xf] }
 0x25e   : > { %v4118_v57 = vsel %vm7949_vm7, %v4113_v8, %v4117_v63  ;;  %v3054_v5 = vor.u32 %v3053_v40, %v3050_v54  ;;  %v3436_v11 = vrot.slane %v2919_v4, 5  ;;  %v3439_v62 = vrot.slane %v8759_v3, 5  ;;  %v8789_v54 = vld [vmem:[#allocation2 + $0x60] sm:$0xf] }
 0x25f   : > { %v4128_v34 = vsel %vm7949_vm7, %v4123_v13, %v4127_v43  ;;  %v3064_v15 = vor.u32 %v3063_v45, %v3059_v16  ;;  %v6202_v60 = vcombine.low %v8732_v29, %v8740_v36  ;;  %v4130_v23 = vshrl.u32 %v8761_v2, 16 }
 0x260   : > { %v6218_v30 = vcombine.low %v4118_v57, %v4128_v34  ;;  %v3055_v18 = vrot.slane %v3054_v5, 4  ;;  %v3437_v24 = vsel %vm7953_vm10, %v6139_v37, %v3436_v11  ;;  %v3438_v46 = vrot.slane %v3436_v11, 4  ;;  %v8797_v57 = vld [vmem:[#allocation2 + $0x64] sm:$0xf] }
 0x261   : > { %v3065_v59 = vrot.slane %v3064_v15, 4  ;;  %v4132_v44 = vrot.slane %v4130_v23, 4  ;;  %v4133_v51 = vshll.u32 %v8761_v2, 16  ;;  %v4139_v10 = vshll.u32 %v8766_v19, 16  ;;  %v3999_v23 = vld [vmem:[#allocation2 + $0x68] sm:$0x1] }
 0x262   : > { %4745 = vmatprep.mubr.bf16.mxu0 %v6218_v30  ;;  %v3060_v29 = vsel %vm7949_vm7, %v3055_v18, %v3059_v16  ;;  %v3440_v36 = vsel %vm7953_vm10, %v3438_v46, %v3439_v62  ;;  %v4143_v39 = vshrl.u32 %v8766_v19, 16  ;;  %v4149_v6 = vshll.u32 %v3998_v41, 16  ;;  %v2921_v46 = vld [vmem:[#allocation2 + $0x54] sm:$0xf] }
 0x263   : > { %v3070_v27 = vsel %vm7949_vm7, %v3065_v59, %v3069_v49  ;;  %v6171_v55 = vcombine.low %v3437_v24, %v3440_v36  ;;  %4746 = vmatmul.mubr.bf16.gmra.mrb[96].mxu0 %v6202_v60  ;;  %v4135_v14 = vrot.slane %v4133_v51, 5  ;;  %v4141_v1 = vrot.slane %v4139_v10, 5 }
 0x264   : > { %v6154_v53 = vcombine.low %v3060_v29, %v3070_v27  ;;  %v4145_v17 = vrot.slane %v4143_v39, 4  ;;  %v4151_v0 = vrot.slane %v4149_v6, 5  ;;  %v3072_v48 = vshrl.u32 %v2918_v38, 16  ;;  %v8813_v6 = vld [vmem:[#allocation2 + $0x68] sm:$0x1] }
 0x265   : > { %v4136_v12 = vor.u32 %v4135_v14, %v4132_v44  ;;  %v3075_v63 = vshll.u32 %v2918_v38, 16  ;;  %v3081_v25 = vshll.u32 %v2919_v4, 16  ;;  %v3085_v22 = vshrl.u32 %v2919_v4, 16 }
 0x266   : > { %3832 = vmatmul.mubr.bf16.gmra.mrb[96].mxu1 %v6154_v53  ;;  %v4146_v52 = vor.u32 %v4145_v17, %v4141_v1  ;;  %v3074_v56 = vrot.slane %v3072_v48, 4  ;;  %v3091_v33 = vshll.u32 %v8759_v3, 16  ;;  %v6140_v21 = vrot.slane %v3341_v31, 9  ;;  %v3342_v53 = vld [vmem:[#allocation2 + $0x60] sm:$0xe] }
 0x267   : > { %3839 = vmatprep.mubr.bf16.mxu1 %v6171_v55  ;;  %v4137_v43 = vrot.slane %v4136_v12, 4  ;;  %v3077_v50 = vrot.slane %v3075_v63, 5  ;;  %v3083_v47 = vrot.slane %v3081_v25, 5  ;;  %v3087_v8 = vrot.slane %v3085_v22, 4  ;;  %v8822_v25 = vld [vmem:[#allocation2 + $0x6c] sm:$0xf] }
 0x268   : > { %v4147_v40 = vrot.slane %v4146_v52, 4  ;;  %v3093_v16 = vrot.slane %v3091_v33, 5  ;;  %v3443_v13 = vrot.slane %v8787_v28, 5  ;;  %v3446_v45 = vrot.slane %v8784_v58, 5 }
 0x269   : > { %v4142_v49 = vsel %vm7949_vm7, %v4137_v43, %v4141_v1  ;;  %v3078_v3 = vor.u32 %v3077_v50, %v3074_v56  ;;  %v3088_v4 = vor.u32 %v3087_v8, %v3083_v47  ;;  %v6203_v37 = vcombine.low %v8761_v2, %v8766_v19  ;;  %v8815_v27 = vpop.f32.mrb[16].mxu1 }
 0x26a   : > { %v4152_v5 = vsel %vm7949_vm7, %v4147_v40, %v4151_v0  ;;  %v3444_v11 = vsel %vm7953_vm10, %v6140_v21, %v3443_v13  ;;  %v3445_v62 = vrot.slane %v3443_v13, 4  ;;  %v4154_v34 = vshrl.u32 %v8789_v54, 16  ;;  %v8818_v17 = vpop.f32.mrb[17].mxu1  ;;  %v2925_v40 = vld [vmem:[#allocation2 + $0x64] sm:$0xf] }
 0x26b   : > { %v6219_v15 = vcombine.low %v4142_v49, %v4152_v5  ;;  %v3079_v60 = vrot.slane %v3078_v3, 4  ;;  %v3089_v41 = vrot.slane %v3088_v4, 4  ;;  %v4157_v30 = vshll.u32 %v8789_v54, 16  ;;  %v8824_v22 = vpop.f32.mrb[18].mxu1  ;;  %v8831_v49 = vld [vmem:[#allocation2 + $0x70] sm:$0xf] }
 0x26c   : > { %v3447_v2 = vsel %vm7953_vm10, %v3445_v62, %v3446_v45  ;;  %v4156_v19 = vrot.slane %v4154_v34, 4  ;;  %v4163_v18 = vshll.u32 %v8797_v57, 16  ;;  %v4167_v24 = vshrl.u32 %v8797_v57, 16  ;;  %v8826_v43 = vpop.f32.mrb[19].mxu1  ;;  %v4000_v5 = vld [vmem:[#allocation2 + $0x74] sm:$0x1] }
 0x26d   : > { %4753 = vmatprep.mubr.bf16.mxu0 %v6219_v15  ;;  %v3084_v59 = vsel %vm7949_vm7, %v3079_v60, %v3083_v47  ;;  %v3094_v44 = vsel %vm7949_vm7, %v3089_v41, %v3093_v16  ;;  %v6172_v51 = vcombine.low %v3444_v11, %v3447_v2  ;;  %v4159_v10 = vrot.slane %v4157_v30, 5 }
 0x26e   : > { %v6155_v38 = vcombine.low %v3084_v59, %v3094_v44  ;;  %4754 = vmatmul.mubr.bf16.gmra.mrb[100].mxu0 %v6203_v37  ;;  %v4165_v29 = vrot.slane %v4163_v18, 5  ;;  %v4169_v36 = vrot.slane %v4167_v24, 4  ;;  %v4173_v39 = vshll.u32 %v3999_v23, 16 }
 0x26f   : > { %v4160_v55 = vor.u32 %v4159_v10, %v4156_v19  ;;  %v3096_v14 = vshrl.u32 %v2921_v46, 16  ;;  %v3099_v1 = vshll.u32 %v2921_v46, 16  ;;  %v3105_v31 = vshll.u32 %v8787_v28, 16  ;;  %v2924_v19 = vld [vmem:[#allocation2 + $0x60] sm:$0xf] }
 0x270   : > { %3840 = vmatmul.mubr.bf16.gmra.mrb[100].mxu1 %v6155_v38  ;;  %v4170_v0 = vor.u32 %v4169_v36, %v4165_v29  ;;  %v4175_v48 = vrot.slane %v4173_v39, 5  ;;  %v3109_v12 = vshrl.u32 %v8787_v28, 16  ;;  %v3115_v63 = vshll.u32 %v8784_v58, 16  ;;  %v3343_v10 = vld [vmem:[#allocation2 + $0x6c] sm:$0xe] }
 0x271   : > { %3847 = vmatprep.mubr.bf16.mxu1 %v6172_v51  ;;  %v4161_v52 = vrot.slane %v4160_v55, 4  ;;  %v3098_v56 = vrot.slane %v3096_v14, 4  ;;  %v3101_v33 = vrot.slane %v3099_v1, 5  ;;  %v3107_v21 = vrot.slane %v3105_v31, 5 }
 0x272   : > { %v4171_v50 = vrot.slane %v4170_v0, 4  ;;  %v3111_v47 = vrot.slane %v3109_v12, 4  ;;  %v3117_v8 = vrot.slane %v3115_v63, 5  ;;  %v6141_v16 = vrot.slane %v3342_v53, 9  ;;  %v8851_v0 = vld [vmem:[#allocation2 + $0x70] sm:$0xf] }
 0x273   : > { %v4166_v28 = vsel %vm7949_vm7, %v4161_v52, %v4165_v29  ;;  %v3102_v58 = vor.u32 %v3101_v33, %v3098_v56  ;;  %v3450_v13 = vrot.slane %v2925_v40, 5  ;;  %v3453_v45 = vrot.slane %v8813_v6, 5 }
 0x274   : > { %v4176_v3 = vsel %vm7949_vm7, %v4171_v50, %v4175_v48  ;;  %v3112_v4 = vor.u32 %v3111_v47, %v3107_v21  ;;  %v6204_v37 = vcombine.low %v8789_v54, %v8797_v57  ;;  %v4178_v11 = vshrl.u32 %v8822_v25, 16  ;;  %v8853_v48 = vld [vmem:[#allocation2 + $0x74] sm:$0x1] }
 0x275   : > { %v6220_v62 = vcombine.low %v4166_v28, %v4176_v3  ;;  %v3103_v34 = vrot.slane %v3102_v58, 4  ;;  %v3451_v15 = vsel %vm7953_vm10, %v6141_v16, %v3450_v13  ;;  %v3452_v60 = vrot.slane %v3450_v13, 4 }
 0x276   : > { %v3113_v41 = vrot.slane %v3112_v4, 4  ;;  %v4180_v23 = vrot.slane %v4178_v11, 4  ;;  %v4181_v30 = vshll.u32 %v8822_v25, 16  ;;  %v4187_v2 = vshll.u32 %v8831_v49, 16  ;;  %v8849_v55 = vpop.f32.mrb[20].mxu1 }
 0x277   : > { %4761 = vmatprep.mubr.bf16.mxu0 %v6220_v62  ;;  %v3108_v54 = vsel %vm7949_vm7, %v3103_v34, %v3107_v21  ;;  %v3454_v57 = vsel %vm7953_vm10, %v3452_v60, %v3453_v45  ;;  %v4191_v18 = vshrl.u32 %v8831_v49, 16  ;;  %v4197_v24 = vshll.u32 %v4000_v5, 16  ;;  %v8855_v12 = vpop.f32.mrb[21].mxu1  ;;  %v8858_v21 = vld [vmem:[#allocation2 + $0x78] sm:$0xf] }
 0x278   : > { %v3118_v46 = vsel %vm7949_vm7, %v3113_v41, %v3117_v8  ;;  %v6173_v59 = vcombine.low %v3451_v15, %v3454_v57  ;;  %4762 = vmatmul.mubr.bf16.gmra.mrb[104].mxu0 %v6204_v37  ;;  %v4183_v44 = vrot.slane %v4181_v30, 5  ;;  %v4189_v51 = vrot.slane %v4187_v2, 5  ;;  %v8860_v50 = vpop.f32.mrb[22].mxu1  ;;  %v8870_v11 = vld [vmem:[#allocation2 + $0x7c] sm:$0xf] }
 0x279   : > { %v6156_v38 = vcombine.low %v3108_v54, %v3118_v46  ;;  %v4193_v29 = vrot.slane %v4191_v18, 4  ;;  %v4199_v36 = vrot.slane %v4197_v24, 5  ;;  %v3120_v39 = vshrl.u32 %v2924_v19, 16  ;;  %v8862_v28 = vpop.f32.mrb[23].mxu1  ;;  %v4001_v2 = vld [vmem:[#allocation2 + $0x80] sm:$0x1] }
 0x27a   : > { %v4184_v14 = vor.u32 %v4183_v44, %v4180_v23  ;;  %v3123_v1 = vshll.u32 %v2924_v19, 16  ;;  %v3129_v31 = vshll.u32 %v2925_v40, 16  ;;  %v3133_v53 = vshrl.u32 %v2925_v40, 16  ;;  %v2927_v18 = vld [vmem:[#allocation2 + $0x6c] sm:$0xf] }
 0x27b   : > { %3848 = vmatmul.mubr.bf16.gmra.mrb[104].mxu1 %v6156_v38  ;;  %v4194_v63 = vor.u32 %v4193_v29, %v4189_v51  ;;  %v3122_v52 = vrot.slane %v3120_v39, 4  ;;  %v3139_v56 = vshll.u32 %v8813_v6, 16  ;;  %v6142_v33 = vrot.slane %v3343_v10, 9 }
 0x27c   : > { %3855 = vmatprep.mubr.bf16.mxu1 %v6173_v59  ;;  %v4185_v47 = vrot.slane %v4184_v14, 4  ;;  %v3125_v8 = vrot.slane %v3123_v1, 5  ;;  %v3131_v40 = vrot.slane %v3129_v31, 5  ;;  %v3135_v16 = vrot.slane %v3133_v53, 4 }
 0x27d   : > { %v4195_v58 = vrot.slane %v4194_v63, 4  ;;  %v3141_v13 = vrot.slane %v3139_v56, 5  ;;  %v3457_v45 = vrot.slane %v8851_v0, 5  ;;  %v3460_v3 = vrot.slane %v8853_v48, 5 }
 0x27e   : > { %v4190_v6 = vsel %vm7949_vm7, %v4185_v47, %v4189_v51  ;;  %v3126_v4 = vor.u32 %v3125_v8, %v3122_v52  ;;  %v3136_v37 = vor.u32 %v3135_v16, %v3131_v40  ;;  %v6205_v5 = vcombine.low %v8822_v25, %v8831_v49  ;;  %v3344_v52 = vld [vmem:[#allocation2 + $0x78] sm:$0xe]  ;;  %v8897_v16 = vld [vmem:[#allocation2 + $0x80] sm:$0x1] }
 0x27f   : > { %v4200_v62 = vsel %vm7949_vm7, %v4195_v58, %v4199_v36  ;;  %v3458_v34 = vsel %vm7953_vm10, %v6142_v33, %v3457_v45  ;;  %v3459_v15 = vrot.slane %v3457_v45, 4  ;;  %v4202_v60 = vshrl.u32 %v8858_v21, 16  ;;  %v8882_v24 = vpop.f32.mrb[20].mxu0 }
 0x280   : > { %v6221_v41 = vcombine.low %v4190_v6, %v4200_v62  ;;  %v3127_v23 = vrot.slane %v3126_v4, 4  ;;  %v3137_v30 = vrot.slane %v3136_v37, 4  ;;  %v4205_v19 = vshll.u32 %v8858_v21, 16  ;;  %v8888_v10 = vpop.f32.mrb[21].mxu0  ;;  %v8899_v6 = vld [vmem:[#allocation2 + $0x84] sm:$0xf] }
 0x281   : > { %v3461_v25 = vsel %vm7953_vm10, %v3459_v15, %v3460_v3  ;;  %v4204_v49 = vrot.slane %v4202_v60, 4  ;;  %v4211_v54 = vshll.u32 %v8870_v11, 16  ;;  %v4215_v57 = vshrl.u32 %v8870_v11, 16  ;;  %v8890_v14 = vpop.f32.mrb[22].mxu0  ;;  %v2931_v62 = vld [vmem:[#allocation2 + $0x7c] sm:$0xf] }
 0x282   : > { %4769 = vmatprep.mubr.bf16.mxu0 %v6221_v41  ;;  %v3132_v46 = vsel %vm7949_vm7, %v3127_v23, %v3131_v40  ;;  %v3142_v59 = vsel %vm7949_vm7, %v3137_v30, %v3141_v13  ;;  %v6174_v44 = vcombine.low %v3458_v34, %v3461_v25  ;;  %v4207_v51 = vrot.slane %v4205_v19, 5  ;;  %v8893_v56 = vpop.f32.mrb[23].mxu0  ;;  %v8904_v41 = vld [vmem:[#allocation2 + $0x88] sm:$0xf]  ;;  %v4002_v19 = vld [vmem:[#allocation2 + $0x8c] sm:$0x1] }
 0x283   : > { %v6157_v38 = vcombine.low %v3132_v46, %v3142_v59  ;;  %4770 = vmatmul.mubr.bf16.gmra.mrb[108].mxu0 %v6205_v5  ;;  %v4213_v29 = vrot.slane %v4211_v54, 5  ;;  %v4217_v36 = vrot.slane %v4215_v57, 4  ;;  %v4221_v39 = vshll.u32 %v4001_v2, 16  ;;  %v2930_v59 = vld [vmem:[#allocation2 + $0x78] sm:$0xf] }
 0x284   : > { %v4208_v1 = vor.u32 %v4207_v51, %v4204_v49  ;;  %v3144_v31 = vshrl.u32 %v2927_v18, 16  ;;  %v3147_v53 = vshll.u32 %v2927_v18, 16  ;;  %v3153_v63 = vshll.u32 %v8851_v0, 16 }
 0x285   : > { %3856 = vmatmul.mubr.bf16.gmra.mrb[108].mxu1 %v6157_v38  ;;  %v4218_v33 = vor.u32 %v4217_v36, %v4213_v29  ;;  %v4223_v47 = vrot.slane %v4221_v39, 5  ;;  %v3157_v8 = vshrl.u32 %v8851_v0, 16  ;;  %v3163_v40 = vshll.u32 %v8853_v48, 16 }
 0x286   : > { %3863 = vmatprep.mubr.bf16.mxu1 %v6174_v44  ;;  %v4209_v58 = vrot.slane %v4208_v1, 4  ;;  %v3146_v13 = vrot.slane %v3144_v31, 4  ;;  %v3149_v45 = vrot.slane %v3147_v53, 5  ;;  %v3155_v3 = vrot.slane %v3153_v63, 5 }
 0x287   : > { %v4219_v4 = vrot.slane %v4218_v33, 4  ;;  %v3159_v37 = vrot.slane %v3157_v8, 4  ;;  %v3165_v5 = vrot.slane %v3163_v40, 5  ;;  %v6143_v34 = vrot.slane %v3344_v52, 9  ;;  %v8911_v49 = vpop.f32.mrb[24].mxu0 }
 0x288   : > { %v4214_v15 = vsel %vm7949_vm7, %v4209_v58, %v4213_v29  ;;  %v3150_v0 = vor.u32 %v3149_v45, %v3146_v13  ;;  %v3464_v60 = vrot.slane %v2931_v62, 5  ;;  %v3467_v48 = vrot.slane %v8897_v16, 5  ;;  %v8915_v44 = vpop.f32.mrb[25].mxu0  ;;  %v3345_v8 = vld [vmem:[#allocation2 + $0x84] sm:$0xe] }
 0x289   : > { %v4224_v23 = vsel %vm7949_vm7, %v4219_v4, %v4223_v47  ;;  %v3160_v30 = vor.u32 %v3159_v37, %v3155_v3  ;;  %v6206_v2 = vcombine.low %v8858_v21, %v8870_v11  ;;  %v4226_v25 = vshrl.u32 %v8899_v6, 16  ;;  %v8919_v11 = vpop.f32.mrb[26].mxu0 }
 0x28a   : > { %v6222_v54 = vcombine.low %v4214_v15, %v4224_v23  ;;  %v3151_v57 = vrot.slane %v3150_v0, 4  ;;  %v3465_v18 = vsel %vm7953_vm10, %v6143_v34, %v3464_v60  ;;  %v3466_v46 = vrot.slane %v3464_v60, 4  ;;  %v8926_v53 = vpop.f32.mrb[27].mxu0  ;;  %v8934_v60 = vld [vmem:[#allocation2 + $0x8c] sm:$0x1] }
 0x28b   : > { %v3161_v51 = vrot.slane %v3160_v30, 4  ;;  %v4228_v38 = vrot.slane %v4226_v25, 4  ;;  %v4229_v29 = vshll.u32 %v8899_v6, 16  ;;  %v4235_v21 = vshll.u32 %v8904_v41, 16  ;;  %v8930_v40 = vpop.f32.mrb[24].mxu1 }
 0x28c   : > { %4777 = vmatprep.mubr.bf16.mxu0 %v6222_v54  ;;  %v3156_v36 = vsel %vm7949_vm7, %v3151_v57, %v3155_v3  ;;  %v3468_v39 = vsel %vm7953_vm10, %v3466_v46, %v3467_v48  ;;  %v4239_v1 = vshrl.u32 %v8904_v41, 16  ;;  %v4245_v31 = vshll.u32 %v4002_v19, 16  ;;  %v8932_v4 = vpop.f32.mrb[25].mxu1 }
 0x28d   : > { %v3166_v63 = vsel %vm7949_vm7, %v3161_v51, %v3165_v5  ;;  %v6175_v52 = vcombine.low %v3465_v18, %v3468_v39  ;;  %4778 = vmatmul.mubr.bf16.gmra.mrb[112].mxu0 %v6206_v2  ;;  %v4231_v33 = vrot.slane %v4229_v29, 5  ;;  %v4237_v47 = vrot.slane %v4235_v21, 5  ;;  %v8936_v5 = vpop.f32.mrb[26].mxu1  ;;  %v8939_v2 = vld [vmem:[#allocation2 + $0x88] sm:$0xf] }
 0x28e   : > { %v6158_v58 = vcombine.low %v3156_v36, %v3166_v63  ;;  %v4241_v13 = vrot.slane %v4239_v1, 4  ;;  %v4247_v45 = vrot.slane %v4245_v31, 5  ;;  %v3168_v3 = vshrl.u32 %v2930_v59, 16  ;;  %v8941_v25 = vpop.f32.mrb[27].mxu1  ;;  %v8951_v1 = vld [vmem:[#allocation2 + $0x94] sm:$0xf] }
 0x28f   : > { %v4232_v37 = vor.u32 %v4231_v33, %v4228_v38  ;;  %v3171_v34 = vshll.u32 %v2930_v59, 16  ;;  %v3177_v15 = vshll.u32 %v2931_v62, 16  ;;  %v3181_v0 = vshrl.u32 %v2931_v62, 16  ;;  %v8943_v62 = vld [vmem:[#allocation2 + $0x90] sm:$0xf] }
 0x290   : > { %3864 = vmatmul.mubr.bf16.gmra.mrb[112].mxu1 %v6158_v58  ;;  %v4242_v48 = vor.u32 %v4241_v13, %v4237_v47  ;;  %v3170_v23 = vrot.slane %v3168_v3, 4  ;;  %v3187_v30 = vshll.u32 %v8897_v16, 16  ;;  %v6144_v19 = vrot.slane %v3345_v8, 9 }
 0x291   : > { %3871 = vmatprep.mubr.bf16.mxu1 %v6175_v52  ;;  %v4233_v54 = vrot.slane %v4232_v37, 4  ;;  %v3173_v57 = vrot.slane %v3171_v34, 5  ;;  %v3179_v18 = vrot.slane %v3177_v15, 5  ;;  %v3183_v46 = vrot.slane %v3181_v0, 4  ;;  %v2933_v15 = vld [vmem:[#allocation2 + $0x84] sm:$0xf] }
 0x292   : > { %v4243_v59 = vrot.slane %v4242_v48, 4  ;;  %v3189_v51 = vrot.slane %v3187_v30, 5  ;;  %v3471_v38 = vrot.slane %v8939_v2, 5  ;;  %v3474_v29 = vrot.slane %v8934_v60, 5 }
 0x293   : > { %v4238_v16 = vsel %vm7949_vm7, %v4233_v54, %v4237_v47  ;;  %v3174_v21 = vor.u32 %v3173_v57, %v3170_v23  ;;  %v3184_v36 = vor.u32 %v3183_v46, %v3179_v18  ;;  %v6207_v39 = vcombine.low %v8899_v6, %v8904_v41  ;;  %v4003_v47 = vld [vmem:[#allocation2 + $0x98] sm:$0x1]  ;;  %v8959_v37 = vpop.f32.mrb[28].mxu1 }
 0x294   : > { %v4248_v31 = vsel %vm7949_vm7, %v4243_v59, %v4247_v45  ;;  %v3472_v63 = vsel %vm7953_vm10, %v6144_v19, %v3471_v38  ;;  %v3473_v52 = vrot.slane %v3471_v38, 4  ;;  %v4250_v33 = vshrl.u32 %v8943_v62, 16  ;;  %v8965_v0 = vpop.f32.mrb[29].mxu1 }
 0x295   : > { %v6223_v8 = vcombine.low %v4238_v16, %v4248_v31  ;;  %v3175_v58 = vrot.slane %v3174_v21, 4  ;;  %v3185_v13 = vrot.slane %v3184_v36, 4  ;;  %v4253_v3 = vshll.u32 %v8943_v62, 16  ;;  %v8973_v57 = vpop.f32.mrb[30].mxu1 }
 0x296   : > { %v3475_v6 = vsel %vm7953_vm10, %v3473_v52, %v3474_v29  ;;  %v4252_v41 = vrot.slane %v4250_v33, 4  ;;  %v4259_v45 = vshll.u32 %v8951_v1, 16  ;;  %v4263_v34 = vshrl.u32 %v8951_v1, 16  ;;  %v8977_v21 = vpop.f32.mrb[31].mxu1 }
 0x297   : > { %4785 = vmatprep.mubr.bf16.mxu0 %v6223_v8  ;;  %v3180_v48 = vsel %vm7949_vm7, %v3175_v58, %v3179_v18  ;;  %v3190_v23 = vsel %vm7949_vm7, %v3185_v13, %v3189_v51  ;;  %v6176_v30 = vcombine.low %v3472_v63, %v3475_v6  ;;  %v4255_v19 = vrot.slane %v4253_v3, 5  ;;  %v8971_v54 = vpop.f32.mrb[28].mxu0  ;;  %v3346_v63 = vld [vmem:[#allocation2 + $0x90] sm:$0xe]  ;;  %v8984_v13 = vld [vmem:[#allocation2 + $0x98] sm:$0x1] }
 0x298   : > { %v6159_v46 = vcombine.low %v3180_v48, %v3190_v23  ;;  %4786 = vmatmul.mubr.bf16.gmra.mrb[116].mxu0 %v6207_v39  ;;  %v4261_v59 = vrot.slane %v4259_v45, 5  ;;  %v4265_v38 = vrot.slane %v4263_v34, 4  ;;  %v4269_v29 = vshll.u32 %v4003_v47, 16  ;;  %v8975_v16 = vpop.f32.mrb[29].mxu0  ;;  %v8988_v34 = vld [vmem:[#allocation2 + $0x9c] sm:$0xf] }
 0x299   : > { %v4256_v36 = vor.u32 %v4255_v19, %v4252_v41  ;;  %v3192_v18 = vshrl.u32 %v2933_v15, 16  ;;  %v3195_v31 = vshll.u32 %v2933_v15, 16  ;;  %v3201_v51 = vshll.u32 %v8939_v2, 16  ;;  %v8980_v52 = vpop.f32.mrb[30].mxu0  ;;  %v8990_v19 = vld [vmem:[#allocation2 + $0x94] sm:$0xf] }
 0x29a   : > { %3872 = vmatmul.mubr.bf16.gmra.mrb[116].mxu1 %v6159_v46  ;;  %v4266_v33 = vor.u32 %v4265_v38, %v4261_v59  ;;  %v4271_v8 = vrot.slane %v4269_v29, 5  ;;  %v3205_v39 = vshrl.u32 %v8939_v2, 16  ;;  %v3211_v58 = vshll.u32 %v8934_v60, 16  ;;  %v8986_v47 = vpop.f32.mrb[31].mxu0  ;;  %v8996_v29 = vld [vmem:[#allocation2 + $0xa0] sm:$0xf] }
 0x29b   : > { %3879 = vmatprep.mubr.bf16.mxu1 %v6176_v30  ;;  %v4257_v3 = vrot.slane %v4256_v36, 4  ;;  %v3194_v6 = vrot.slane %v3192_v18, 4  ;;  %v3197_v41 = vrot.slane %v3195_v31, 5  ;;  %v3203_v45 = vrot.slane %v3201_v51, 5  ;;  %v4004_v51 = vld [vmem:[#allocation2 + $0xa4] sm:$0x1] }
 0x29c   : > { %v4267_v15 = vrot.slane %v4266_v33, 4  ;;  %v3207_v48 = vrot.slane %v3205_v39, 4  ;;  %v3213_v23 = vrot.slane %v3211_v58, 5  ;;  %v6145_v46 = vrot.slane %v3346_v63, 9 }
 0x29d   : > { %v4262_v60 = vsel %vm7949_vm7, %v4257_v3, %v4261_v59  ;;  %v3198_v2 = vor.u32 %v3197_v41, %v3194_v6  ;;  %v3478_v38 = vrot.slane %v8990_v19, 5  ;;  %v3481_v30 = vrot.slane %v8984_v13, 5 }
 0x29e   : > { %v4272_v36 = vsel %vm7949_vm7, %v4267_v15, %v4271_v8  ;;  %v3208_v18 = vor.u32 %v3207_v48, %v3203_v45  ;;  %v6208_v31 = vcombine.low %v8943_v62, %v8951_v1  ;;  %v4274_v63 = vshrl.u32 %v8988_v34, 16  ;;  %v9005_v3 = vpop.f32.mrb[32].mxu1 }
 0x29f   : > { %v6224_v33 = vcombine.low %v4262_v60, %v4272_v36  ;;  %v3199_v39 = vrot.slane %v3198_v2, 4  ;;  %v3479_v59 = vsel %vm7953_vm10, %v6145_v46, %v3478_v38  ;;  %v3480_v58 = vrot.slane %v3478_v38, 4  ;;  %v9007_v6 = vpop.f32.mrb[32].mxu0  ;;  %v9011_v62 = vpop.f32.mrb[33].mxu1 }
 0x2a0   : > { %9886 = vst [vmem:[#allocation18_spill] sm:$0xff] %v9007_v6  ;;  %v3209_v41 = vrot.slane %v3208_v18, 4  ;;  %v4276_v61 = vrot.slane %v4274_v63, 4  ;;  %v4277_v8 = vshll.u32 %v8988_v34, 16  ;;  %v4283_v15 = vshll.u32 %v8996_v29, 16  ;;  %v9013_v1 = vpop.f32.mrb[33].mxu0 }
 0x2a1   : > { %9887 = vst [vmem:[#allocation19_spill] sm:$0xff] %v9013_v1  ;;  %4793 = vmatprep.mubr.bf16.mxu0 %v6224_v33  ;;  %v3204_v48 = vsel %vm7949_vm7, %v3199_v39, %v3203_v45  ;;  %v3482_v46 = vsel %vm7953_vm10, %v3480_v58, %v3481_v30  ;;  %v4287_v60 = vshrl.u32 %v8996_v29, 16  ;;  %v4293_v2 = vshll.u32 %v4004_v51, 16  ;;  %v9020_v38 = vpop.f32.mrb[34].mxu1  ;;  %v9022_v36 = vpop.f32.mrb[34].mxu0  ;;  %v7400_v18 = vld [vmem:[#allocation9] sm:$0xff]  }
 0x2a2   : > { %9888 = vst [vmem:[#allocation20_spill] sm:$0xff] %v9020_v38  ;;  %9889 = vst [vmem:[#allocation21_spill] sm:$0xff] %v9022_v36  ;;  %v3214_v63 = vsel %vm7949_vm7, %v3209_v41, %v3213_v23  ;;  %v6177_v9 = vcombine.low %v3479_v59, %v3482_v46  ;;  %4794 = vmatmul.mubr.bf16.gmra.mrb[120].mxu0 %v6208_v31  ;;  %v4279_v33 = vrot.slane %v4277_v8, 5  ;;  %v4285_v1 = vrot.slane %v4283_v15, 5  ;;  %v2936_v6 = vld [vmem:[#allocation2 + $0x90] sm:$0xf] }
 0x2a3   : > { %v9026_v45 = vpop.f32.mrb[35].mxu1  ;;  %v9028_v39 = vpop.f32.mrb[35].mxu0  ;;  %v6160_v30 = vcombine.low %v3204_v48, %v3214_v63  ;;  %v4289_v58 = vrot.slane %v4287_v60, 4  ;;  %v4295_v51 = vrot.slane %v4293_v2, 5  ;;  %v6536_v38 = vadd.f32 %v8818_v17, %v8815_v27  ;;  %7110 = vmatprep.subr.bf16.mxu0 %v7400_v18  ;;  %v3347_v46 = vld [vmem:[#allocation2 + $0x9c] sm:$0xe] }
 0x2a4   : > { %v4280_v36 = vor.u32 %v4279_v33, %v4276_v61  ;;  %v6648_v23 = vadd.f32 %v8611_v7, %v8605_v35  ;;  %v6539_v31 = vadd.f32 %v8826_v43, %v8824_v22  ;;  %v6651_v59 = vadd.f32 %v8625_v20, %v8618_v42  ;;  %7111 = vmatpush3.bf16.msra.mxu0 %v7400_v18  ;;  %v9044_v7 = vld [vmem:[#allocation2 + $0xa0] sm:$0xf]  ;;  %v9046_v22 = vld [vmem:[#allocation2 + $0xa4] sm:$0x1]  ;;  %v9048_v42 = vld [vmem:[#allocation2 + $0xa8] sm:$0xf] }
 0x2a5   : > { %3880 = vmatmul.mubr.bf16.gmra.mrb[120].mxu1 %v6160_v30  ;;  %v4290_v41 = vor.u32 %v4289_v58, %v4285_v1  ;;  %v3216_v8 = vshrl.u32 %v2936_v6, 16  ;;  %v3219_v15 = vshll.u32 %v2936_v6, 16  ;;  %v3225_v48 = vshll.u32 %v8990_v19, 16 }
 0x2a6   : > { %3887 = vmatprep.mubr.bf16.mxu1 %v6177_v9  ;;  %v4281_v27 = vrot.slane %v4280_v36, 4  ;;  %v9039_v61 = vadd.f32 %v6648_v23, %v6536_v38  ;;  %v9041_v17 = vadd.f32 %v6651_v59, %v6539_v31  ;;  %v3229_v35 = vshrl.u32 %v8990_v19, 16  ;;  %v9050_v2 = vpop.f32.mrb[36].mxu1  ;;  %v9063_v31 = vld [vmem:[#allocation2 + $0xac] sm:$0xf] }
 0x2a7   : > { %v4291_v20 = vrot.slane %v4290_v41, 4  ;;  %v3218_v43 = vrot.slane %v3216_v8, 4  ;;  %v3221_v6 = vrot.slane %v3219_v15, 5  ;;  %v3227_v60 = vrot.slane %v3225_v48, 5  ;;  %v9055_v19 = vpop.f32.mrb[37].mxu1  ;;  %9892 = vst [vmem:[#allocation24_spill] sm:$0xff] %v9063_v31 }
 0x2a8   : > { %9890 = vst [vmem:[#allocation22_spill] sm:$0xff] %v9039_v61  ;;  %9891 = vst [vmem:[#allocation23_spill] sm:$0xff] %v9041_v17  ;;  %v4286_v9 = vsel %vm7949_vm7, %v4281_v27, %v4285_v1  ;;  %v3231_v38 = vrot.slane %v3229_v35, 4  ;;  %v3235_v36 = vshll.u32 %v8984_v13, 16  ;;  %v6146_v18 = vrot.slane %v3347_v46, 9  ;;  %v9057_v63 = vpop.f32.mrb[36].mxu0 }
 0x2a9   : > { %v4296_v33 = vsel %vm7949_vm7, %v4291_v20, %v4295_v51  ;;  %v3222_v30 = vor.u32 %v3221_v6, %v3218_v43  ;;  %v3485_v58 = vrot.slane %v9044_v7, 5  ;;  %v3488_v23 = vrot.slane %v9046_v22, 5  ;;  %v9065_v59 = vpop.f32.mrb[38].mxu1  ;;  %v9067_v1 = vpop.f32.mrb[37].mxu0  ;;  %v9071_v48 = vld [vmem:[#allocation2 + $0xb0] sm:$0x1] }
 0x2aa   : > { %v6225_v13 = vcombine.low %v4286_v9, %v4296_v33  ;;  %v3232_v41 = vor.u32 %v3231_v38, %v3227_v60  ;;  %v3237_v8 = vrot.slane %v3235_v36, 5  ;;  %v6209_v15 = vcombine.low %v8988_v34, %v8996_v29  ;;  %9893 = vst [vmem:[#allocation25_spill] sm:$0xff] %v9071_v48  ;;  %v9073_v51 = vpop.f32.mrb[39].mxu1  ;;  %v9075_v46 = vpop.f32.mrb[38].mxu0  ;;  %v2939_v61 = vld [vmem:[#allocation2 + $0x9c] sm:$0xf] }
 0x2ab   : > { %9894 = vst [vmem:[#allocation26_spill] sm:$0xff] %v9073_v51  ;;  %9895 = vst [vmem:[#allocation27_spill] sm:$0xff] %v9075_v46  ;;  %v3223_v27 = vrot.slane %v3222_v30, 4  ;;  %v3486_v35 = vsel %vm7953_vm10, %v6146_v18, %v3485_v58  ;;  %v3487_v20 = vrot.slane %v3485_v58, 4  ;;  %v4298_v43 = vshrl.u32 %v9048_v42, 16  ;;  %v9080_v6 = vpop.f32.mrb[39].mxu0 }
 0x2ac   : > { %9896 = vst [vmem:[#allocation28_spill] sm:$0xff] %v9080_v6  ;;  %4801 = vmatprep.mubr.bf16.mxu0 %v6225_v13  ;;  %v3233_v9 = vrot.slane %v3232_v41, 4  ;;  %v4301_v38 = vshll.u32 %v9048_v42, 16  ;;  %v4307_v34 = vshll.u32 %v9063_v31, 16  ;;  %v4311_v29 = vshrl.u32 %v9063_v31, 16 }
 0x2ad   : > { %v3228_v36 = vsel %vm7949_vm7, %v3223_v27, %v3227_v60  ;;  %v3489_v33 = vsel %vm7953_vm10, %v3487_v20, %v3488_v23  ;;  %4802 = vmatmul.mubr.bf16.gmra.mrb[124].mxu0 %v6209_v15  ;;  %v4300_v18 = vrot.slane %v4298_v43, 4  ;;  %v4317_v30 = vshll.u32 %v9071_v48, 16 }
 0x2ae   : > { %v3238_v58 = vsel %vm7949_vm7, %v3233_v9, %v3237_v8  ;;  %v6178_v13 = vcombine.low %v3486_v35, %v3489_v33  ;;  %v4303_v41 = vrot.slane %v4301_v38, 5  ;;  %v4309_v17 = vrot.slane %v4307_v34, 5  ;;  %v3348_v35 = vld [vmem:[#allocation2 + $0xa8] sm:$0xe] }
 0x2af   : > { %v6161_v6 = vcombine.low %v3228_v36, %v3238_v58  ;;  %v4313_v46 = vrot.slane %v4311_v29, 4  ;;  %v4319_v51 = vrot.slane %v4317_v30, 5  ;;  %v6542_v60 = vadd.f32 %v8855_v12, %v8849_v55 }
 0x2b0   : > { %v4304_v27 = vor.u32 %v4303_v41, %v4300_v18  ;;  %v6654_v23 = vadd.f32 %v8888_v10, %v8882_v24  ;;  %v6545_v15 = vadd.f32 %v8862_v28, %v8860_v50  ;;  %v6657_v8 = vadd.f32 %v8893_v56, %v8890_v14  ;;  %v9100_v20 = vpop.f32.mrb[40].mxu1  ;;  %v9102_v43 = vpop.f32.mrb[40].mxu0  ;;  %v9114_v56 = vld [vmem:[#allocation2 + $0xac] sm:$0xf] }
 0x2b1   : > { %3888 = vmatmul.mubr.bf16.gmra.mrb[124].mxu1 %v6161_v6  ;;  %v4314_v9 = vor.u32 %v4313_v46, %v4309_v17  ;;  %v3240_v38 = vshrl.u32 %v2939_v61, 16  ;;  %v3243_v34 = vshll.u32 %v2939_v61, 16  ;;  %v3249_v55 = vshll.u32 %v9044_v7, 16  ;;  %v9105_v12 = vpop.f32.mrb[41].mxu1  ;;  %v9107_v24 = vpop.f32.mrb[41].mxu0 }
 0x2b2   : > { %3895 = vmatprep.mubr.bf16.mxu1 %v6178_v13  ;;  %v4305_v50 = vrot.slane %v4304_v27, 4  ;;  %v9109_v28 = vadd.f32 %v6654_v23, %v6542_v60  ;;  %v9111_v10 = vadd.f32 %v6657_v8, %v6545_v15  ;;  %v3253_v14 = vshrl.u32 %v9044_v7, 16  ;;  %v9116_v6 = vld [vmem:[#allocation2 + $0xb0] sm:$0x1]  ;;  %v9118_v46 = vpop.f32.mrb[42].mxu1  ;;  %v9120_v61 = vpop.f32.mrb[42].mxu0 }
 0x2b3   : > { %v4315_v29 = vrot.slane %v4314_v9, 4  ;;  %v3242_v36 = vrot.slane %v3240_v38, 4  ;;  %v3245_v33 = vrot.slane %v3243_v34, 5  ;;  %v3251_v18 = vrot.slane %v3249_v55, 5  ;;  %v9122_v30 = vpop.f32.mrb[43].mxu1  ;;  %v9124_v58 = vpop.f32.mrb[43].mxu0 }
 0x2b4   : > { %9897 = vst [vmem:[#allocation29_spill] sm:$0xff] %v9109_v28  ;;  %9898 = vst [vmem:[#allocation30_spill] sm:$0xff] %v9111_v10  ;;  %v4310_v13 = vsel %vm7949_vm7, %v4305_v50, %v4309_v17  ;;  %v3255_v7 = vrot.slane %v3253_v14, 4  ;;  %v3259_v41 = vshll.u32 %v9046_v22, 16  ;;  %v6147_v60 = vrot.slane %v3348_v35, 9  ;;  %v7401_v23 = vld [vmem:[#allocation9 + $0x8] sm:$0xff]  }
 0x2b5   : > { %v9129_v27 = vld [vmem:[#allocation2 + $0xb4] sm:$0xf]  ;;  %v4320_v15 = vsel %vm7949_vm7, %v4315_v29, %v4319_v51  ;;  %v3246_v8 = vor.u32 %v3245_v33, %v3242_v36  ;;  %v3492_v9 = vrot.slane %v9114_v56, 5  ;;  %v3495_v38 = vrot.slane %v9116_v6, 5  ;;  %v9135_v34 = vld [vmem:[#allocation2 + $0xb8] sm:$0xf]  ;;  %7112 = vmatprep.subr.bf16.mxu0 %v7401_v23 }
 0x2b6   : > { %9899 = vst [vmem:[#allocation31_spill] sm:$0xff] %v9135_v34  ;;  %v6226_v55 = vcombine.low %v4310_v13, %v4320_v15  ;;  %v3256_v10 = vor.u32 %v3255_v7, %v3251_v18  ;;  %v3261_v17 = vrot.slane %v3259_v41, 5  ;;  %v6210_v22 = vcombine.low %v9048_v42, %v9063_v31  ;;  %v9139_v35 = vld [vmem:[#allocation2 + $0xbc] sm:$0x1]  ;;  %7113 = vmatpush3.bf16.msra.mxu0 %v7401_v23 }
 0x2b7   : > { %9900 = vst [vmem:[#allocation32_spill] sm:$0xff] %v9139_v35  ;;  %v3247_v50 = vrot.slane %v3246_v8, 4  ;;  %v3493_v51 = vsel %vm7953_vm10, %v6147_v60, %v3492_v9  ;;  %v3494_v14 = vrot.slane %v3492_v9, 4  ;;  %v4322_v29 = vshrl.u32 %v9129_v27, 16 }
 0x2b8   : > { %4809 = vmatprep.mubr.bf16.mxu0 %v6226_v55  ;;  %v3257_v36 = vrot.slane %v3256_v10, 4  ;;  %v4325_v33 = vshll.u32 %v9129_v27, 16  ;;  %v4331_v13 = vshll.u32 %v9135_v34, 16  ;;  %v4335_v7 = vshrl.u32 %v9135_v34, 16  ;;  %v2942_v55 = vld [vmem:[#allocation2 + $0xa8] sm:$0xf] }
 0x2b9   : > { %v3252_v42 = vsel %vm7949_vm7, %v3247_v50, %v3251_v18  ;;  %v3496_v41 = vsel %vm7953_vm10, %v3494_v14, %v3495_v38  ;;  %4810 = vmatmul.mubr.bf16.gmra.mrb[128].mxu0 %v6210_v22  ;;  %v4324_v60 = vrot.slane %v4322_v29, 4  ;;  %v4341_v15 = vshll.u32 %v9139_v35, 16 }
 0x2ba   : > { %v3262_v23 = vsel %vm7949_vm7, %v3257_v36, %v3261_v17  ;;  %v6179_v10 = vcombine.low %v3493_v51, %v3496_v41  ;;  %v4327_v8 = vrot.slane %v4325_v33, 5  ;;  %v4333_v9 = vrot.slane %v4331_v13, 5 }
 0x2bb   : > { %v6162_v28 = vcombine.low %v3252_v42, %v3262_v23  ;;  %v4337_v48 = vrot.slane %v4335_v7, 4  ;;  %v4343_v31 = vrot.slane %v4341_v15, 5  ;;  %v6548_v18 = vadd.f32 %v8932_v4, %v8930_v40  ;;  %v9156_v50 = vpop.f32.mrb[44].mxu1  ;;  %v3349_v4 = vld [vmem:[#allocation2 + $0xb4] sm:$0xe] }
 0x2bc   : > { %v4328_v38 = vor.u32 %v4327_v8, %v4324_v60  ;;  %v6660_v22 = vadd.f32 %v8915_v44, %v8911_v49  ;;  %v6551_v14 = vadd.f32 %v8941_v25, %v8936_v5  ;;  %v6663_v17 = vadd.f32 %v8926_v53, %v8919_v11  ;;  %v9164_v51 = vpop.f32.mrb[45].mxu1  ;;  %v9174_v11 = vld [vmem:[#allocation2 + $0xb8] sm:$0xf]  ;;  %v9176_v53 = vld [vmem:[#allocation2 + $0xbc] sm:$0x1] }
 0x2bd   : > { %3896 = vmatmul.mubr.bf16.gmra.mrb[128].mxu1 %v6162_v28  ;;  %v4338_v29 = vor.u32 %v4337_v48, %v4333_v9  ;;  %v3264_v36 = vshrl.u32 %v2942_v55, 16  ;;  %v3267_v33 = vshll.u32 %v2942_v55, 16  ;;  %v3273_v40 = vshll.u32 %v9114_v56, 16  ;;  %v9167_v13 = vpop.f32.mrb[46].mxu1 }
 0x2be   : > { %3903 = vmatprep.mubr.bf16.mxu1 %v6179_v10  ;;  %v4329_v7 = vrot.slane %v4328_v38, 4  ;;  %v9169_v49 = vadd.f32 %v6660_v22, %v6548_v18  ;;  %v9171_v44 = vadd.f32 %v6663_v17, %v6551_v14  ;;  %v3277_v5 = vshrl.u32 %v9114_v56, 16  ;;  %v9178_v25 = vpop.f32.mrb[47].mxu1  ;;  %v9185_v56 = vld [vmem:[#allocation2 + $0xc0] sm:$0xf] }
 0x2bf   : > { %v4339_v48 = vrot.slane %v4338_v29, 4  ;;  %v3266_v28 = vrot.slane %v3264_v36, 4  ;;  %v3269_v42 = vrot.slane %v3267_v33, 5  ;;  %v3275_v41 = vrot.slane %v3273_v40, 5  ;;  %v9180_v60 = vpop.f32.mrb[44].mxu0 }
 0x2c0   : > { %9901 = vst [vmem:[#allocation33_spill] sm:$0xff] %v9169_v49  ;;  %9902 = vst [vmem:[#allocation34_spill] sm:$0xff] %v9171_v44  ;;  %v4334_v15 = vsel %vm7949_vm7, %v4329_v7, %v4333_v9  ;;  %v3279_v23 = vrot.slane %v3277_v5, 4  ;;  %v3283_v10 = vshll.u32 %v9116_v6, 16  ;;  %v6148_v8 = vrot.slane %v3349_v4, 9  ;;  %v9187_v55 = vpop.f32.mrb[45].mxu0 }
 0x2c1   : > { %v4344_v18 = vsel %vm7949_vm7, %v4339_v48, %v4343_v31  ;;  %v3270_v38 = vor.u32 %v3269_v42, %v3266_v28  ;;  %v3499_v22 = vrot.slane %v9174_v11, 5  ;;  %v3502_v14 = vrot.slane %v9176_v53, 5  ;;  %v9193_v17 = vld [vmem:[#allocation2 + $0xc4] sm:$0xf]  ;;  %v9195_v29 = vpop.f32.mrb[46].mxu0 }
 0x2c2   : > { %9903 = vst [vmem:[#allocation35_spill] sm:$0xff] %v9193_v17  ;;  %v6227_v9 = vcombine.low %v4334_v15, %v4344_v18  ;;  %v3280_v36 = vor.u32 %v3279_v23, %v3275_v41  ;;  %v3285_v6 = vrot.slane %v3283_v10, 5  ;;  %v6211_v33 = vcombine.low %v9129_v27, %v9135_v34  ;;  %v9199_v40 = vld [vmem:[#allocation2 + $0xc8] sm:$0x1]  ;;  %v9201_v4 = vpop.f32.mrb[47].mxu0 }
 0x2c3   : > { %9904 = vst [vmem:[#allocation36_spill] sm:$0xff] %v9199_v40  ;;  %v3271_v31 = vrot.slane %v3270_v38, 4  ;;  %v3500_v7 = vsel %vm7953_vm10, %v6148_v8, %v3499_v22  ;;  %v3501_v5 = vrot.slane %v3499_v22, 4  ;;  %v4346_v48 = vshrl.u32 %v9185_v56, 16  ;;  %v2945_v44 = vld [vmem:[#allocation2 + $0xb4] sm:$0xf] }
 0x2c4   : > { %4817 = vmatprep.mubr.bf16.mxu0 %v6227_v9  ;;  %v3281_v28 = vrot.slane %v3280_v36, 4  ;;  %v4349_v42 = vshll.u32 %v9185_v56, 16  ;;  %v4355_v15 = vshll.u32 %v9193_v17, 16  ;;  %v4359_v23 = vshrl.u32 %v9193_v17, 16 }
 0x2c5   : > { %v3276_v27 = vsel %vm7949_vm7, %v3271_v31, %v3275_v41  ;;  %v3503_v10 = vsel %vm7953_vm10, %v3501_v5, %v3502_v14  ;;  %4818 = vmatmul.mubr.bf16.gmra.mrb[132].mxu0 %v6211_v33  ;;  %v4348_v18 = vrot.slane %v4346_v48, 4  ;;  %v4365_v8 = vshll.u32 %v9199_v40, 16  ;;  %v7410_v40 = vld [vmem:[#allocation2 + $0x1c] sm:$0xf] }
 0x2c6   : > { %v3286_v38 = vsel %vm7949_vm7, %v3281_v28, %v3285_v6  ;;  %v6180_v22 = vcombine.low %v3500_v7, %v3503_v10  ;;  %v4351_v9 = vrot.slane %v4349_v42, 5  ;;  %v4357_v36 = vrot.slane %v4355_v15, 5  ;;  %v3350_v7 = vld [vmem:[#allocation2 + $0xc0] sm:$0xe] }
 0x2c7   : > { %v6163_v49 = vcombine.low %v3276_v27, %v3286_v38  ;;  %v4361_v35 = vrot.slane %v4359_v23, 4  ;;  %v4367_v34 = vrot.slane %v4365_v8, 5  ;;  %v6554_v41 = vadd.f32 %v8965_v0, %v8959_v37  ;;  %v9218_v31 = vpop.f32.mrb[48].mxu0 }
 0x2c8   : > { %v4352_v14 = vor.u32 %v4351_v9, %v4348_v18  ;;  %v6666_v33 = vadd.f32 %v8975_v16, %v8971_v54  ;;  %v6557_v5 = vadd.f32 %v8977_v21, %v8973_v57  ;;  %v6669_v6 = vadd.f32 %v8986_v47, %v8980_v52  ;;  %v9226_v48 = vpop.f32.mrb[49].mxu0  ;;  %v7402_v54 = vld [vmem:[#allocation9 + $0x10] sm:$0xff]  }
 0x2c9   : > { %3904 = vmatmul.mubr.bf16.gmra.mrb[132].mxu1 %v6163_v49  ;;  %v4362_v28 = vor.u32 %v4361_v35, %v4357_v36  ;;  %v3288_v42 = vshrl.u32 %v2945_v44, 16  ;;  %v3291_v15 = vshll.u32 %v2945_v44, 16  ;;  %v3297_v37 = vshll.u32 %v9174_v11, 16  ;;  %v9229_v0 = vpop.f32.mrb[48].mxu1  ;;  %v9231_v23 = vpop.f32.mrb[50].mxu0  ;;  %7114 = vmatprep.subr.bf16.mxu0 %v7402_v54 }
 0x2ca   : > { %3911 = vmatprep.mubr.bf16.mxu1 %v6180_v22  ;;  %v4353_v16 = vrot.slane %v4352_v14, 4  ;;  %v9233_v57 = vadd.f32 %v6666_v33, %v6554_v41  ;;  %v9235_v21 = vadd.f32 %v6669_v6, %v6557_v5  ;;  %v3301_v52 = vshrl.u32 %v9174_v11, 16  ;;  %v9238_v47 = vld [vmem:[#allocation2 + $0xc8] sm:$0x1]  ;;  %v9240_v35 = vpop.f32.mrb[49].mxu1  ;;  %v9242_v49 = vpop.f32.mrb[51].mxu0  ;;  %7115 = vmatpush3.bf16.msra.mxu0 %v7402_v54 }
 0x2cb   : > { %v4363_v44 = vrot.slane %v4362_v28, 4  ;;  %v3290_v27 = vrot.slane %v3288_v42, 4  ;;  %v3293_v10 = vrot.slane %v3291_v15, 5  ;;  %v3299_v18 = vrot.slane %v3297_v37, 5  ;;  %v9244_v8 = vpop.f32.mrb[50].mxu1 }
 0x2cc   : > { %9905 = vst [vmem:[#allocation37_spill] sm:$0xff] %v9233_v57  ;;  %9906 = vst [vmem:[#allocation38_spill] sm:$0xff] %v9235_v21  ;;  %v4358_v38 = vsel %vm7949_vm7, %v4353_v16, %v4357_v36  ;;  %v3303_v22 = vrot.slane %v3301_v52, 4  ;;  %v3307_v9 = vshll.u32 %v9176_v53, 16  ;;  %v2949_v11 = vld [vmem:[#allocation2 + $0xc4] sm:$0xf]  ;;  %v6212_v36 = vcombine.low %v9185_v56, %v9193_v17 }
 0x2cd   : > { %v6149_v41 = vrot.slane %v3350_v7, 9  ;;  %v9249_v14 = vpop.f32.mrb[51].mxu1  ;;  %v4368_v33 = vsel %vm7949_vm7, %v4363_v44, %v4367_v34  ;;  %v3294_v5 = vor.u32 %v3293_v10, %v3290_v27  ;;  %v3506_v6 = vrot.slane %v2949_v11, 5  ;;  %v2948_v16 = vld [vmem:[#allocation2 + $0xc0] sm:$0xf]  ;;  %v9908_v27 = vld [vmem:[#allocation19_spill] sm:$0xff] }
 0x2ce   : > { %v3509_v28 = vrot.slane %v9238_v47, 5  ;;  %v6228_v42 = vcombine.low %v4358_v38, %v4368_v33  ;;  %v3304_v15 = vor.u32 %v3303_v22, %v3299_v18  ;;  %v3309_v37 = vrot.slane %v3307_v9, 5  ;;  %v9907_v44 = vld [vmem:[#allocation18_spill] sm:$0xff]  ;;  %v9909_v38 = vld [vmem:[#allocation20_spill] sm:$0xff]  ;;  %v9910_v9 = vld [vmem:[#allocation21_spill] sm:$0xff] }
 0x2cf   : > { %v3295_v53 = vrot.slane %v3294_v5, 4  ;;  %v3507_v7 = vsel %vm7953_vm10, %v6149_v41, %v3506_v6  ;;  %v3508_v52 = vrot.slane %v3506_v6, 4  ;;  %v6560_v54 = vadd.f32 %v9011_v62, %v9005_v3  ;;  %v9270_v62 = vld [vmem:[#allocation2 + $0xcc] sm:$0xf] }
 0x2d0   : > { %4825 = vmatprep.mubr.bf16.mxu0 %v6228_v42  ;;  %v3305_v34 = vrot.slane %v3304_v15, 4  ;;  %v6672_v10 = vadd.f32 %v9908_v27, %v9907_v44  ;;  %v6563_v22 = vadd.f32 %v9026_v45, %v9909_v38  ;;  %v6675_v56 = vadd.f32 %v9028_v39, %v9910_v9  ;;  %v9280_v44 = vld [vmem:[#allocation2 + $0xd0] sm:$0xf] }
 0x2d1   : > { %v3300_v33 = vsel %vm7949_vm7, %v3295_v53, %v3299_v18  ;;  %v3510_v41 = vsel %vm7953_vm10, %v3508_v52, %v3509_v28  ;;  %4826 = vmatmul.mubr.bf16.gmra.mrb[136].mxu0 %v6212_v36  ;;  %v3312_v5 = vshrl.u32 %v2948_v16, 16  ;;  %v3315_v3 = vshll.u32 %v2948_v16, 16  ;;  %v9284_v52 = vld [vmem:[#allocation2 + $0xd4] sm:$0x1] }
 0x2d2   : > { %v9272_v6 = vpop.f32.mrb[52].mxu1  ;;  %v3310_v42 = vsel %vm7949_vm7, %v3305_v34, %v3309_v37  ;;  %v6181_v45 = vcombine.low %v3507_v7, %v3510_v41  ;;  %v9276_v15 = vadd.f32 %v6672_v10, %v6560_v54  ;;  %v9278_v39 = vadd.f32 %v6675_v56, %v6563_v22  ;;  %9913 = vst [vmem:[#allocation20_spill] sm:$0xff] %v9284_v52 }
 0x2d3   : > { %v9282_v18 = vpop.f32.mrb[53].mxu1  ;;  %v6164_v28 = vcombine.low %v3300_v33, %v3310_v42  ;;  %v3314_v36 = vrot.slane %v3312_v5, 4  ;;  %v3317_v53 = vrot.slane %v3315_v3, 5  ;;  %v3321_v16 = vshll.u32 %v2949_v11, 16  ;;  %v4874_v33 = vld [vmem:[#allocation2 + $0x18] sm:$0xe] }
 0x2d4   : > { %9911 = vst [vmem:[#allocation18_spill] sm:$0xff] %v9276_v15  ;;  %9912 = vst [vmem:[#allocation19_spill] sm:$0xff] %v9278_v39  ;;  %v9286_v27 = vpop.f32.mrb[54].mxu1  ;;  %v3325_v38 = vshrl.u32 %v2949_v11, 16  ;;  %v3331_v37 = vshll.u32 %v9238_v47, 16  ;;  %v4370_v7 = vshrl.u32 %v9270_v62, 16 }
 0x2d5   : > { %v4373_v54 = vshll.u32 %v9270_v62, 16  ;;  %v9291_v34 = vpop.f32.mrb[55].mxu1  ;;  %3912 = vmatmul.mubr.bf16.gmra.mrb[136].mxu1 %v6164_v28  ;;  %v3318_v10 = vor.u32 %v3317_v53, %v3314_v36  ;;  %v3323_v22 = vrot.slane %v3321_v16, 5  ;;  %v4379_v9 = vshll.u32 %v9280_v44, 16  ;;  %v9295_v41 = vpop.f32.mrb[52].mxu0 }
 0x2d6   : > { %9914 = vst [vmem:[#allocation21_spill] sm:$0xff] %v9291_v34  ;;  %v4383_v56 = vshrl.u32 %v9280_v44, 16  ;;  %3919 = vmatprep.mubr.bf16.mxu1 %v6181_v45  ;;  %v3327_v11 = vrot.slane %v3325_v38, 4  ;;  %v3333_v5 = vrot.slane %v3331_v37, 5  ;;  %v4372_v47 = vrot.slane %v4370_v7, 4  ;;  %v9297_v42 = vpop.f32.mrb[53].mxu0 }
 0x2d7   : > { %v4375_v3 = vrot.slane %v4373_v54, 5  ;;  %v3319_v39 = vrot.slane %v3318_v10, 4  ;;  %v4381_v15 = vrot.slane %v4379_v9, 5  ;;  %v4389_v28 = vshll.u32 %v9284_v52, 16  ;;  %v9300_v36 = vpop.f32.mrb[54].mxu0 }
 0x2d8   : > { %v4385_v21 = vrot.slane %v4383_v56, 4  ;;  %v3328_v53 = vor.u32 %v3327_v11, %v3323_v22  ;;  %v6246_v57 = vrot.slane %v4874_v33, 9  ;;  %v4924_v17 = vrot.slane %v7410_v40, 5  ;;  %v9302_v34 = vpop.f32.mrb[55].mxu0  ;;  %v7411_v7 = vld [vmem:[#allocation2 + $0x20] sm:$0x1] }
 0x2d9   : > { %v4376_v16 = vor.u32 %v4375_v3, %v4372_v47  ;;  %v3324_v45 = vsel %vm7949_vm7, %v3319_v39, %v3323_v22  ;;  %v4391_v37 = vrot.slane %v4389_v28, 5  ;;  %v4927_v54 = vrot.slane %v7411_v7, 5  ;;  %v7412_v7 = vld [vmem:[#allocation2 + $0x28] sm:$0xf] }
 0x2da   : > { %v4386_v38 = vor.u32 %v4385_v21, %v4381_v15  ;;  %v3329_v10 = vrot.slane %v3328_v53, 4  ;;  %v4925_v56 = vsel %vm7953_vm10, %v6246_v57, %v4924_v17  ;;  %v4926_v52 = vrot.slane %v4924_v17, 4  ;;  %v4875_v21 = vld [vmem:[#allocation2 + $0x24] sm:$0xe]  ;;  %v9916_v53 = vld [vmem:[#allocation27_spill] sm:$0xff] }
 0x2db   : > { %v4377_v9 = vrot.slane %v4376_v16, 4  ;;  %v6213_v33 = vcombine.low %v9270_v62, %v9280_v44  ;;  %v6566_v40 = vadd.f32 %v9055_v19, %v9050_v2  ;;  %v6678_v39 = vadd.f32 %v9067_v1, %v9057_v63  ;;  %v9915_v57 = vld [vmem:[#allocation26_spill] sm:$0xff]  ;;  %v4876_v62 = vld [vmem:[#allocation2 + $0x30] sm:$0xe] }
 0x2dc   : > { %v4387_v11 = vrot.slane %v4386_v38, 4  ;;  %v3334_v22 = vsel %vm7949_vm7, %v3329_v10, %v3333_v5  ;;  %v4928_v17 = vsel %vm7953_vm10, %v4926_v52, %v4927_v54  ;;  %v6569_v3 = vadd.f32 %v9915_v57, %v9065_v59  ;;  %v9917_v16 = vld [vmem:[#allocation28_spill] sm:$0xff]  ;;  %v4877_v57 = vld [vmem:[#allocation2 + $0x3c] sm:$0xe] }
 0x2dd   : > { %v4382_v47 = vsel %vm7949_vm7, %v4377_v9, %v4381_v15  ;;  %v6165_v28 = vcombine.low %v3324_v45, %v3334_v22  ;;  %v6262_v19 = vcombine.low %v4925_v56, %v4928_v17  ;;  %v9324_v63 = vadd.f32 %v6678_v39, %v6566_v40  ;;  %v9326_v1 = vpop.f32.mrb[56].mxu0  ;;  %v7403_v59 = vld [vmem:[#allocation9 + $0x18] sm:$0xff]  }
 0x2de   : > { %v4392_v2 = vsel %vm7949_vm7, %v4387_v11, %v4391_v37  ;;  %v6681_v15 = vadd.f32 %v9917_v16, %v9916_v53  ;;  %v6247_v38 = vrot.slane %v4875_v21, 9  ;;  %v4931_v52 = vrot.slane %v7412_v7, 5  ;;  %v9330_v54 = vpop.f32.mrb[57].mxu0  ;;  %v7413_v10 = vld [vmem:[#allocation2 + $0x34] sm:$0xf]  ;;  %7116 = vmatprep.subr.bf16.mxu0 %v7403_v59 }
 0x2df   : > { %v6229_v5 = vcombine.low %v4382_v47, %v4392_v2  ;;  %3920 = vmatmul.mubr.bf16.gmra.mrb[140].mxu1 %v6165_v28  ;;  %v6248_v45 = vrot.slane %v4876_v62, 9  ;;  %v4938_v26 = vrot.slane %v7413_v10, 5  ;;  %v7414_v37 = vld [vmem:[#allocation2 + $0x38] sm:$0x1]  ;;  %v6572_v56 = vadd.f32 %v9105_v12, %v9100_v20  ;;  %v9334_v11 = vpop.f32.mrb[58].mxu0  ;;  %7117 = vmatpush3.bf16.msra.mxu0 %v7403_v59 }
 0x2e0   : > { %v4941_v9 = vrot.slane %v7414_v37, 5  ;;  %7078 = vmatprep.mubr.bf16.mxu1 %v6262_v19  ;;  %v9336_v40 = vadd.f32 %v6681_v15, %v6569_v3  ;;  %v4933_v39 = vrot.slane %v4931_v52, 4  ;;  %v6684_v21 = vadd.f32 %v9107_v24, %v9102_v43  ;;  %v9340_v22 = vpop.f32.mrb[59].mxu0  ;;  %v9918_v62 = vld [vmem:[#allocation17_spill] sm:$0xff]  ;;  %v7415_v2 = vld [vmem:[#allocation2 + $0x40] sm:$0xf] }
 0x2e1   : > { %4833 = vmatprep.mubr.bf16.mxu0 %v6229_v5  ;;  %v4932_v47 = vsel %vm7953_vm10, %v6247_v38, %v4931_v52  ;;  %v4940_v17 = vrot.slane %v4938_v26, 4  ;;  %v6575_v20 = vadd.f32 %v9122_v30, %v9118_v46  ;;  %v6687_v12 = vadd.f32 %v9124_v58, %v9120_v61  ;;  %v9348_v3 = vpop.f32.mrb[56].mxu1  ;;  %v4878_v58 = vld [vmem:[#allocation2 + $0x48] sm:$0xe]  ;;  %v7416_v15 = vld [vmem:[#allocation2 + $0x44] sm:$0x1] }
 0x2e2   : > { %4834 = vmatmul.mubr.bf16.gmra.mrb[140].mxu0 %v6213_v33  ;;  %v9919_v28 = vrot.slane %v9918_v62, 5  ;;  %v4939_v24 = vsel %vm7953_vm10, %v6248_v45, %v4938_v26  ;;  %v9356_v33 = vadd.f32 %v6684_v21, %v6572_v56  ;;  %v4945_v19 = vrot.slane %v7415_v2, 5  ;;  %v9358_v46 = vpop.f32.mrb[57].mxu1  ;;  %v7417_v45 = vld [vmem:[#allocation2 + $0x4c] sm:$0xf] }
 0x2e3   : > { %v4942_v61 = vsel %vm7953_vm10, %v4940_v17, %v4941_v9  ;;  %v9362_v30 = vadd.f32 %v6687_v12, %v6575_v20  ;;  %v9364_v5 = vpop.f32.mrb[58].mxu1  ;;  %v6249_v16 = vrot.slane %v4877_v57, 9  ;;  %v4948_v38 = vrot.slane %v7416_v15, 5  ;;  %v4879_v12 = vld [vmem:[#allocation2 + $0x54] sm:$0xe] }
 0x2e4   : > { %v4935_v43 = vsel %vm7953_vm10, %v4933_v39, %v9919_v28  ;;  %v9366_v7 = vpop.f32.mrb[59].mxu1  ;;  %v6264_v52 = vcombine.low %v4939_v24, %v4942_v61  ;;  %v4952_v10 = vrot.slane %v7417_v45, 5  ;;  %v6578_v59 = vadd.f32 %v9164_v51, %v9156_v50  ;;  %v7419_v51 = vld [vmem:[#allocation2 + $0x58] sm:$0xf]  ;;  %v4880_v24 = vld [vmem:[#allocation2 + $0x60] sm:$0xe] }
 0x2e5   : > { %v6263_v53 = vcombine.low %v4932_v47, %v4935_v43  ;;  %v6690_v26 = vadd.f32 %v9187_v55, %v9180_v60  ;;  %v4947_v37 = vrot.slane %v4945_v19, 4  ;;  %v6250_v9 = vrot.slane %v4878_v58, 9  ;;  %v7418_v47 = vld [vmem:[#allocation2 + $0x50] sm:$0x1]  ;;  %v7420_v2 = vld [vmem:[#allocation2 + $0x64] sm:$0xf] }
 0x2e6   : > { %v6581_v56 = vadd.f32 %v9178_v25, %v9167_v13  ;;  %v6693_v39 = vadd.f32 %v9201_v4, %v9195_v29  ;;  %v4954_v21 = vrot.slane %v4952_v10, 4  ;;  %v4955_v17 = vrot.slane %v7418_v47, 5  ;;  %v7423_v47 = vld [vmem:[#allocation2 + $0x70] sm:$0xf] }
 0x2e7   : > { %7079 = vmatmul.mubr.bf16.vlgmr.msra.gmra.mrb[144].mxu1 %v6263_v53  ;;  %v9376_v20 = vadd.f32 %v6690_v26, %v6578_v59  ;;  %v4959_v60 = vrot.slane %v7419_v51, 5  ;;  %v4946_v55 = vsel %vm7953_vm10, %v6249_v16, %v4945_v19  ;;  %v6584_v13 = vadd.f32 %v9240_v35, %v9229_v0  ;;  %v7421_v53 = vld [vmem:[#allocation2 + $0x5c] sm:$0x1] }
 0x2e8   : > { %7082 = vmatprep.mubr.bf16.mxu1 %v6264_v52  ;;  %v9378_v50 = vadd.f32 %v6693_v39, %v6581_v56  ;;  %v4949_v29 = vsel %vm7953_vm10, %v4947_v37, %v4948_v38  ;;  %v4953_v4 = vsel %vm7953_vm10, %v6250_v9, %v4952_v10  ;;  %v6251_v57 = vrot.slane %v4879_v12, 9  ;;  %v7422_v10 = vld [vmem:[#allocation2 + $0x68] sm:$0x1]  ;;  %v9920_v12 = vld [vmem:[#allocation21_spill] sm:$0xff] }
 0x2e9   : > { %v9384_v25 = vpop.f32.mrb[60].mxu1  ;;  %v6696_v62 = vadd.f32 %v9226_v48, %v9218_v31  ;;  %v4956_v43 = vsel %vm7953_vm10, %v4954_v21, %v4955_v17  ;;  %v4966_v0 = vrot.slane %v7420_v2, 5  ;;  %v6587_v35 = vadd.f32 %v9249_v14, %v9244_v8  ;;  %v4881_v21 = vld [vmem:[#allocation2 + $0x6c] sm:$0xe]  ;;  %v7425_v2 = vld [vmem:[#allocation2 + $0x74] sm:$0x1] }
 0x2ea   : > { %v9392_v28 = vpop.f32.mrb[61].mxu1  ;;  %v6699_v19 = vadd.f32 %v9242_v49, %v9231_v23  ;;  %v4961_v58 = vrot.slane %v4959_v60, 4  ;;  %v4962_v16 = vrot.slane %v7421_v53, 5  ;;  %v6265_v38 = vcombine.low %v4946_v55, %v4949_v29  ;;  %v4882_v55 = vld [vmem:[#allocation2 + $0x78] sm:$0xe] }
 0x2eb   : > { %v9400_v61 = vpop.f32.mrb[62].mxu1  ;;  %v9402_v31 = vadd.f32 %v6696_v62, %v6584_v13  ;;  %v6266_v8 = vcombine.low %v4953_v4, %v4956_v43  ;;  %v6252_v14 = vrot.slane %v4880_v24, 9  ;;  %v4969_v23 = vrot.slane %v7422_v10, 5  ;;  %v7404_v43 = vld [vmem:[#allocation9 + $0x20] sm:$0xff]  }
 0x2ec   : > { %v9406_v15 = vpop.f32.mrb[63].mxu1  ;;  %v9408_v52 = vadd.f32 %v6699_v19, %v6587_v35  ;;  %v4960_v59 = vsel %vm7953_vm10, %v6251_v57, %v4959_v60  ;;  %v4968_v26 = vrot.slane %v4966_v0, 4  ;;  %v6590_v37 = vadd.f32 %v9282_v18, %v9272_v6  ;;  %v7424_v6 = vld [vmem:[#allocation2 + $0x7c] sm:$0xf]  ;;  %7118 = vmatprep.subr.bf16.mxu0 %v7404_v43 }
 0x2ed   : > { %v9404_v48 = vpop.f32.mrb[60].mxu0  ;;  %v6702_v9 = vadd.f32 %v9297_v42, %v9295_v41  ;;  %v4963_v39 = vsel %vm7953_vm10, %v4961_v58, %v4962_v16  ;;  %v4973_v17 = vrot.slane %v7423_v47, 5  ;;  %v6593_v51 = vadd.f32 %v9920_v12, %v9286_v27  ;;  %7119 = vmatpush3.bf16.msra.mxu0 %v7404_v43 }
 0x2ee   : > { %v9410_v45 = vpop.f32.mrb[61].mxu0  ;;  %v6705_v60 = vadd.f32 %v9302_v34, %v9300_v36  ;;  %v4980_v18 = vrot.slane %v7424_v6, 5  ;;  %v4967_v42 = vsel %vm7953_vm10, %v6252_v14, %v4966_v0  ;;  %v6267_v57 = vcombine.low %v4960_v59, %v4963_v39  ;;  %v4883_v14 = vld [vmem:[#allocation2 + $0x84] sm:$0xe]  ;;  %v7427_v59 = vld [vmem:[#allocation2 + $0x88] sm:$0xf] }
 0x2ef   : > { %v9412_v49 = vpop.f32.mrb[62].mxu0  ;;  %7083 = vmatmul.mubr.bf16.gmra.mrb[148].mxu1 %v6265_v38  ;;  %v9428_v13 = vadd.f32 %v6702_v9, %v6590_v37  ;;  %v4970_v27 = vsel %vm7953_vm10, %v4968_v26, %v4969_v23  ;;  %v6253_v62 = vrot.slane %v4881_v21, 9  ;;  %v6596_v34 = vadd.f32 %v9358_v46, %v9348_v3  ;;  %v7426_v38 = vld [vmem:[#allocation2 + $0x80] sm:$0x1]  ;;  %v4884_v9 = vld [vmem:[#allocation2 + $0x90] sm:$0xe] }
 0x2f0   : > { %v9420_v56 = vpop.f32.mrb[63].mxu0  ;;  %7086 = vmatprep.mubr.bf16.mxu1 %v6266_v8  ;;  %v9434_v29 = vadd.f32 %v6705_v60, %v6593_v51  ;;  %v4975_v24 = vrot.slane %v4973_v17, 4  ;;  %v4976_v35 = vrot.slane %v7425_v2, 5  ;;  %v6254_v19 = vrot.slane %v4882_v55, 9  ;;  %v7428_v21 = vld [vmem:[#allocation2 + $0x94] sm:$0xf] }
 0x2f1   : > { %v9430_v41 = vpop.f32.mrb[64].mxu1  ;;  %v6708_v0 = vadd.f32 %v9330_v54, %v9326_v1  ;;  %v4982_v16 = vrot.slane %v4980_v18, 4  ;;  %v4983_v8 = vrot.slane %v7426_v38, 5  ;;  %v6599_v3 = vadd.f32 %v9366_v7, %v9364_v5  ;;  %v7429_v51 = vld [vmem:[#allocation2 + $0x8c] sm:$0x1] }
 0x2f2   : > { %v9436_v4 = vpop.f32.mrb[65].mxu1  ;;  %v6711_v46 = vadd.f32 %v9340_v22, %v9334_v11  ;;  %v6268_v23 = vcombine.low %v4967_v42, %v4970_v27  ;;  %v4987_v26 = vrot.slane %v7427_v59, 5  ;;  %v4974_v54 = vsel %vm7953_vm10, %v6253_v62, %v4973_v17  ;;  %v4888_v6 = vld [vmem:[#allocation2 + $0xc0] sm:$0xe] }
 0x2f3   : > { %v9442_v36 = vpop.f32.mrb[66].mxu1  ;;  %v9452_v37 = vadd.f32 %v6708_v0, %v6596_v34  ;;  %v4977_v11 = vsel %vm7953_vm10, %v4975_v24, %v4976_v35  ;;  %v4981_v22 = vsel %vm7953_vm10, %v6254_v19, %v4980_v18  ;;  %v6255_v7 = vrot.slane %v4883_v14, 9  ;;  %v7430_v24 = vld [vmem:[#allocation2 + $0x98] sm:$0x1]  ;;  %v4889_v14 = vld [vmem:[#allocation2 + $0xcc] sm:$0xe] }
 0x2f4   : > { %v9446_v53 = vpop.f32.mrb[67].mxu1  ;;  %v9456_v39 = vadd.f32 %v6711_v46, %v6599_v3  ;;  %v4994_v47 = vrot.slane %v7428_v21, 5  ;;  %v4984_v12 = vsel %vm7953_vm10, %v4982_v16, %v4983_v8  ;;  %v4990_v60 = vrot.slane %v7429_v51, 5  ;;  %v7431_v59 = vld [vmem:[#allocation2 + $0xa0] sm:$0xf]  ;;  %v9923_v51 = vld [vmem:[#allocation24_spill] sm:$0xff] }
 0x2f5   : > { %v6718_v58 = vpop.f32.mrb[64].mxu0  ;;  %v6602_v17 = vadd.f32 %v9392_v28, %v9384_v25  ;;  %v6714_v55 = vadd.f32 %v9410_v45, %v9404_v48  ;;  %v6256_v27 = vrot.slane %v4884_v9, 9  ;;  %v6605_v18 = vadd.f32 %v9406_v15, %v9400_v61  ;;  %v9921_v15 = vld [vmem:[#allocation35_spill] sm:$0xff] }
 0x2f6   : > { %v6719_v10 = vpop.f32.mrb[65].mxu0  ;;  %v6717_v62 = vadd.f32 %v9420_v56, %v9412_v49  ;;  %v6269_v43 = vcombine.low %v4974_v54, %v4977_v11  ;;  %v4997_v2 = vrot.slane %v7430_v24, 5  ;;  %v6270_v28 = vcombine.low %v4981_v22, %v4984_v12  ;;  %v9922_v49 = vld [vmem:[#allocation36_spill] sm:$0xff] }
 0x2f7   : > { %v6721_v1 = vpop.f32.mrb[66].mxu0  ;;  %7087 = vmatmul.mubr.bf16.gmra.mrb[152].mxu1 %v6267_v57  ;;  %v4989_v57 = vrot.slane %v4987_v26, 4  ;;  %v9472_v35 = vadd.f32 %v6714_v55, %v6602_v17  ;;  %v4996_v19 = vrot.slane %v4994_v47, 4  ;;  %v6260_v45 = vrot.slane %v4888_v6, 9 }
 0x2f8   : > { %v6722_v5 = vpop.f32.mrb[67].mxu0  ;;  %7090 = vmatprep.mubr.bf16.mxu1 %v6268_v23  ;;  %v9474_v48 = vadd.f32 %v6717_v62, %v6605_v18  ;;  %v4988_v61 = vsel %vm7953_vm10, %v6255_v7, %v4987_v26  ;;  %v5022_v38 = vrot.slane %v9921_v15, 5  ;;  %v5025_v56 = vrot.slane %v9922_v49, 5 }
 0x2f9   : > { %v6612_v42 = vpop.f32.mrb[68].mxu1  ;;  %v6608_v8 = vadd.f32 %v9436_v4, %v9430_v41  ;;  %v4991_v46 = vsel %vm7953_vm10, %v4989_v57, %v4990_v60  ;;  %v4995_v23 = vsel %vm7953_vm10, %v6256_v27, %v4994_v47  ;;  %v5001_v54 = vrot.slane %v7431_v59, 5 }
 0x2fa   : > { %v6613_v34 = vpop.f32.mrb[69].mxu1  ;;  %v6720_v9 = vadd.f32 %v6719_v10, %v6718_v58  ;;  %v9488_v26 = vsel %vm7953_vm10, %v6260_v45, %v5022_v38  ;;  %v5024_v22 = vrot.slane %v5022_v38, 4  ;;  %v6611_v41 = vadd.f32 %v9446_v53, %v9442_v36  ;;  %v4885_v10 = vld [vmem:[#allocation2 + $0x9c] sm:$0xe]  ;;  %v9924_v36 = vld [vmem:[#allocation20_spill] sm:$0xff] }
 0x2fb   : > { %v6615_v25 = vpop.f32.mrb[70].mxu1  ;;  %v6723_v4 = vadd.f32 %v6722_v5, %v6721_v1  ;;  %v4998_v21 = vsel %vm7953_vm10, %v4996_v19, %v4997_v2  ;;  %v6261_v12 = vrot.slane %v4889_v14, 9  ;;  %v5029_v58 = vrot.slane %v9280_v44, 5  ;;  %v4886_v45 = vld [vmem:[#allocation2 + $0xa8] sm:$0xe] }
 0x2fc   : > { %v6616_v16 = vpop.f32.mrb[71].mxu1  ;;  %v9494_v47 = vadd.f32 %v6720_v9, %v6608_v8  ;;  %v5008_v60 = vrot.slane %v9923_v51, 5  ;;  %v9500_v17 = vsel %vm7953_vm10, %v5024_v22, %v5025_v56  ;;  %v5032_v53 = vrot.slane %v9924_v36, 5 }
 0x2fd   : > { %v6724_v0 = vpop.f32.mrb[68].mxu0  ;;  %v9502_v55 = vadd.f32 %v6723_v4, %v6611_v41  ;;  %v6276_v5 = vcombine.low %v9488_v26, %v9500_v17  ;;  %v9509_v6 = vsel %vm7953_vm10, %v6261_v12, %v5029_v58  ;;  %v5031_v44 = vrot.slane %v5029_v58, 4  ;;  %v9931_v17 = vld [vmem:[#allocation30_spill] sm:$0xff] }
 0x2fe   : > { %v6725_v3 = vpop.f32.mrb[69].mxu0  ;;  %v6614_v57 = vadd.f32 %v6613_v34, %v6612_v42  ;;  %v6617_v62 = vadd.f32 %v6616_v16, %v6615_v25  ;;  %v6257_v19 = vrot.slane %v4885_v10, 9  ;;  %v5003_v16 = vrot.slane %v5001_v54, 4  ;;  %v9926_v10 = vld [vmem:[#allocation31_spill] sm:$0xff] }
 0x2ff   : > { %v6727_v11 = vpop.f32.mrb[70].mxu0  ;;  %7091 = vmatmul.mubr.bf16.gmra.mrb[156].mxu1 %v6269_v43  ;;  %v6726_v18 = vadd.f32 %v6725_v3, %v6724_v0  ;;  %v9513_v15 = vsel %vm7953_vm10, %v5031_v44, %v5032_v53  ;;  %v6272_v0 = vcombine.low %v4995_v23, %v4998_v21  ;;  %v6258_v59 = vrot.slane %v4886_v45, 9  ;;  %v4887_v21 = vld [vmem:[#allocation2 + $0xb4] sm:$0xe] }
 0x300   : > { %v6728_v7 = vpop.f32.mrb[71].mxu0  ;;  %7094 = vmatprep.mubr.bf16.mxu1 %v6270_v28  ;;  %v6271_v28 = vcombine.low %v4988_v61, %v4991_v46  ;;  %v6277_v56 = vcombine.low %v9509_v6, %v9513_v15  ;;  %v7432_v61 = vld [vmem:[#allocation2 + $0xa4] sm:$0x1]  ;;  %v5010_v9 = vrot.slane %v5008_v60, 4  ;;  %v5002_v58 = vsel %vm7953_vm10, %v6257_v19, %v5001_v54 }
 0x301   : > { %v6618_v1 = vpop.f32.mrb[72].mxu1  ;;  %v6729_v43 = vadd.f32 %v6728_v7, %v6727_v11  ;;  %v9517_v8 = vadd.f32 %v6726_v18, %v6614_v57  ;;  %v5004_v14 = vrot.slane %v7432_v61, 5  ;;  %v9925_v11 = vld [vmem:[#allocation25_spill] sm:$0xff]  ;;  %v5015_v51 = vrot.slane %v9926_v10, 5 }
 0x302   : > { %v6619_v27 = vpop.f32.mrb[73].mxu1  ;;  %v5011_v22 = vrot.slane %v9925_v11, 5  ;;  %v5009_v44 = vsel %vm7953_vm10, %v6258_v59, %v5008_v60 }
 0x303   : > { %v6620_v24 = vadd.f32 %v6619_v27, %v6618_v1  ;;  %v6621_v2 = vpop.f32.mrb[74].mxu1  ;;  %v9519_v42 = vadd.f32 %v6729_v43, %v6617_v62  ;;  %v5005_v23 = vsel %vm7953_vm10, %v5003_v16, %v5004_v14  ;;  %v7405_v1 = vld [vmem:[#allocation9 + $0x28] sm:$0xff]   ;;  %v5017_v45 = vrot.slane %v5015_v51, 4 }
 0x304   : > { %v6622_v49 = vpop.f32.mrb[75].mxu1  ;;  %v5012_v57 = vsel %vm7953_vm10, %v5010_v9, %v5011_v22  ;;  %7120 = vmatprep.subr.bf16.mxu0 %v7405_v1  ;;  %v6273_v43 = vcombine.low %v5002_v58, %v5005_v23 }
 0x305   : > { %v6730_v38 = vpop.f32.mrb[72].mxu0  ;;  %v6623_v25 = vadd.f32 %v6622_v49, %v6621_v2  ;;  %7121 = vmatpush3.bf16.msra.mxu0 %v7405_v1  ;;  %v6274_v19 = vcombine.low %v5009_v44, %v5012_v57 }
 0x306   : > { %v6731_v34 = vpop.f32.mrb[73].mxu0 }
 0x307   : > { %v6732_v3 = vadd.f32 %v6731_v34, %v6730_v38  ;;  %v6733_v46 = vpop.f32.mrb[74].mxu0  ;;  %7095 = vmatmul.mubr.bf16.gmra.mrb[160].mxu1 %v6271_v28  ;;  %v9927_v38 = vld [vmem:[#allocation32_spill] sm:$0xff] }
 0x308   : > { %v6734_v41 = vpop.f32.mrb[75].mxu0  ;;  %7098 = vmatprep.mubr.bf16.mxu1 %v6272_v0  ;;  %v5018_v49 = vrot.slane %v9927_v38, 5 }
 0x309   : > { %v9522_v4 = vadd.f32 %v6732_v3, %v6620_v24  ;;  %v6735_v7 = vadd.f32 %v6734_v41, %v6733_v46  ;;  %v6624_v12 = vpop.f32.mrb[76].mxu1  ;;  %v6259_v24 = vrot.slane %v4887_v21, 9 }
 0x30a   : > { %v6625_v53 = vpop.f32.mrb[77].mxu1  ;;  %v5019_v3 = vsel %vm7953_vm10, %v5017_v45, %v5018_v49 }
 0x30b   : > { %v9529_v36 = vadd.f32 %v6735_v7, %v6623_v25  ;;  %v6626_v27 = vadd.f32 %v6625_v53, %v6624_v12  ;;  %v6627_v18 = vpop.f32.mrb[78].mxu1  ;;  %v5016_v14 = vsel %vm7953_vm10, %v6259_v24, %v5015_v51  ;;  %v9928_v12 = vld [vmem:[#allocation22_spill] sm:$0xff]  ;;  %v9929_v51 = vld [vmem:[#allocation23_spill] sm:$0xff] }
 0x30c   : > { %v6628_v54 = vpop.f32.mrb[79].mxu1  ;;  %v6275_v7 = vcombine.low %v5016_v14, %v5019_v3 }
 0x30d   : > { %v6736_v62 = vpop.f32.mrb[76].mxu0  ;;  %v6629_v28 = vadd.f32 %v6628_v54, %v6627_v18 }
 0x30e   : > { %v6737_v2 = vpop.f32.mrb[77].mxu0 }
 0x30f   : > { %v6738_v34 = vadd.f32 %v6737_v2, %v6736_v62  ;;  %v6739_v25 = vpop.f32.mrb[78].mxu0  ;;  %7099 = vmatmul.mubr.bf16.gmra.mrb[164].mxu1 %v6273_v43  ;;  %v9930_v2 = vld [vmem:[#allocation29_spill] sm:$0xff] }
 0x310   : > { %v6740_v60 = vpop.f32.mrb[79].mxu0  ;;  %7102 = vmatprep.mubr.bf16.mxu1 %v6274_v19 }
 0x311   : > { %v9536_v0 = vadd.f32 %v6738_v34, %v6626_v27  ;;  %v6741_v16 = vadd.f32 %v6740_v60, %v6739_v25  ;;  %v6758_v61 = vpop.f32.mrb[80].mxu1  ;;  %v7406_v34 = vld [vmem:[#allocation9 + $0x30] sm:$0xff]  }
 0x312   : > { %v6759_v59 = vpop.f32.mrb[81].mxu1  ;;  %7122 = vmatprep.subr.bf16.mxu0 %v7406_v34 }
 0x313   : > { %v9542_v46 = vadd.f32 %v6741_v16, %v6629_v28  ;;  %v6760_v9 = vadd.f32 %v6759_v59, %v6758_v61  ;;  %v6761_v11 = vpop.f32.mrb[82].mxu1  ;;  %7123 = vmatpush3.bf16.msra.mxu0 %v7406_v34 }
 0x314   : > { %v6762_v41 = vpop.f32.mrb[83].mxu1 }
 0x315   : > { %v6870_v22 = vpop.f32.mrb[80].mxu0  ;;  %v9545_v58 = vadd.f32 %v6760_v9, %v9928_v12  ;;  %v6763_v21 = vadd.f32 %v6762_v41, %v6761_v11  ;;  %v9932_v41 = vld [vmem:[#allocation33_spill] sm:$0xff] }
 0x316   : > { %v6871_v23 = vpop.f32.mrb[81].mxu0 }
 0x317   : > { %v9547_v10 = vadd.f32 %v6871_v23, %v6870_v22  ;;  %v6873_v53 = vpop.f32.mrb[82].mxu0  ;;  %7103 = vmatmul.mubr.bf16.gmra.mrb[168].mxu1 %v6275_v7  ;;  %v9550_v32 = vadd.f32 %v6763_v21, %v9929_v51  ;;  %v9933_v7 = vld [vmem:[#allocation34_spill] sm:$0xff] }
 0x318   : > { %v6874_v1 = vpop.f32.mrb[83].mxu0  ;;  %7106 = vmatprep.mubr.bf16.mxu1 %v6276_v5 }
 0x319   : > { %v9555_v44 = vadd.f32 %v6874_v1, %v6873_v53 }
 0x31a   : > { %v6764_v57 = vpop.f32.mrb[84].mxu1 }
 0x31b   : > { %v6765_v27 = vpop.f32.mrb[85].mxu1 }
 0x31c   : > { %v6766_v18 = vadd.f32 %v6765_v27, %v6764_v57  ;;  %v6767_v54 = vpop.f32.mrb[86].mxu1 }
 0x31d   : > { %v6876_v62 = vpop.f32.mrb[84].mxu0  ;;  %v6768_v24 = vpop.f32.mrb[87].mxu1 }
 0x31e   : > { %v6877_v43 = vpop.f32.mrb[85].mxu0  ;;  %v3930_v28 = vadd.f32 %v6766_v18, %v9930_v2  ;;  %v6769_v45 = vadd.f32 %v6768_v24, %v6767_v54  ;;  %v9934_v24 = vld [vmem:[#allocation37_spill] sm:$0xff] }
 0x31f   : > { %v6878_v19 = vadd.f32 %v6877_v43, %v6876_v62  ;;  %v6879_v38 = vpop.f32.mrb[86].mxu0  ;;  %7107 = vmatmul.mubr.bf16.gmra.mrb[172].mxu1 %v6277_v56 }
 0x320   : > { %v6880_v26 = vpop.f32.mrb[87].mxu0  ;;  %v3931_v5 = vadd.f32 %v6769_v45, %v9931_v17 }
 0x321   : > { %v6881_v49 = vadd.f32 %v6880_v26, %v6879_v38  ;;  %v9935_v38 = vld [vmem:[#allocation38_spill] sm:$0xff] }
 0x324   : > { %v6770_v25 = vpop.f32.mrb[88].mxu1 }
 0x325   : > { %v6882_v60 = vpop.f32.mrb[88].mxu0  ;;  %v6771_v16 = vpop.f32.mrb[89].mxu1 }
 0x326   : > { %v6883_v61 = vpop.f32.mrb[89].mxu0  ;;  %v6772_v14 = vadd.f32 %v6771_v16, %v6770_v25  ;;  %v6773_v3 = vpop.f32.mrb[90].mxu1  ;;  %v7407_v16 = vld [vmem:[#allocation9 + $0x38] sm:$0xff]  }
 0x327   : > { %v6884_v59 = vadd.f32 %v6883_v61, %v6882_v60  ;;  %v6885_v9 = vpop.f32.mrb[90].mxu0  ;;  %v6774_v11 = vpop.f32.mrb[91].mxu1  ;;  %v9566_v61 = vadd.f32 %v6878_v19, %v3930_v28  ;;  %7124 = vmatprep.subr.bf16.mxu0 %v7407_v16  ;;  %v9574_v28 = vadd.f32 %v6881_v49, %v3931_v5 }
 0x328   : > { %v6886_v22 = vpop.f32.mrb[91].mxu0  ;;  %v3932_v6 = vadd.f32 %v6772_v14, %v9932_v41  ;;  %v6775_v15 = vadd.f32 %v6774_v11, %v6773_v3  ;;  %7125 = vmatpush3.bf16.msra.mxu0 %v7407_v16 }
 0x329   : > { %v6887_v56 = vadd.f32 %v6886_v22, %v6885_v9 }
 0x32a   : > { %v3933_v12 = vadd.f32 %v6775_v15, %v9933_v7  ;;  %v9936_v7 = vld [vmem:[#allocation18_spill] sm:$0xff]  ;;  %v9583_v49 = vadd.f32 %v6884_v59, %v3932_v6 }
 0x32d   : > { %v6888_v23 = vpop.f32.mrb[92].mxu0 }
 0x32e   : > { %v6889_v21 = vpop.f32.mrb[93].mxu0  ;;  %v6776_v53 = vpop.f32.mrb[92].mxu1 }
 0x32f   : > { %v6890_v51 = vadd.f32 %v6889_v21, %v6888_v23  ;;  %v6891_v1 = vpop.f32.mrb[94].mxu0  ;;  %v6777_v57 = vpop.f32.mrb[93].mxu1 }
 0x330   : > { %v6892_v27 = vpop.f32.mrb[95].mxu0  ;;  %v6778_v18 = vadd.f32 %v6777_v57, %v6776_v53  ;;  %v6779_v62 = vpop.f32.mrb[94].mxu1  ;;  %v9937_v53 = vld [vmem:[#allocation19_spill] sm:$0xff]  ;;  %v9572_v57 = vadd.f32 %v9547_v10, %v9545_v58 }
 0x331   : > { %v6893_v54 = vadd.f32 %v6892_v27, %v6891_v1  ;;  %v6780_v43 = vpop.f32.mrb[95].mxu1 }
 0x332   : > { %v3934_v2 = vadd.f32 %v6778_v18, %v9934_v24  ;;  %v6781_v45 = vadd.f32 %v6780_v43, %v6779_v62  ;;  %v9578_v24 = vadd.f32 %v9555_v44, %v9550_v32 }
 0x334   : > { %v3935_v26 = vadd.f32 %v6781_v45, %v9935_v38  ;;  %v9580_v45 = vadd.f32 %v6890_v51, %v3934_v2 }
 0x336   : > { %v6894_v17 = vpop.f32.mrb[96].mxu0 }
 0x337   : > { %v6895_v34 = vpop.f32.mrb[97].mxu0 }
 0x338   : > { %v6896_v25 = vadd.f32 %v6895_v34, %v6894_v17  ;;  %v6897_v60 = vpop.f32.mrb[98].mxu0 }
 0x339   : > { %v6782_v14 = vpop.f32.mrb[96].mxu1  ;;  %v6898_v3 = vpop.f32.mrb[99].mxu0 }
 0x33a   : > { %v6783_v9 = vpop.f32.mrb[97].mxu1  ;;  %v6899_v11 = vadd.f32 %v6898_v3, %v6897_v60 }
 0x33b   : > { %v6784_v22 = vadd.f32 %v6783_v9, %v6782_v14  ;;  %v6785_v41 = vpop.f32.mrb[98].mxu1  ;;  %v9585_v14 = vadd.f32 %v6893_v54, %v3935_v26  ;;  %v9588_v9 = vadd.f32 %v6887_v56, %v3933_v12 }
 0x33c   : > { %v6786_v15 = vpop.f32.mrb[99].mxu1 }
 0x33d   : > { %v3936_v23 = vadd.f32 %v6784_v22, %v9936_v7  ;;  %v6787_v21 = vadd.f32 %v6786_v15, %v6785_v41 }
 0x33f   : > { %v3937_v1 = vadd.f32 %v6787_v21, %v9937_v53 }
 0x341   : > { %v6900_v19 = vpop.f32.mrb[100].mxu0 }
 0x342   : > { %v6901_v27 = vpop.f32.mrb[101].mxu0 }
 0x343   : > { %v6788_v18 = vpop.f32.mrb[100].mxu1  ;;  %v6902_v62 = vadd.f32 %v6901_v27, %v6900_v19  ;;  %v6903_v43 = vpop.f32.mrb[102].mxu0 }
 0x344   : > { %v6789_v38 = vpop.f32.mrb[101].mxu1  ;;  %v6904_v17 = vpop.f32.mrb[103].mxu0 }
 0x345   : > { %v6790_v34 = vadd.f32 %v6789_v38, %v6788_v18  ;;  %v6791_v60 = vpop.f32.mrb[102].mxu1  ;;  %v6905_v16 = vadd.f32 %v6904_v17, %v6903_v43 }
 0x346   : > { %v6792_v58 = vpop.f32.mrb[103].mxu1 }
 0x347   : > { %v3938_v10 = vadd.f32 %v6790_v34, %v9324_v63  ;;  %v6793_v5 = vadd.f32 %v6792_v58, %v6791_v60  ;;  %v9592_v63 = vadd.f32 %v6896_v25, %v3936_v23 }
 0x349   : > { %v3939_v3 = vadd.f32 %v6793_v5, %v9336_v40  ;;  %v9590_v32 = vadd.f32 %v6902_v62, %v3938_v10  ;;  %v9596_v40 = vadd.f32 %v6899_v11, %v3937_v1 }
 0x34b   : > { %v6906_v44 = vpop.f32.mrb[104].mxu0  ;;  %v9594_v54 = vadd.f32 %v6905_v16, %v3939_v3 }
 0x34c   : > { %v6907_v51 = vpop.f32.mrb[105].mxu0 }
 0x34d   : > { %v6908_v2 = vadd.f32 %v6907_v51, %v6906_v44  ;;  %v6909_v22 = vpop.f32.mrb[106].mxu0 }
 0x34e   : > { %v6794_v41 = vpop.f32.mrb[104].mxu1  ;;  %v6910_v15 = vpop.f32.mrb[107].mxu0 }
 0x34f   : > { %v6795_v7 = vpop.f32.mrb[105].mxu1  ;;  %v6911_v21 = vadd.f32 %v6910_v15, %v6909_v22 }
 0x350   : > { %v6796_v59 = vadd.f32 %v6795_v7, %v6794_v41  ;;  %v6797_v6 = vpop.f32.mrb[106].mxu1 }
 0x351   : > { %v6798_v26 = vpop.f32.mrb[107].mxu1 }
 0x352   : > { %v3940_v56 = vadd.f32 %v6796_v59, %v9356_v33  ;;  %v6799_v12 = vadd.f32 %v6798_v26, %v6797_v6 }
 0x354   : > { %v3941_v53 = vadd.f32 %v6799_v12, %v9362_v30  ;;  %v9600_v18 = vadd.f32 %v6908_v2, %v3940_v56 }
 0x356   : > { %v6912_v19 = vpop.f32.mrb[108].mxu0  ;;  %v9602_v17 = vadd.f32 %v6911_v21, %v3941_v53 }
 0x357   : > { %v6913_v27 = vpop.f32.mrb[109].mxu0 }
 0x358   : > { %v6800_v62 = vpop.f32.mrb[108].mxu1  ;;  %v6914_v43 = vadd.f32 %v6913_v27, %v6912_v19  ;;  %v6915_v25 = vpop.f32.mrb[110].mxu0 }
 0x359   : > { %v6801_v23 = vpop.f32.mrb[109].mxu1  ;;  %v6916_v38 = vpop.f32.mrb[111].mxu0 }
 0x35a   : > { %v6802_v34 = vadd.f32 %v6801_v23, %v6800_v62  ;;  %v6803_v60 = vpop.f32.mrb[110].mxu1  ;;  %v6917_v11 = vadd.f32 %v6916_v38, %v6915_v25 }
 0x35b   : > { %v6804_v1 = vpop.f32.mrb[111].mxu1 }
 0x35c   : > { %v3942_v33 = vadd.f32 %v6802_v34, %v9376_v20  ;;  %v6805_v16 = vadd.f32 %v6804_v1, %v6803_v60 }
 0x35e   : > { %v3943_v30 = vadd.f32 %v6805_v16, %v9378_v50  ;;  %v9606_v58 = vadd.f32 %v6914_v43, %v3942_v33 }
 0x360   : > { %v6918_v10 = vpop.f32.mrb[112].mxu0  ;;  %v9608_v5 = vadd.f32 %v6917_v11, %v3943_v30 }
 0x361   : > { %v6919_v3 = vpop.f32.mrb[113].mxu0 }
 0x362   : > { %v6920_v44 = vadd.f32 %v6919_v3, %v6918_v10  ;;  %v6921_v51 = vpop.f32.mrb[114].mxu0 }
 0x363   : > { %v6806_v2 = vpop.f32.mrb[112].mxu1  ;;  %v6922_v22 = vpop.f32.mrb[115].mxu0 }
 0x364   : > { %v6807_v41 = vpop.f32.mrb[113].mxu1  ;;  %v6923_v15 = vadd.f32 %v6922_v22, %v6921_v51 }
 0x365   : > { %v6808_v7 = vadd.f32 %v6807_v41, %v6806_v2  ;;  %v6809_v21 = vpop.f32.mrb[114].mxu1 }
 0x366   : > { %v6810_v59 = vpop.f32.mrb[115].mxu1 }
 0x367   : > { %v3944_v20 = vadd.f32 %v6808_v7, %v9402_v31  ;;  %v6811_v6 = vadd.f32 %v6810_v59, %v6809_v21 }
 0x369   : > { %v3945_v50 = vadd.f32 %v6811_v6, %v9408_v52  ;;  %v9612_v26 = vadd.f32 %v6920_v44, %v3944_v20 }
 0x36b   : > { %v6924_v56 = vpop.f32.mrb[116].mxu0  ;;  %v9614_v12 = vadd.f32 %v6923_v15, %v3945_v50 }
 0x36c   : > { %v6925_v53 = vpop.f32.mrb[117].mxu0 }
 0x36d   : > { %v6812_v19 = vpop.f32.mrb[116].mxu1  ;;  %v6926_v27 = vadd.f32 %v6925_v53, %v6924_v56  ;;  %v6927_v62 = vpop.f32.mrb[118].mxu0 }
 0x36e   : > { %v6813_v43 = vpop.f32.mrb[117].mxu1  ;;  %v6928_v25 = vpop.f32.mrb[119].mxu0 }
 0x36f   : > { %v6814_v23 = vadd.f32 %v6813_v43, %v6812_v19  ;;  %v6815_v38 = vpop.f32.mrb[118].mxu1  ;;  %v6929_v34 = vadd.f32 %v6928_v25, %v6927_v62 }
 0x370   : > { %v6816_v60 = vpop.f32.mrb[119].mxu1 }
 0x371   : > { %v3946_v31 = vadd.f32 %v6814_v23, %v9428_v13  ;;  %v6817_v11 = vadd.f32 %v6816_v60, %v6815_v38 }
 0x373   : > { %v3947_v52 = vadd.f32 %v6817_v11, %v9434_v29  ;;  %v9618_v1 = vadd.f32 %v6926_v27, %v3946_v31 }
 0x375   : > { %v6930_v33 = vpop.f32.mrb[120].mxu0  ;;  %v9620_v16 = vadd.f32 %v6929_v34, %v3947_v52 }
 0x376   : > { %v6931_v30 = vpop.f32.mrb[121].mxu0 }
 0x377   : > { %v6932_v10 = vadd.f32 %v6931_v30, %v6930_v33  ;;  %v6933_v3 = vpop.f32.mrb[122].mxu0 }
 0x378   : > { %v6818_v44 = vpop.f32.mrb[120].mxu1  ;;  %v6934_v51 = vpop.f32.mrb[123].mxu0 }
 0x379   : > { %v6819_v2 = vpop.f32.mrb[121].mxu1  ;;  %v6935_v22 = vadd.f32 %v6934_v51, %v6933_v3 }
 0x37a   : > { %v6820_v41 = vadd.f32 %v6819_v2, %v6818_v44  ;;  %v6821_v15 = vpop.f32.mrb[122].mxu1 }
 0x37b   : > { %v6822_v7 = vpop.f32.mrb[123].mxu1 }
 0x37c   : > { %v3948_v13 = vadd.f32 %v6820_v41, %v9452_v37  ;;  %v6823_v21 = vadd.f32 %v6822_v7, %v6821_v15 }
 0x37e   : > { %v3949_v29 = vadd.f32 %v6823_v21, %v9456_v39  ;;  %v9624_v59 = vadd.f32 %v6932_v10, %v3948_v13 }
 0x380   : > { %v6936_v20 = vpop.f32.mrb[124].mxu0  ;;  %v9626_v6 = vadd.f32 %v6935_v22, %v3949_v29 }
 0x381   : > { %v6937_v50 = vpop.f32.mrb[125].mxu0 }
 0x382   : > { %v6938_v56 = vadd.f32 %v6937_v50, %v6936_v20  ;;  %v6939_v53 = vpop.f32.mrb[126].mxu0 }
 0x383   : > { %v6940_v19 = vpop.f32.mrb[127].mxu0 }
 0x384   : > { %v6824_v27 = vpop.f32.mrb[124].mxu1  ;;  %v6941_v62 = vadd.f32 %v6940_v19, %v6939_v53 }
 0x385   : > { %v6825_v43 = vpop.f32.mrb[125].mxu1 }
 0x386   : > { %v6826_v25 = vadd.f32 %v6825_v43, %v6824_v27  ;;  %v6827_v23 = vpop.f32.mrb[126].mxu1 }
 0x387   : > { %v6828_v38 = vpop.f32.mrb[127].mxu1 }
 0x388   : > { %v3950_v37 = vadd.f32 %v6826_v25, %v9472_v35  ;;  %v6829_v34 = vadd.f32 %v6828_v38, %v6827_v23 }
 0x38a   : > { %v3951_v39 = vadd.f32 %v6829_v34, %v9474_v48  ;;  %v9630_v60 = vadd.f32 %v6938_v56, %v3950_v37 }
 0x38c   : > { %v6942_v31 = vpop.f32.mrb[128].mxu0  ;;  %v9632_v11 = vadd.f32 %v6941_v62, %v3951_v39 }
 0x38d   : > { %v6943_v52 = vpop.f32.mrb[129].mxu0 }
 0x38e   : > { %v6944_v33 = vadd.f32 %v6943_v52, %v6942_v31  ;;  %v6945_v30 = vpop.f32.mrb[130].mxu0 }
 0x38f   : > { %v6946_v10 = vpop.f32.mrb[131].mxu0 }
 0x390   : > { %v6830_v3 = vpop.f32.mrb[128].mxu1  ;;  %v6947_v44 = vadd.f32 %v6946_v10, %v6945_v30 }
 0x391   : > { %v6831_v51 = vpop.f32.mrb[129].mxu1 }
 0x392   : > { %v6832_v2 = vadd.f32 %v6831_v51, %v6830_v3  ;;  %v6833_v22 = vpop.f32.mrb[130].mxu1 }
 0x393   : > { %v6834_v41 = vpop.f32.mrb[131].mxu1 }
 0x394   : > { %v3952_v35 = vadd.f32 %v6832_v2, %v9494_v47  ;;  %v6835_v15 = vadd.f32 %v6834_v41, %v6833_v22 }
 0x396   : > { %v3953_v48 = vadd.f32 %v6835_v15, %v9502_v55  ;;  %v9636_v7 = vadd.f32 %v6944_v33, %v3952_v35 }
 0x398   : > { %v6948_v13 = vpop.f32.mrb[132].mxu0  ;;  %v9638_v21 = vadd.f32 %v6947_v44, %v3953_v48 }
 0x399   : > { %v6949_v29 = vpop.f32.mrb[133].mxu0 }
 0x39a   : > { %v6950_v20 = vadd.f32 %v6949_v29, %v6948_v13  ;;  %v6951_v50 = vpop.f32.mrb[134].mxu0 }
 0x39b   : > { %v6952_v56 = vpop.f32.mrb[135].mxu0 }
 0x39c   : > { %v6836_v53 = vpop.f32.mrb[132].mxu1  ;;  %v6953_v19 = vadd.f32 %v6952_v56, %v6951_v50 }
 0x39d   : > { %v6837_v27 = vpop.f32.mrb[133].mxu1 }
 0x39e   : > { %v6838_v62 = vadd.f32 %v6837_v27, %v6836_v53  ;;  %v6839_v43 = vpop.f32.mrb[134].mxu1 }
 0x39f   : > { %v6840_v25 = vpop.f32.mrb[135].mxu1 }
 0x3a0   : > { %v3954_v47 = vadd.f32 %v6838_v62, %v9517_v8  ;;  %v6841_v23 = vadd.f32 %v6840_v25, %v6839_v43 }
 0x3a2   : > { %v3955_v55 = vadd.f32 %v6841_v23, %v9519_v42  ;;  %v9642_v38 = vadd.f32 %v6950_v20, %v3954_v47  ;;  %v9659_v23 = vld [vmem:[%s9840_s5] ss:$0 sm:$0xff] }
 0x3a4   : > { %v6954_v37 = vpop.f32.mrb[136].mxu0  ;;  %v9644_v34 = vadd.f32 %v6953_v19, %v3955_v55 }
 0x3a5   : > { %v6955_v39 = vpop.f32.mrb[137].mxu0 }
 0x3a6   : > { %v6956_v31 = vadd.f32 %v6955_v39, %v6954_v37  ;;  %v6957_v52 = vpop.f32.mrb[138].mxu0 }
 0x3a7   : > { %v6958_v33 = vpop.f32.mrb[139].mxu0 }
 0x3a8   : > { %v6842_v30 = vpop.f32.mrb[136].mxu1  ;;  %v6959_v10 = vadd.f32 %v6958_v33, %v6957_v52 }
 0x3a9   : > { %v6843_v3 = vpop.f32.mrb[137].mxu1 }
 0x3aa   : > { %v6844_v44 = vadd.f32 %v6843_v3, %v6842_v30  ;;  %v6845_v51 = vpop.f32.mrb[138].mxu1 }
 0x3ab   : > { %v6846_v2 = vpop.f32.mrb[139].mxu1 }
 0x3ac   : > { %v3956_v8 = vadd.f32 %v6844_v44, %v9522_v4  ;;  %v6847_v22 = vadd.f32 %v6846_v2, %v6845_v51 }
 0x3ae   : > { %v3957_v42 = vadd.f32 %v6847_v22, %v9529_v36  ;;  %v9648_v41 = vadd.f32 %v6956_v31, %v3956_v8 }
 0x3b0   : > { %v9650_v35 = vadd.f32 %v6959_v10, %v3957_v42 }
 0x3b2   : > { %v6848_v15 = vpop.f32.mrb[140].mxu1 }
 0x3b3   : > { %v6849_v48 = vpop.f32.mrb[141].mxu1 }
 0x3b4   : > { %v6850_v13 = vadd.f32 %v6849_v48, %v6848_v15  ;;  %v6851_v29 = vpop.f32.mrb[142].mxu1 }
 0x3b5   : > { %v6960_v20 = vpop.f32.mrb[140].mxu0  ;;  %v6852_v50 = vpop.f32.mrb[143].mxu1 }
 0x3b6   : > { %v6961_v56 = vpop.f32.mrb[141].mxu0  ;;  %v3958_v53 = vadd.f32 %v6850_v13, %v9536_v0  ;;  %v6853_v19 = vadd.f32 %v6852_v50, %v6851_v29 }
 0x3b7   : > { %v6962_v27 = vadd.f32 %v6961_v56, %v6960_v20  ;;  %v6963_v62 = vpop.f32.mrb[142].mxu0 }
 0x3b8   : > { %v6964_v4 = vpop.f32.mrb[143].mxu0  ;;  %v3959_v43 = vadd.f32 %v6853_v19, %v9542_v46 }
 0x3b9   : > { %v6965_v36 = vadd.f32 %v6964_v4, %v6963_v62  ;;  %v9654_v25 = vadd.f32 %v6962_v27, %v3958_v53 }
 0x3ba   : > { %v7080_v47 = vpop.f32.mrb[144].mxu1 }
 0x3bb   : > { %v9661_v55 = vadd.f32 %v6965_v36, %v3959_v43  ;;  %v5325_v37 = vadd.f32 %v7080_v47, %v9566_v61  ;;  %v5196_v0 = vpop.f32.mrb[145].mxu1 }
 0x3bc   : > { %v5323_v39 = vadd.f32 %v5196_v0, %v9572_v57  ;;  %v7081_v31 = vpop.f32.mrb[146].mxu1 }
 0x3bd   : > { %v5364_v52 = vadd.f32 %v9659_v23, %v5325_v37  ;;  %v5326_v46 = vadd.f32 %v7081_v31, %v9574_v28  ;;  %v5199_v33 = vpop.f32.mrb[147].mxu1 }
 0x3be   : > { %v5362_v30 = vadd.f32 %v9659_v23, %v5323_v39  ;;  %v5324_v10 = vadd.f32 %v5199_v33, %v9578_v24 }
 0x3bf   : > { %v5365_v3 = vadd.f32 %v9659_v23, %v5326_v46  ;;  %v5396_v51 = vmax.f32 %v5364_v52, 0.0 }
 0x3c0   : > { %v5363_v44 = vadd.f32 %v9659_v23, %v5324_v10  ;;  %v5394_v61 = vmax.f32 %v5362_v30, 0.0 }
 0x3c1   : > { %v5397_v2 = vmax.f32 %v5365_v3, 0.0 }
 0x3c2   : > { %v5395_v8 = vmax.f32 %v5363_v44, 0.0  ;;  %v7084_v22 = vpop.f32.mrb[148].mxu1 }
 0x3c3   : > { %v5427_v57 = vpack.c.bf16 %v5397_v2, %v5396_v51  ;;  %v5329_v42 = vadd.f32 %v7084_v22, %v9580_v45  ;;  %v5212_v15 = vpop.f32.mrb[149].mxu1 }
 0x3c4   : > { %v5327_v28 = vadd.f32 %v5212_v15, %v9583_v49  ;;  %v7085_v48 = vpop.f32.mrb[150].mxu1  ;;  %v5426_v13 = vpack.c.bf16 %v5395_v8, %v5394_v61 }
 0x3c5   : > { %v5368_v29 = vadd.f32 %v9659_v23, %v5329_v42  ;;  %v5330_v24 = vadd.f32 %v7085_v48, %v9585_v14  ;;  %v5215_v20 = vpop.f32.mrb[151].mxu1 }
 0x3c6   : > { %v5366_v50 = vadd.f32 %v9659_v23, %v5327_v28  ;;  %v5328_v56 = vadd.f32 %v5215_v20, %v9588_v9  ;;  %7126 = vmatprep.mubr.bf16.mxu0 %v5426_v13 }
 0x3c7   : > { %v5369_v53 = vadd.f32 %v9659_v23, %v5330_v24  ;;  %7127 = vmatmul.mubr.bf16.vlgmr.msra.gmra.mrb[144].mxu0 %v5427_v57  ;;  %v5400_v19 = vmax.f32 %v5368_v29, 0.0 }
 0x3c8   : > { %v5367_v45 = vadd.f32 %v9659_v23, %v5328_v56  ;;  %v5398_v49 = vmax.f32 %v5366_v50, 0.0 }
 0x3c9   : > { %v5401_v27 = vmax.f32 %v5369_v53, 0.0 }
 0x3ca   : > { %v5399_v62 = vmax.f32 %v5367_v45, 0.0  ;;  %v7088_v4 = vpop.f32.mrb[152].mxu1 }
 0x3cb   : > { %v5333_v43 = vadd.f32 %v7088_v4, %v9590_v32  ;;  %v5228_v36 = vpop.f32.mrb[153].mxu1  ;;  %v5429_v14 = vpack.c.bf16 %v5401_v27, %v5400_v19 }
 0x3cc   : > { %v5331_v47 = vadd.f32 %v5228_v36, %v9592_v63  ;;  %v7089_v37 = vpop.f32.mrb[154].mxu1  ;;  %v5428_v0 = vpack.c.bf16 %v5399_v62, %v5398_v49 }
 0x3cd   : > { %v5372_v9 = vadd.f32 %v9659_v23, %v5333_v43  ;;  %v5334_v39 = vadd.f32 %v7089_v37, %v9594_v54  ;;  %v5231_v31 = vpop.f32.mrb[155].mxu1 }
 0x3ce   : > { %v5370_v52 = vadd.f32 %v9659_v23, %v5331_v47  ;;  %v5332_v46 = vadd.f32 %v5231_v31, %v9596_v40  ;;  %7130 = vmatprep.mubr.bf16.mxu0 %v5428_v0 }
 0x3cf   : > { %v5373_v33 = vadd.f32 %v9659_v23, %v5334_v39  ;;  %7131 = vmatmul.mubr.bf16.gmra.mrb[148].mxu0 %v5429_v14  ;;  %v5404_v30 = vmax.f32 %v5372_v9, 0.0 }
 0x3d0   : > { %v5371_v32 = vadd.f32 %v9659_v23, %v5332_v46  ;;  %v5402_v63 = vmax.f32 %v5370_v52, 0.0 }
 0x3d1   : > { %v5405_v10 = vmax.f32 %v5373_v33, 0.0 }
 0x3d2   : > { %v5403_v3 = vmax.f32 %v5371_v32, 0.0  ;;  %v7092_v44 = vpop.f32.mrb[156].mxu1 }
 0x3d3   : > { %v5337_v51 = vadd.f32 %v7092_v44, %v9606_v58  ;;  %v5244_v2 = vpop.f32.mrb[157].mxu1  ;;  %v5431_v54 = vpack.c.bf16 %v5405_v10, %v5404_v30 }
 0x3d4   : > { %v5335_v61 = vadd.f32 %v5244_v2, %v9600_v18  ;;  %v7093_v8 = vpop.f32.mrb[158].mxu1  ;;  %v5430_v22 = vpack.c.bf16 %v5403_v3, %v5402_v63 }
 0x3d5   : > { %v5376_v40 = vadd.f32 %v9659_v23, %v5337_v51  ;;  %v5338_v57 = vadd.f32 %v7093_v8, %v9608_v5  ;;  %v5247_v42 = vpop.f32.mrb[159].mxu1 }
 0x3d6   : > { %v5374_v15 = vadd.f32 %v9659_v23, %v5335_v61  ;;  %v5336_v28 = vadd.f32 %v5247_v42, %v9602_v17  ;;  %7134 = vmatprep.mubr.bf16.mxu0 %v5430_v22 }
 0x3d7   : > { %v5377_v48 = vadd.f32 %v9659_v23, %v5338_v57  ;;  %7135 = vmatmul.mubr.bf16.gmra.mrb[152].mxu0 %v5431_v54  ;;  %v5408_v13 = vmax.f32 %v5376_v40, 0.0 }
 0x3d8   : > { %v5375_v58 = vadd.f32 %v9659_v23, %v5336_v28  ;;  %v5406_v18 = vmax.f32 %v5374_v15, 0.0 }
 0x3d9   : > { %v5409_v29 = vmax.f32 %v5377_v48, 0.0 }
 0x3da   : > { %v5407_v24 = vmax.f32 %v5375_v58, 0.0  ;;  %v7096_v20 = vpop.f32.mrb[160].mxu1 }
 0x3db   : > { %v5341_v50 = vadd.f32 %v7096_v20, %v9618_v1  ;;  %v5260_v56 = vpop.f32.mrb[161].mxu1  ;;  %v5433_v5 = vpack.c.bf16 %v5409_v29, %v5408_v13 }
 0x3dc   : > { %v5339_v53 = vadd.f32 %v5260_v56, %v9612_v26  ;;  %v7097_v45 = vpop.f32.mrb[162].mxu1  ;;  %v5432_v19 = vpack.c.bf16 %v5407_v24, %v5406_v18 }
 0x3dd   : > { %v5380_v17 = vadd.f32 %v9659_v23, %v5341_v50  ;;  %v5342_v27 = vadd.f32 %v7097_v45, %v9620_v16  ;;  %v5263_v49 = vpop.f32.mrb[163].mxu1 }
 0x3de   : > { %v5378_v62 = vadd.f32 %v9659_v23, %v5339_v53  ;;  %v5340_v4 = vadd.f32 %v5263_v49, %v9614_v12  ;;  %7138 = vmatprep.mubr.bf16.mxu0 %v5432_v19 }
 0x3df   : > { %v5381_v43 = vadd.f32 %v9659_v23, %v5342_v27  ;;  %7139 = vmatmul.mubr.bf16.gmra.mrb[156].mxu0 %v5433_v5  ;;  %v5412_v36 = vmax.f32 %v5380_v17, 0.0 }
 0x3e0   : > { %v5379_v1 = vadd.f32 %v9659_v23, %v5340_v4  ;;  %v5410_v26 = vmax.f32 %v5378_v62, 0.0 }
 0x3e1   : > { %v5413_v14 = vmax.f32 %v5381_v43, 0.0 }
 0x3e2   : > { %v5411_v47 = vmax.f32 %v5379_v1, 0.0  ;;  %v7100_v37 = vpop.f32.mrb[164].mxu1 }
 0x3e3   : > { %v5345_v0 = vadd.f32 %v7100_v37, %v9630_v60  ;;  %v5276_v9 = vpop.f32.mrb[165].mxu1  ;;  %v5435_v16 = vpack.c.bf16 %v5413_v14, %v5412_v36 }
 0x3e4   : > { %v5343_v39 = vadd.f32 %v5276_v9, %v9624_v59  ;;  %v7101_v31 = vpop.f32.mrb[166].mxu1  ;;  %v5434_v52 = vpack.c.bf16 %v5411_v47, %v5410_v26 }
 0x3e5   : > { %v5384_v12 = vadd.f32 %v9659_v23, %v5345_v0  ;;  %v5346_v46 = vadd.f32 %v7101_v31, %v9632_v11  ;;  %v5279_v33 = vpop.f32.mrb[167].mxu1 }
 0x3e6   : > { %v5382_v32 = vadd.f32 %v9659_v23, %v5343_v39  ;;  %v5344_v30 = vadd.f32 %v5279_v33, %v9626_v6  ;;  %7142 = vmatprep.mubr.bf16.mxu0 %v5434_v52 }
 0x3e7   : > { %v5385_v10 = vadd.f32 %v9659_v23, %v5346_v46  ;;  %7143 = vmatmul.mubr.bf16.gmra.mrb[160].mxu0 %v5435_v16  ;;  %v5416_v63 = vmax.f32 %v5384_v12, 0.0 }
 0x3e8   : > { %v5383_v60 = vadd.f32 %v9659_v23, %v5344_v30  ;;  %v5414_v59 = vmax.f32 %v5382_v32, 0.0 }
 0x3e9   : > { %v5417_v3 = vmax.f32 %v5385_v10, 0.0 }
 0x3ea   : > { %v5415_v44 = vmax.f32 %v5383_v60, 0.0  ;;  %v7104_v51 = vpop.f32.mrb[168].mxu1 }
 0x3eb   : > { %v5349_v2 = vadd.f32 %v7104_v51, %v9642_v38  ;;  %v5292_v54 = vpop.f32.mrb[169].mxu1  ;;  %v5437_v11 = vpack.c.bf16 %v5417_v3, %v5416_v63 }
 0x3ec   : > { %v5347_v61 = vadd.f32 %v5292_v54, %v9636_v7  ;;  %v7105_v8 = vpop.f32.mrb[170].mxu1  ;;  %v5436_v22 = vpack.c.bf16 %v5415_v44, %v5414_v59 }
 0x3ed   : > { %v5388_v6 = vadd.f32 %v9659_v23, %v5349_v2  ;;  %v5350_v40 = vadd.f32 %v7105_v8, %v9644_v34  ;;  %v5295_v57 = vpop.f32.mrb[171].mxu1 }
 0x3ee   : > { %v5386_v42 = vadd.f32 %v9659_v23, %v5347_v61  ;;  %v5348_v15 = vadd.f32 %v5295_v57, %v9638_v21  ;;  %7146 = vmatprep.mubr.bf16.mxu0 %v5436_v22 }
 0x3ef   : > { %v5389_v28 = vadd.f32 %v9659_v23, %v5350_v40  ;;  %7147 = vmatmul.mubr.bf16.gmra.mrb[164].mxu0 %v5437_v11  ;;  %v5420_v48 = vmax.f32 %v5388_v6, 0.0 }
 0x3f0   : > { %v5387_v38 = vadd.f32 %v9659_v23, %v5348_v15  ;;  %v5418_v7 = vmax.f32 %v5386_v42, 0.0 }
 0x3f1   : > { %v5421_v58 = vmax.f32 %v5389_v28, 0.0 }
 0x3f2   : > { %v5419_v13 = vmax.f32 %v5387_v38, 0.0  ;;  %v7108_v29 = vpop.f32.mrb[172].mxu1 }
 0x3f3   : > { %v5353_v18 = vadd.f32 %v7108_v29, %v9654_v25  ;;  %v5308_v24 = vpop.f32.mrb[173].mxu1  ;;  %v5439_v34 = vpack.c.bf16 %v5421_v58, %v5420_v48 }
 0x3f4   : > { %v5351_v20 = vadd.f32 %v5308_v24, %v9648_v41  ;;  %v7109_v50 = vpop.f32.mrb[174].mxu1  ;;  %v5438_v56 = vpack.c.bf16 %v5419_v13, %v5418_v7 }
 0x3f5   : > { %v5392_v21 = vadd.f32 %v9659_v23, %v5353_v18  ;;  %v5354_v5 = vadd.f32 %v7109_v50, %v9661_v55  ;;  %v5311_v53 = vpop.f32.mrb[175].mxu1 }
 0x3f6   : > { %v5390_v45 = vadd.f32 %v9659_v23, %v5351_v20  ;;  %v5352_v19 = vadd.f32 %v5311_v53, %v9650_v35  ;;  %7150 = vmatprep.mubr.bf16.mxu0 %v5438_v56  ;;  %v9730_v35 = vld [vmem:[%s9841_s6] ss:$0 sm:$0xff] }
 0x3f7   : > { %v5393_v17 = vadd.f32 %v9659_v23, %v5354_v5  ;;  %7151 = vmatmul.mubr.bf16.gmra.mrb[168].mxu0 %v5439_v34  ;;  %v5424_v27 = vmax.f32 %v5392_v21, 0.0 }
 0x3f8   : > { %v5391_v25 = vadd.f32 %v9659_v23, %v5352_v19  ;;  %v5422_v41 = vmax.f32 %v5390_v45, 0.0 }
 0x3f9   : > { %v5425_v49 = vmax.f32 %v5393_v17, 0.0 }
 0x3fa   : > { %v5423_v62 = vmax.f32 %v5391_v25, 0.0 }
 0x3fb   : > { %v5441_v4 = vpack.c.bf16 %v5425_v49, %v5424_v27 }
 0x3fc   : > { %v5440_v43 = vpack.c.bf16 %v5423_v62, %v5422_v41 }
 0x3fe   : > { %7154 = vmatprep.mubr.bf16.mxu0 %v5440_v43 }
 0x3ff   : > { %7155 = vmatmul.mubr.bf16.gmra.mrb[172].mxu0 %v5441_v4 }
 0x49a   : > { %v7128_v55 = vpop.f32.mrb[144].mxu0 }
 0x49b   : > { %v5547_v1 = vpop.f32.mrb[145].mxu0  ;;  %v5556_v14 = vadd.f32 %v7128_v55, %v9730_v35 }
 0x49c   : > { %v7129_v36 = vpop.f32.mrb[146].mxu0  ;;  %v5548_v47 = vadd.f32 %v9730_v35, %v5547_v1 }
 0x49d   : > { %v5559_v23 = vadd.f32 %v7129_v36, %v9730_v35  ;;  %v5550_v26 = vpop.f32.mrb[147].mxu0 }
 0x49e   : > { %v5551_v37 = vadd.f32 %v9730_v35, %v5550_v26 }
 0x49f   : > { %v6407_v0 = vpack.c.bf16 %v5559_v23, %v5556_v14 }
 0x4a0   : > { %v6402_v9 = vpack.c.bf16 %v5551_v37, %v5548_v47 }
 0x4a1   : > { %6479 = vst [vmem:[%s9738_s21 + $0x8] sm:$0xff] %v6407_v0  }
 0x4a2   : > { %6403 = vst [vmem:[%s9738_s21] sm:$0xff] %v6402_v9   ;;  %v7132_v16 = vpop.f32.mrb[148].mxu0 }
 0x4a3   : > { %v5563_v39 = vpop.f32.mrb[149].mxu0  ;;  %v5572_v52 = vadd.f32 %v7132_v16, %v9730_v35 }
 0x4a4   : > { %v7133_v31 = vpop.f32.mrb[150].mxu0  ;;  %v5564_v33 = vadd.f32 %v9730_v35, %v5563_v39 }
 0x4a5   : > { %v5575_v12 = vadd.f32 %v7133_v31, %v9730_v35  ;;  %v5566_v46 = vpop.f32.mrb[151].mxu0 }
 0x4a6   : > { %v5567_v32 = vadd.f32 %v9730_v35, %v5566_v46 }
 0x4a7   : > { %v6417_v30 = vpack.c.bf16 %v5575_v12, %v5572_v52 }
 0x4a8   : > { %v6412_v10 = vpack.c.bf16 %v5567_v32, %v5564_v33 }
 0x4a9   : > { %6481 = vst [vmem:[%s9738_s21 + $0x18] sm:$0xff] %v6417_v30  }
 0x4aa   : > { %6480 = vst [vmem:[%s9738_s21 + $0x10] sm:$0xff] %v6412_v10   ;;  %v7136_v60 = vpop.f32.mrb[152].mxu0 }
 0x4ab   : > { %v5579_v63 = vpop.f32.mrb[153].mxu0  ;;  %v5588_v59 = vadd.f32 %v7136_v60, %v9730_v35 }
 0x4ac   : > { %v7137_v3 = vpop.f32.mrb[154].mxu0  ;;  %v5580_v2 = vadd.f32 %v9730_v35, %v5579_v63 }
 0x4ad   : > { %v5591_v44 = vadd.f32 %v7137_v3, %v9730_v35  ;;  %v5582_v51 = vpop.f32.mrb[155].mxu0 }
 0x4ae   : > { %v5583_v54 = vadd.f32 %v9730_v35, %v5582_v51 }
 0x4af   : > { %v6427_v11 = vpack.c.bf16 %v5591_v44, %v5588_v59 }
 0x4b0   : > { %v6422_v61 = vpack.c.bf16 %v5583_v54, %v5580_v2 }
 0x4b1   : > { %6483 = vst [vmem:[%s9738_s21 + $0x28] sm:$0xff] %v6427_v11  }
 0x4b2   : > { %6482 = vst [vmem:[%s9738_s21 + $0x20] sm:$0xff] %v6422_v61   ;;  %v7140_v8 = vpop.f32.mrb[156].mxu0 }
 0x4b3   : > { %v5595_v22 = vpop.f32.mrb[157].mxu0  ;;  %v5604_v40 = vadd.f32 %v7140_v8, %v9730_v35 }
 0x4b4   : > { %v7141_v6 = vpop.f32.mrb[158].mxu0  ;;  %v5596_v15 = vadd.f32 %v9730_v35, %v5595_v22 }
 0x4b5   : > { %v5607_v57 = vadd.f32 %v7141_v6, %v9730_v35  ;;  %v5598_v42 = vpop.f32.mrb[159].mxu0 }
 0x4b6   : > { %v5599_v28 = vadd.f32 %v9730_v35, %v5598_v42 }
 0x4b7   : > { %v6437_v38 = vpack.c.bf16 %v5607_v57, %v5604_v40 }
 0x4b8   : > { %v6432_v48 = vpack.c.bf16 %v5599_v28, %v5596_v15 }
 0x4b9   : > { %6485 = vst [vmem:[%s9738_s21 + $0x38] sm:$0xff] %v6437_v38  }
 0x4ba   : > { %6484 = vst [vmem:[%s9738_s21 + $0x30] sm:$0xff] %v6432_v48   ;;  %v7144_v58 = vpop.f32.mrb[160].mxu0 }
 0x4bb   : > { %v5611_v7 = vpop.f32.mrb[161].mxu0  ;;  %v5620_v29 = vadd.f32 %v7144_v58, %v9730_v35 }
 0x4bc   : > { %v7145_v13 = vpop.f32.mrb[162].mxu0  ;;  %v5612_v34 = vadd.f32 %v9730_v35, %v5611_v7 }
 0x4bd   : > { %v5623_v18 = vadd.f32 %v7145_v13, %v9730_v35  ;;  %v5614_v24 = vpop.f32.mrb[163].mxu0 }
 0x4be   : > { %v5615_v20 = vadd.f32 %v9730_v35, %v5614_v24 }
 0x4bf   : > { %v6447_v50 = vpack.c.bf16 %v5623_v18, %v5620_v29 }
 0x4c0   : > { %v6442_v56 = vpack.c.bf16 %v5615_v20, %v5612_v34 }
 0x4c1   : > { %6487 = vst [vmem:[%s9738_s21 + $0x48] sm:$0xff] %v6447_v50  }
 0x4c2   : > { %6486 = vst [vmem:[%s9738_s21 + $0x40] sm:$0xff] %v6442_v56   ;;  %v7148_v21 = vpop.f32.mrb[164].mxu0 }
 0x4c3   : > { %v5627_v5 = vpop.f32.mrb[165].mxu0  ;;  %v5636_v45 = vadd.f32 %v7148_v21, %v9730_v35 }
 0x4c4   : > { %v7149_v53 = vpop.f32.mrb[166].mxu0  ;;  %v5628_v25 = vadd.f32 %v9730_v35, %v5627_v5 }
 0x4c5   : > { %v5639_v19 = vadd.f32 %v7149_v53, %v9730_v35  ;;  %v5630_v17 = vpop.f32.mrb[167].mxu0 }
 0x4c6   : > { %v5631_v27 = vadd.f32 %v9730_v35, %v5630_v17 }
 0x4c7   : > { %v6457_v49 = vpack.c.bf16 %v5639_v19, %v5636_v45 }
 0x4c8   : > { %v6452_v41 = vpack.c.bf16 %v5631_v27, %v5628_v25 }
 0x4c9   : > { %6489 = vst [vmem:[%s9738_s21 + $0x58] sm:$0xff] %v6457_v49  }
 0x4ca   : > { %6488 = vst [vmem:[%s9738_s21 + $0x50] sm:$0xff] %v6452_v41   ;;  %v7152_v62 = vpop.f32.mrb[168].mxu0 }
 0x4cb   : > { %v5643_v4 = vpop.f32.mrb[169].mxu0  ;;  %v5652_v55 = vadd.f32 %v7152_v62, %v9730_v35 }
 0x4cc   : > { %v7153_v43 = vpop.f32.mrb[170].mxu0  ;;  %v5644_v14 = vadd.f32 %v9730_v35, %v5643_v4 }
 0x4cd   : > { %v5655_v1 = vadd.f32 %v7153_v43, %v9730_v35  ;;  %v5646_v36 = vpop.f32.mrb[171].mxu0 }
 0x4ce   : > { %v5647_v23 = vadd.f32 %v9730_v35, %v5646_v36 }
 0x4cf   : > { %v6467_v26 = vpack.c.bf16 %v5655_v1, %v5652_v55 }
 0x4d0   : > { %v6462_v47 = vpack.c.bf16 %v5647_v23, %v5644_v14 }
 0x4d1   : > { %6491 = vst [vmem:[%s9738_s21 + $0x68] sm:$0xff] %v6467_v26  }
 0x4d2   : > { %6490 = vst [vmem:[%s9738_s21 + $0x60] sm:$0xff] %v6462_v47   ;;  %v7156_v37 = vpop.f32.mrb[172].mxu0 }
 0x4d3   : > { %v5659_v0 = vpop.f32.mrb[173].mxu0  ;;  %v5668_v16 = vadd.f32 %v7156_v37, %v9730_v35 }
 0x4d4   : > { %v7157_v9 = vpop.f32.mrb[174].mxu0  ;;  %v5660_v52 = vadd.f32 %v9730_v35, %v5659_v0 }
 0x4d5   : > { %v5671_v39 = vadd.f32 %v7157_v9, %v9730_v35  ;;  %v5662_v31 = vpop.f32.mrb[175].mxu0 }
 0x4d6   : > { %v5663_v12 = vadd.f32 %v9730_v35, %v5662_v31 }
 0x4d7   : > { %v6477_v46 = vpack.c.bf16 %v5671_v39, %v5668_v16 }
 0x4d8   : > { %v6472_v33 = vpack.c.bf16 %v5663_v12, %v5660_v52 }
 0x4d9   : > { %6493 = vst [vmem:[%s9738_s21 + $0x78] sm:$0xff] %v6477_v46  }
 0x4da   : > { %6492 = vst [vmem:[%s9738_s21 + $0x70] sm:$0xff] %v6472_v33  }
 0x4db   : > { %7560 = shalt.err (!%p7557_p4)
}
 0x4dc   : > { %s7561_s10 = scalar_lea.hbm %s9787_s8, 2048  ;;  %s7565_s20 = scalar_lea.hbm %s9842_s7, 4096 }
 0x4dd   : > { %p7562_p9 = scmp.ne.s32.totalorder %s9787_s8, %s7561_s10  ;;  %p7566_p8 = scmp.lt.u32.totalorder %s9787_s8, %s9842_s7 }
 0x4de   : > { %p7567_p13 = scmp.lt.u32.totalorder %s7565_s20, %s7561_s10  ;;  %p7569_p10 = scmp.lt.u32.totalorder %s7561_s10, %s9787_s8 }
 0x4df   : > { %p7563_p0 = pnand %p7562_p9, %p7827_p5 }
 0x4e0   : > { %p7568_p6 = por %p7567_p13, %p7566_p8 }
 0x4e1   : > { %p7564_p11 = pneg %p7563_p0 }
 0x4e2   : > { %p7570_p3 = por %p7569_p10, %p7568_p6 }
 0x4e4   : > { %p7571_p7 = pnand %p7570_p3, %p7564_p11 }
 0x4e6   : > { %7574 = shalt.err (!%p7571_p7)
}
 0x4e7   : > { %s7631_s23 = smov 64   ;;  %s7632_s11 = smov 4  }
 0x4e8   : > { %7188 = dma.vmem_to_hbm [thread:$0]  (%p7827_p5), %s9789_s29, 2048, %s9787_s8, %s5835_s28, %s7631_s23, %s7631_s23, %s7632_s11  }
 0x4e9 PF: > { %s9938_s30 = sld [smem:[#allocation16_spill]]  ;;  %s5863_s9 = sand.u32 1, %s7609_s24  }
 0x4ea   : > { %p9940_p1 = scmp.ge.s32.totalorder %s7621_s27, 2  ;;  %s5864_s13 = scalar_lea.sflag [#allocation5], %s5863_s9 }
 0x4ef   : > { %p9939_p12 = scmp.ne.s32.totalorder %s9938_s30, 0 }
 0x4f1   : > { %p7205_p2 = pnand %p9940_p1, %p9939_p12 }
 0x4f3   : > { %7604 = dma.done.wait (!%p7205_p2), %s5864_s13, 2048  }
 0x4f4   : > { %7606 = vsyncadd (!%p7205_p2), %s5864_s13, 4294965248  ;;  %p22_p4 = scmp.ge.s32.totalorder %s7813_s22, 4   ;;  %s9941_s24 = smov %s7613_s25 }
 0x4f5   : > { %s9942_s25 = smov %s7617_s26  ;;  %s9943_s26 = smov %s7823_s18 }
 0x4f6   : > { %s9944_s27 = smov %s7813_s22  ;;  %24 = sbr.rel (!%p22_p4) target bundleno = 7 (0x7), region = 108 }
 0x4fd   :  { %5869 = vsyncpa [#allocation4], 1 }
 0x4fe   :  { %5871 = vsyncpa [#allocation4 + $0x1], 1 }
 0x4ff   :  { %5872 = vsyncpa [#allocation7], 1 }
 0x500   :  { %5873 = vsyncpa [#allocation10], 1 }
 0x501   :  { %5874 = vsyncpa [#allocation5], 1 }
 0x502   :  { %5876 = vsyncpa [#allocation5 + $0x1], 1 }

</bundles_post_ra>
